<compile_context>
chip_gen: v5e
topology: v5e:2x2
jax: 0.10.0
libtpu: 0.0.40
codegen_flags: <defaults>
</compile_context>

<pallas_src>
import jax
import jax.numpy as jnp
import numpy as np
from jax.experimental import pallas as pl
from jax.experimental.pallas import tpu as pltpu

LN_EPS = 1e-5


def _layer_norm(v, g, b):
    mu = jnp.mean(v, axis=-1, keepdims=True)
    var = jnp.mean((v - mu) ** 2, axis=-1, keepdims=True)
    return (v - mu) * jax.lax.rsqrt(var + LN_EPS) * g + b


# --------------------------------------------------------------------------------------
# Kernel
# --------------------------------------------------------------------------------------
def hopfield_pooling_kernel(x_ref, qT_ref, wkv_ref, mask_ref, wzT_ref, out_ref):
    Bb, Sp, Din = x_ref.shape          # batch block, padded seq (== padded quantity), input
    H, Qp = qT_ref.shape               # hidden size, padded quantity
    Dout = wzT_ref.shape[0]
    md = wkv_ref.dtype                 # matmul operand dtype (bf16 by default, cast in wrapper)
    prec = jax.lax.Precision.HIGHEST if wkv_ref.dtype == jnp.float32 else None

    # ---- LayerNorm statistics once (affines are folded into wkv in the wrapper). ----
    x = x_ref[...].reshape(Bb * Sp, Din)                          # aligned merge (Sp % 8 == 0)
    mu = jnp.mean(x, axis=-1, keepdims=True)
    xc = x - mu
    var = jnp.mean(xc * xc, axis=-1, keepdims=True)
    xn = (xc * jax.lax.rsqrt(var + LN_EPS)).astype(md)

    # ---- Fused K|V projection: ONE (Bb*Sp, Din) @ (Din, 2H) GEMM, 128-lane output. ----
    # K/V biases were eliminated algebraically (softmax shift-invariance / attn rows sum to 1).
    kv = jnp.dot(xn, wkv_ref[...], precision=prec,
                 preferred_element_type=jnp.float32)              # (Bb*Sp, 2H) f32

    # ---- Scores: plain 2-D GEMM against the (H, Qp) query table (q stays MXU-stationary,
    # no per-batch broadcast). The table already holds LN + Wq + bq + 1/sqrt(H).
    k2 = kv[:, :H].astype(md)
    scores = jnp.dot(k2, qT_ref[...], precision=prec,
                     preferred_element_type=jnp.float32)          # (Bb*Sp, Qp)
    scores = scores.reshape(Bb, Sp, Qp) + mask_ref[...][None, :, :]   # 0 / -1e30 key-pad mask

    # ---- Softmax over the stored-pattern (key) axis; exact division for parity. ----
    m = jnp.max(scores, axis=1, keepdims=True)
    p = jnp.exp(scores - m)
    attn = p / jnp.sum(p, axis=1, keepdims=True)                  # (Bb, Sp, Qp) f32

    # ---- Association readout: per-batch attn^T @ V (contract the key axis). ----
    v3 = kv[:, H:].astype(md).reshape(Bb, Sp, H)                  # aligned split
    z = jnp.einsum("bkq,bkh->bqh", attn.astype(md), v3, precision=prec,
                   preferred_element_type=jnp.float32)            # (Bb, Qp, H) f32

    # ---- Fused out_proj x head. Dout == 1 -> VPU multiply + lane reduce (no 1-col GEMM). ----
    z2 = z.reshape(Bb * Qp, H)                                    # aligned merge
    if Dout == 1:
        out_flat = jnp.sum(z2 * wzT_ref[...], axis=-1)            # (Bb*Qp,)
    else:
        out_flat = jax.lax.dot_general(
            z2, wzT_ref[...], (((1,), (1,)), ((), ())),
            preferred_element_type=jnp.float32).reshape(-1)

    # Lane-dense store: one contiguous flattened slab per grid step.
    out_ref[...] = out_flat.reshape(1, 1, Bb * Qp * Dout)


# --------------------------------------------------------------------------------------
# Wrapper
# --------------------------------------------------------------------------------------
def _tensorcores_per_chip():
    """v7x has 2 TensorCores per chip; v5e/v6e have 1 (fallback 1 if undetectable)."""
    try:
        kind = jax.devices()[0].device_kind.lower()
    except Exception:
        return 1
    return 2 if ("v7" in kind or "7x" in kind) else 1


def _pick_block_b(B, Sp, num_cores, max_rows=8192):
    """Single grid step on 1-TC chips; even >=2-step split for v7x; cap rows for VMEM."""
    divisors = [d for d in range(1, B + 1) if B % d == 0]
    fits = [d for d in divisors if d * Sp <= max_rows] or [1]
    if num_cores <= 1:
        return max(fits)
    even = [d for d in fits if (B // d) >= num_cores and (B // d) % num_cores == 0]
    return max(even) if even else max(fits)


def _fold_params(params, S, Sp, scaling, matmul_dtype):
    """Trace-time algebraic folding (runs once per call / once under jit)."""
    f32 = jnp.float32
    wk, wv, wq = (params[n].astype(f32) for n in ("wk", "wv", "wq"))
    wo, wout = params["wo"].astype(f32), params["wout"].astype(f32)

    # LayerNorm affines folded into the projections:
    #   (xn*g + b)@W + bias == xn@(g[:,None]*W) + (b@W + bias)
    wk_f = params["ln_k_g"].astype(f32)[:, None] * wk
    wv_f = params["ln_v_g"].astype(f32)[:, None] * wv
    wkv = jnp.concatenate([wk_f, wv_f], axis=1).astype(matmul_dtype)      # (Din, 2H)

    # Full K bias cancels under the key-softmax (adds a per-query constant only).
    # Full V bias passes through the attention (rows sum to 1) -> folded into b_total.
    bv_full = params["ln_v_b"].astype(f32) @ wv + params["bv"].astype(f32)  # (H,)

    # Query table: LN + Wq + bq + 1/sqrt(H), zero-padded to Qp and transposed to (H, Qp).
    q_norm = _layer_norm(params["pool_w"].astype(f32),
                         params["ln_q_g"].astype(f32), params["ln_q_b"].astype(f32))
    q = (q_norm @ wq + params["bq"].astype(f32)) * scaling                 # (Q, H)
    qT = jnp.pad(q, ((0, Sp - q.shape[0]), (0, 0))).T.astype(matmul_dtype)  # (H, Qp)

    # Fused out_proj x output head (z@Wo+bo)@Wout+bout == z@(Wo@Wout) + b_total.
    wz = wo @ wout                                                         # (H, Dout)
    wzT = wz.T                                                             # (Dout, H), f32 VPU path
    b_total = bv_full @ wz + params["bo"].astype(f32) @ wout + params["bout"].astype(f32)

    # Additive key-padding mask (compile-time constant): keys >= S get -1e30.
    mask_np = np.zeros((Sp, Sp), np.float32)
    mask_np[S:, :] = -1e30
    mask = jnp.asarray(mask_np)                                            # (Sp, Qp)
    return qT, wkv, mask, wzT, b_total


def hopfield_pooling_forward(features, params, apply_activation=False,
                             block_b=None, matmul_dtype=jnp.bfloat16):
    """Returns a list of per-target outputs (num_targets == 1 here), each (B, S, Dout)."""
    B, S, Din = features.shape
    Q = params["pool_w"].shape[0]
    assert Q == S, "HopfieldPoolingModel.forward's reshape requires seq_len == quantity"
    H = params["wq"].shape[1]
    Dout = params["wout"].shape[1]
    scaling = 1.0 / float(np.sqrt(H))          # default Hopfield scaling = 1/sqrt(hidden_size)

    Sp = ((S + 7) // 8) * 8                    # pad seq == quantity so reshapes stay aligned
    Qp = Sp

    qT, wkv, mask, wzT, b_total = _fold_params(params, S, Sp, scaling, matmul_dtype)
    x_pad = jnp.pad(features.astype(jnp.float32), ((0, 0), (0, Sp - S), (0, 0)))

    num_cores = _tensorcores_per_chip()
    Bb = block_b if block_b is not None else _pick_block_b(B, Sp, num_cores)
    assert B % Bb == 0, "block_b must divide the batch size"
    num_steps = B // Bb
    W = Bb * Qp * Dout                         # lane-dense flattened output width per step

    out = pl.pallas_call(
        hopfield_pooling_kernel,
        out_shape=jax.ShapeDtypeStruct((num_steps, 1, W), jnp.float32),
        grid=(num_steps,),
        in_specs=[
            pl.BlockSpec((Bb, Sp, Din), lambda i: (i, 0, 0)),   # per-step batch block
            pl.BlockSpec((H, Qp), lambda i: (0, 0)),            # constant blocks: DMA'd once
            pl.BlockSpec((Din, 2 * H), lambda i: (0, 0)),
            pl.BlockSpec((Sp, Qp), lambda i: (0, 0)),
            pl.BlockSpec((Dout, H), lambda i: (0, 0)),
        ],
        out_specs=pl.BlockSpec((1, 1, W), lambda i: (i, 0, 0)),  # lane-dense flattened slab
        compiler_params=pltpu.CompilerParams(dimension_semantics=("parallel",)),
    )(x_pad, qT, wkv, mask, wzT)

    out = out.reshape(B, Qp, Dout)[:, :S, :] + b_total           # drop padded queries, add bias
    if apply_activation:
        out = jax.nn.sigmoid(out)
    # TODO(synk): the torch module builds its head with in_features = quantity*input_size but
    # applies it to a (B, S, input_size) tensor; we implement the per-position head
    # (in_features = input_size) that the forward pass actually implies. num_targets = 1.
    return [out]


# --------------------------------------------------------------------------------------
# Pure-JAX reference (mirrors the torch HopfieldPooling + per-position head semantics).
# --------------------------------------------------------------------------------------
def reference_forward(features, params, apply_activation=False):
    B, S, Din = features.shape
    H = params["wq"].shape[1]
    scaling = 1.0 / float(np.sqrt(H))
    x_stored = _layer_norm(features, params["ln_k_g"], params["ln_k_b"])         # keys
    x_proj = _layer_norm(features, params["ln_v_g"], params["ln_v_b"])           # values
    x_state = _layer_norm(params["pool_w"], params["ln_q_g"], params["ln_q_b"])  # queries
    q = x_state @ params["wq"] + params["bq"]                                    # (Q, H)
    k = x_stored @ params["wk"] + params["bk"]                                   # (B, S, H)
    v = x_proj @ params["wv"] + params["bv"]                                     # (B, S, H)
    scores = scaling * jnp.einsum("qh,bkh->bqk", q, k)                           # no mask (default)
    attn = jax.nn.softmax(scores, axis=-1)
    z = jnp.einsum("bqk,bkh->bqh", attn, v)                                      # (B, Q, H)
    y = z @ params["wo"] + params["bo"]                                          # (B, Q, Din)
    inter = y.reshape(B, S, Din)                                                 # flatten + reshape (Q == S)
    out = inter @ params["wout"] + params["bout"]
    if apply_activation:
        out = jax.nn.sigmoid(out)
    return out


if __name__ == "__main__":
    # quantity == seq_len == 13 (module uses quantity=13), input_size=32, hidden_size=64,
    # output_size=1, num_targets=1, batch=8.
    B, S, Din, H, Dout = 8, 13, 32, 64, 1
    key = jax.random.PRNGKey(0)
    ks = jax.random.split(key, 14)

    features = jax.random.normal(ks[0], (B, S, Din), jnp.float32)

    def w(k, shape, scale):
        return jax.random.normal(k, shape, jnp.float32) * scale

    params = dict(
        ln_k_g=1.0 + 0.1 * jax.random.normal(ks[1], (Din,), jnp.float32),
        ln_k_b=0.05 * jax.random.normal(ks[2], (Din,), jnp.float32),
        ln_q_g=1.0 + 0.1 * jax.random.normal(ks[3], (Din,), jnp.float32),
        ln_q_b=0.05 * jax.random.normal(ks[4], (Din,), jnp.float32),
        ln_v_g=1.0 + 0.1 * jax.random.normal(ks[5], (Din,), jnp.float32),
        ln_v_b=0.05 * jax.random.normal(ks[6], (Din,), jnp.float32),
        # Trainable pooling (state pattern) weights, shape (quantity, input_size).
        pool_w=w(ks[7], (S, Din), 1.0),
        # Association-core projections, stored as (in, out).
        wq=w(ks[8], (Din, H), 0.1), bq=w(ks[9], (H,), 0.02),
        wk=w(ks[10], (Din, H), 0.1), bk=w(ks[11], (H,), 0.02),
        wv=w(ks[12], (Din, H), 0.1), bv=w(ks[13], (H,), 0.02),
        # Output projection back to input_size, then the per-target head.
        wo=w(ks[8], (H, Din), 0.1), bo=jnp.zeros((Din,), jnp.float32),
        wout=w(ks[9], (Din, Dout), 0.1), bout=jnp.zeros((Dout,), jnp.float32),
    )

    ref = reference_forward(features, params, apply_activation=False)

    # f32 matmul path: tight check validating the kernel logic and all algebraic foldings
    # (exact softmax division, bias elimination, LN-affine / out_proj+head fusion).
    outs_f32 = hopfield_pooling_forward(features, params, matmul_dtype=jnp.float32)
    jax.block_until_ready(outs_f32)
    np.testing.assert_allclose(np.asarray(outs_f32[0]), np.asarray(ref),
                               rtol=2e-3, atol=2e-4)

    # Default bf16-matmul path (full-rate MXU on v5e/v6e/v7x): loose numerical sanity check.
    outs = hopfield_pooling_forward(features, params, apply_activation=False)
    jax.block_until_ready(outs)
    np.testing.assert_allclose(np.asarray(outs[0]), np.asarray(ref),
                               rtol=1e-1, atol=2e-2)

    print("KERNEL_OK")
</pallas_src>

<mosaic_0001>
module attributes {stable_mosaic.version = 11 : i64} {
  func.func @hopfield_pooling_kernel(%arg0: i32, %arg1: memref<8x16x32xf32, #tpu.memory_space<vmem>>, %arg2: memref<64x16xf32, #tpu.memory_space<vmem>>, %arg3: memref<32x128xf32, #tpu.memory_space<vmem>>, %arg4: memref<16x16xf32, #tpu.memory_space<vmem>>, %arg5: memref<1x64xf32, #tpu.memory_space<vmem>>, %arg6: memref<1x1x128xf32, #tpu.memory_space<vmem>>) attributes {dimension_semantics = [#tpu.dimension_semantics<parallel>], iteration_bounds = array<i64: 1>, scalar_prefetch = 0 : i64, scratch_operands = 0 : i64, tpu.core_type = #tpu.core_type<tc>, window_params = [{transform_indices = @transform_0, window_bounds = array<i64: 8, 16, 32>}, {pipeline_mode = #tpu.pipeline_mode<synchronous>, transform_indices = @transform_1, window_bounds = array<i64: 64, 16>}, {pipeline_mode = #tpu.pipeline_mode<synchronous>, transform_indices = @transform_2, window_bounds = array<i64: 32, 128>}, {pipeline_mode = #tpu.pipeline_mode<synchronous>, transform_indices = @transform_3, window_bounds = array<i64: 16, 16>}, {pipeline_mode = #tpu.pipeline_mode<synchronous>, transform_indices = @transform_4, window_bounds = array<i64: 1, 64>}, {transform_indices = @transform_5, window_bounds = array<i64: 1, 1, 128>}]} {
    %c0 = arith.constant 0 : index
    %c0_0 = arith.constant 0 : index
    %c0_1 = arith.constant 0 : index
    %0 = vector.load %arg1[%c0, %c0_0, %c0_1] : memref<8x16x32xf32, #tpu.memory_space<vmem>>, vector<8x16x32xf32>
    %1 = vector.shape_cast %0 : vector<8x16x32xf32> to vector<128x32xf32>
    %cst = arith.constant dense<0.000000e+00> : vector<128xf32>
    %2 = vector.multi_reduction <add>, %1, %cst [1] : vector<128x32xf32> to vector<128xf32>
    %3 = vector.shape_cast %2 : vector<128xf32> to vector<128x1xf32>
    %cst_2 = arith.constant 3.200000e+01 : f32
    %4 = vector.broadcast %cst_2 : f32 to vector<128x1xf32>
    %5 = arith.divf %3, %4 : vector<128x1xf32>
    %6 = vector.broadcast %5 : vector<128x1xf32> to vector<128x32xf32>
    %7 = arith.subf %1, %6 : vector<128x32xf32>
    %8 = arith.mulf %7, %7 : vector<128x32xf32>
    %cst_3 = arith.constant dense<0.000000e+00> : vector<128xf32>
    %9 = vector.multi_reduction <add>, %8, %cst_3 [1] : vector<128x32xf32> to vector<128xf32>
    %10 = vector.shape_cast %9 : vector<128xf32> to vector<128x1xf32>
    %cst_4 = arith.constant 3.200000e+01 : f32
    %11 = vector.broadcast %cst_4 : f32 to vector<128x1xf32>
    %12 = arith.divf %10, %11 : vector<128x1xf32>
    %cst_5 = arith.constant 9.99999974E-6 : f32
    %13 = vector.broadcast %cst_5 : f32 to vector<128x1xf32>
    %14 = arith.addf %12, %13 : vector<128x1xf32>
    %15 = math.rsqrt %14 : vector<128x1xf32>
    %16 = vector.broadcast %15 : vector<128x1xf32> to vector<128x32xf32>
    %17 = arith.mulf %7, %16 : vector<128x32xf32>
    %c0_6 = arith.constant 0 : index
    %c0_7 = arith.constant 0 : index
    %18 = vector.load %arg3[%c0_6, %c0_7] : memref<32x128xf32, #tpu.memory_space<vmem>>, vector<32x128xf32>
    %cst_8 = arith.constant dense<0.000000e+00> : vector<128x128xf32>
    %19 = tpu.matmul %17, %18, %cst_8 {dimension_numbers = #tpu.dot_dimension_numbers<[1], [0], [0], [1], [0, 0, 1, 1], [], []>, precision = #tpu.contract_precision<fp32>} : vector<128x32xf32>, vector<32x128xf32>, vector<128x128xf32> -> vector<128x128xf32>
    %20 = vector.extract_strided_slice %19 {offsets = [0, 0], sizes = [128, 64], strides = [1, 1]} : vector<128x128xf32> to vector<128x64xf32>
    %c0_9 = arith.constant 0 : index
    %c0_10 = arith.constant 0 : index
    %21 = vector.load %arg2[%c0_9, %c0_10] : memref<64x16xf32, #tpu.memory_space<vmem>>, vector<64x16xf32>
    %cst_11 = arith.constant dense<0.000000e+00> : vector<128x16xf32>
    %22 = tpu.matmul %20, %21, %cst_11 {dimension_numbers = #tpu.dot_dimension_numbers<[1], [0], [0], [1], [0, 0, 1, 1], [], []>, precision = #tpu.contract_precision<fp32>} : vector<128x64xf32>, vector<64x16xf32>, vector<128x16xf32> -> vector<128x16xf32>
    %23 = vector.shape_cast %22 : vector<128x16xf32> to vector<8x16x16xf32>
    %c0_12 = arith.constant 0 : index
    %c0_13 = arith.constant 0 : index
    %24 = vector.load %arg4[%c0_12, %c0_13] : memref<16x16xf32, #tpu.memory_space<vmem>>, vector<16x16xf32>
    %25 = vector.shape_cast %24 : vector<16x16xf32> to vector<1x16x16xf32>
    %26 = vector.broadcast %25 : vector<1x16x16xf32> to vector<8x16x16xf32>
    %27 = arith.addf %23, %26 : vector<8x16x16xf32>
    %cst_14 = arith.constant dense<0xFF800000> : vector<8x16xf32>
    %28 = vector.multi_reduction <maximumf>, %27, %cst_14 [1] : vector<8x16x16xf32> to vector<8x16xf32>
    %29 = vector.shape_cast %28 : vector<8x16xf32> to vector<8x1x16xf32>
    %30 = vector.broadcast %29 : vector<8x1x16xf32> to vector<8x16x16xf32>
    %31 = arith.subf %27, %30 : vector<8x16x16xf32>
    %32 = math.exp %31 : vector<8x16x16xf32>
    %cst_15 = arith.constant dense<0.000000e+00> : vector<8x16xf32>
    %33 = vector.multi_reduction <add>, %32, %cst_15 [1] : vector<8x16x16xf32> to vector<8x16xf32>
    %34 = vector.shape_cast %33 : vector<8x16xf32> to vector<8x1x16xf32>
    %35 = vector.broadcast %34 : vector<8x1x16xf32> to vector<8x16x16xf32>
    %36 = arith.divf %32, %35 : vector<8x16x16xf32>
    %37 = vector.extract_strided_slice %19 {offsets = [0, 64], sizes = [128, 64], strides = [1, 1]} : vector<128x128xf32> to vector<128x64xf32>
    %38 = vector.shape_cast %37 : vector<128x64xf32> to vector<8x16x64xf32>
    "tpu.trace_start"() <{level = 10 : i32, message = "bkq,bkh->bqh"}> : () -> ()
    %cst_16 = arith.constant dense<0.000000e+00> : vector<8x16x64xf32>
    %39 = tpu.matmul %36, %38, %cst_16 {dimension_numbers = #tpu.dot_dimension_numbers<[1], [1], [2], [2], [0, 0, 0, 2, 1, 2], [0], [0]>, precision = #tpu.contract_precision<fp32>} : vector<8x16x16xf32>, vector<8x16x64xf32>, vector<8x16x64xf32> -> vector<8x16x64xf32>
    "tpu.trace_stop"() : () -> ()
    %40 = vector.shape_cast %39 : vector<8x16x64xf32> to vector<128x64xf32>
    %c0_17 = arith.constant 0 : index
    %c0_18 = arith.constant 0 : index
    %41 = vector.load %arg5[%c0_17, %c0_18] : memref<1x64xf32, #tpu.memory_space<vmem>>, vector<1x64xf32>
    %42 = vector.broadcast %41 : vector<1x64xf32> to vector<128x64xf32>
    %43 = arith.mulf %40, %42 : vector<128x64xf32>
    %cst_19 = arith.constant dense<0.000000e+00> : vector<128xf32>
    %44 = vector.multi_reduction <add>, %43, %cst_19 [1] : vector<128x64xf32> to vector<128xf32>
    %45 = vector.shape_cast %44 : vector<128xf32> to vector<1x1x128xf32>
    %c0_20 = arith.constant 0 : index
    %c0_21 = arith.constant 0 : index
    %c0_22 = arith.constant 0 : index
    %46 = vector.load %arg6[%c0_20, %c0_21, %c0_22] : memref<1x1x128xf32, #tpu.memory_space<vmem>>, vector<1x1x128xf32>
    tpu.vector_store %arg6[%c0_20, %c0_21, %c0_22], %45 {strides = array<i32>} : memref<1x1x128xf32, #tpu.memory_space<vmem>>, vector<1x1x128xf32>,
    return
  }
  func.func @transform_0(%arg0: i32) -> (i32, i32, i32) {
    %c0_i32 = arith.constant 0 : i32
    %c0_i32_0 = arith.constant 0 : i32
    %c0_i32_1 = arith.constant 0 : i32
    return %arg0, %c0_i32, %c0_i32_0 : i32, i32, i32
  }
  func.func @transform_1(%arg0: i32) -> (i32, i32) {
    %c0_i32 = arith.constant 0 : i32
    %c0_i32_0 = arith.constant 0 : i32
    %c0_i32_1 = arith.constant 0 : i32
    return %c0_i32, %c0_i32_0 : i32, i32
  }
  func.func @transform_2(%arg0: i32) -> (i32, i32) {
    %c0_i32 = arith.constant 0 : i32
    %c0_i32_0 = arith.constant 0 : i32
    %c0_i32_1 = arith.constant 0 : i32
    return %c0_i32, %c0_i32_0 : i32, i32
  }
  func.func @transform_3(%arg0: i32) -> (i32, i32) {
    %c0_i32 = arith.constant 0 : i32
    %c0_i32_0 = arith.constant 0 : i32
    %c0_i32_1 = arith.constant 0 : i32
    return %c0_i32, %c0_i32_0 : i32, i32
  }
  func.func @transform_4(%arg0: i32) -> (i32, i32) {
    %c0_i32 = arith.constant 0 : i32
    %c0_i32_0 = arith.constant 0 : i32
    %c0_i32_1 = arith.constant 0 : i32
    return %c0_i32, %c0_i32_0 : i32, i32
  }
  func.func @transform_5(%arg0: i32) -> (i32, i32, i32) {
    %c0_i32 = arith.constant 0 : i32
    %c0_i32_0 = arith.constant 0 : i32
    %c0_i32_1 = arith.constant 0 : i32
    return %arg0, %c0_i32, %c0_i32_0 : i32, i32, i32
  }
}

</mosaic_0001>

<bundles_post_ra>
// kernel: tpu_custom_call.1
= control target key start
LH: loop header
LB: loop body
LE: loop exit
PB: predicated region body
PF: predicated region fallthrough
CT: control target
= control target key end

     0   :  { %10 = vsyncpa [#allocation3], 0  ;;  %s5746_s0 = inlined_call_operand.hbm [shape: f32[8,16,32], index: 0, kind: input, shape index: {}]   ;;  %s5747_s1 = inlined_call_operand.vmem [shape: f32[64,16], index: 1, kind: input, shape index: {}]   ;;  %s5748_s2 = inlined_call_operand.vmem [shape: f32[32,128], index: 2, kind: input, shape index: {}]   ;;  %s5749_s3 = inlined_call_operand.vmem [shape: f32[16,16], index: 3, kind: input, shape index: {}]   ;;  %s5750_s4 = inlined_call_operand.vmem [shape: f32[1,64], index: 4, kind: input, shape index: {}]   ;;  %s5751_s5 = inlined_call_operand.hbm [shape: f32[1,1,128], index: 5, kind: output, shape index: {}]  }
   0x1   :  { %11 = vsyncpa [#allocation4], 0  ;;  %s16_s20 = sshll.u32 %s5746_s0, 4  ;;  %s4393_s21 = smov [#allocation2]   ;;  %s17_s20 = int_to_ptr.hbm [resolvable:$true] %s16_s20 }
   0x2   :  { %s18_s22 = sshll.u32 %s4393_s21, 4  ;;  %s4394_s23 = smov 128   ;;  %s19_s22 = int_to_ptr.vmem [resolvable:$true] %s18_s22 }
   0x3   :  { %s4395_s24 = smov 8  }
   0x4   :  { %24 = dma.hbm_to_vmem [thread:$0]  %s17_s20, 2048, %s19_s22, [#allocation3], %s4394_s23, %s4394_s23, %s4395_s24  }
   0x5   :  { %4389 = dma.done.wait [#allocation3], 2048  }
   0x6   :  { %4390 = vsyncadd [#allocation3], 4294965248  ;;  %vm53_vm0 = vcmask 261120   ;;  %v39_v0 = vld [vmem:[#allocation2 + $0x10] sm:$0xff]  ;;  %v37_v1 = vld [vmem:[#allocation2] sm:$0xff]  ;;  %v4396_v14 = vmov 32.0  }
   0x7   :  { %v4432_v2 = vld [vmem:[#allocation2 + $0x20] sm:$0xff]  ;;  %v60_v3 = vsel %vm53_vm0, %v39_v0, 0.0  ;;  %v54_v4 = vsel %vm53_vm0, %v37_v1, 0.0  ;;  %v38_v6 = vld [vmem:[#allocation2 + $0x8] sm:$0xff]  ;;  %v40_v7 = vld [vmem:[#allocation2 + $0x18] sm:$0xff]  ;;  %4259 = vrcp.f32 %v4396_v14  ;;  %s4241_s29 = sshll.u32 %s5751_s5, 4  ;;  %s4242_s29 = int_to_ptr.hbm [resolvable:$true] %s4241_s29 }
   0x8   :  { %v66_v5 = vsel %vm53_vm0, %v4432_v2, 0.0  ;;  %61 = vadd.xlane.f32.xlu1 %v60_v3  ;;  %55 = vadd.xlane.f32.xlu0 %v54_v4  ;;  %v42_v8 = vld [vmem:[#allocation2 + $0x28] sm:$0xff]  ;;  %v57_v9 = vsel %vm53_vm0, %v38_v6, 0.0  ;;  %v63_v10 = vsel %vm53_vm0, %v40_v7, 0.0  ;;  %v43_v12 = vld [vmem:[#allocation2 + $0x30] sm:$0xff]  ;;  %v4461_v39 = vld [vmem:[#allocation2 + $0x38] sm:$0xff] }
   0x9   :  { %67 = vadd.xlane.f32.xlu2 %v66_v5  ;;  %v69_v11 = vsel %vm53_vm0, %v42_v8, 0.0  ;;  %v72_v13 = vsel %vm53_vm0, %v43_v12, 0.0  ;;  %v4457_v36 = vld [vmem:[#allocation2 + $0x48] sm:$0xff]  ;;  %v75_v44 = vsel %vm53_vm0, %v4461_v39, 0.0  ;;  %v4481_v50 = vld [vmem:[#allocation2 + $0x40] sm:$0xff]  ;;  %v4491_v57 = vld [vmem:[#allocation2 + $0x50] sm:$0xff] }
   0xa   :  { %v81_v41 = vsel %vm53_vm0, %v4457_v36, 0.0  ;;  %v78_v54 = vsel %vm53_vm0, %v4481_v50, 0.0  ;;  %v4495_v59 = vld [vmem:[#allocation2 + $0x60] sm:$0xff]  ;;  %v84_v61 = vsel %vm53_vm0, %v4491_v57, 0.0  ;;  %v4511_v4 = vld [vmem:[#allocation2 + $0x68] sm:$0xff] }
   0xb   :  { %v90_v62 = vsel %vm53_vm0, %v4495_v59, 0.0  ;;  %v93_v5 = vsel %vm53_vm0, %v4511_v4, 0.0 }
   0xd   :  { %v4260_v15 = vpop.eup %4259 }
   0xe   :  { %v103_v16 = vmul.f32 32.0, %v4260_v15  ;;  %vm107_vm1 = vweird.f32 %v4260_v15 }
  0x10   :  { %58 = vadd.xlane.f32.xlu0 %v57_v9  ;;  %64 = vadd.xlane.f32.xlu1 %v63_v10  ;;  %v104_v17 = vsub.f32 1.0, %v103_v16 }
  0x11   :  { %70 = vadd.xlane.f32.xlu2 %v69_v11 }
  0x12   :  { %v105_v18 = vmul.f32 %v4260_v15, %v104_v17  ;;  %v413_v17 = vld [vmem:[%s5748_s2] sm:$0xff] }
  0x14   :  { %v106_v19 = vadd.f32 %v4260_v15, %v105_v18 }
  0x16   :  { %v4442_v20 = vsel %vm107_vm1, %v4260_v15, %v106_v19  ;;  %v483_v19 = vand.u32 4294901760, %v413_v17 }
  0x18   :  { %73 = vadd.xlane.f32.xlu1 %v72_v13  ;;  %v414_v13 = vld [vmem:[%s5748_s2 + $0x8] sm:$0xff] }
  0x19   :  { %v481_v14 = vand.u32 4294901760, %v414_v13 }
  0x1b   :  { %v639_v18 = vsub.f32 %v414_v13, %v481_v14 }
  0x7b   :  { %v62_v21 = vpop.xlane.xlu1 %61  ;;  %v56_v22 = vpop.xlane.xlu0 %55 }
  0x7c   :  { %v111_v23 = vmul.f32 %v4442_v20, %v62_v21  ;;  %v109_v24 = vmul.f32 %v4442_v20, %v56_v22  ;;  %v68_v25 = vpop.xlane.xlu2 %67 }
  0x7d   :  { %v113_v49 = vmul.f32 %v4442_v20, %v68_v25 }
  0x7e   :  { %v4446_v26 = vsub.f32 %v39_v0, %v111_v23  ;;  %v4448_v27 = vsub.f32 %v37_v1, %v109_v24  ;;  %v4506_v1 = vld [vmem:[#allocation2 + $0x58] sm:$0xff]  ;;  %v640_v23 = vand.u32 4294901760, %v639_v18  ;;  %v645_v24 = vsub.f32 %v413_v17, %v483_v19 }
  0x7f   :  { %v4486_v53 = vsub.f32 %v4432_v2, %v113_v49  ;;  %v87_v3 = vsel %vm53_vm0, %v4506_v1, 0.0 }
  0x80   :  { %v143_v28 = vmul.f32 %v4446_v26, %v4446_v26  ;;  %v141_v29 = vmul.f32 %v4448_v27, %v4448_v27 }
  0x81   :  { %v145_v58 = vmul.f32 %v4486_v53, %v4486_v53 }
  0x82   :  { %v163_v30 = vsel %vm53_vm0, %v143_v28, 0.0  ;;  %v157_v31 = vsel %vm53_vm0, %v141_v29, 0.0  ;;  %v641_v28 = vsub.f32 %v639_v18, %v640_v23  ;;  %v646_v29 = vand.u32 4294901760, %v645_v24 }
  0x83   :  { %164 = vadd.xlane.f32.xlu1 %v163_v30  ;;  %158 = vadd.xlane.f32.xlu0 %v157_v31  ;;  %v59_v32 = vpop.xlane.xlu0 %58  ;;  %v65_v33 = vpop.xlane.xlu1 %64  ;;  %v169_v63 = vsel %vm53_vm0, %v145_v58, 0.0 }
  0x84   :  { %v110_v34 = vmul.f32 %v4442_v20, %v59_v32  ;;  %v71_v35 = vpop.xlane.xlu2 %70  ;;  %v112_v37 = vmul.f32 %v4442_v20, %v65_v33  ;;  %v642_v30 = vand.u32 4294901760, %v641_v28  ;;  %v647_v31 = vsub.f32 %v645_v24, %v646_v29 }
  0x85   :  { %v114_v38 = vmul.f32 %v4442_v20, %v71_v35 }
  0x86   :  { %v4463_v40 = vsub.f32 %v38_v6, %v110_v34  ;;  %v4469_v43 = vsub.f32 %v40_v7, %v112_v37  ;;  %v416_v6 = vld [vmem:[%s5748_s2 + $0x18] sm:$0xff]  ;;  %v648_v32 = vand.u32 4294901760, %v647_v31 }
  0x87   :  { %v4467_v42 = vsub.f32 %v42_v8, %v114_v38  ;;  %v477_v7 = vand.u32 4294901760, %v416_v6  ;;  %v415_v8 = vld [vmem:[%s5748_s2 + $0x10] sm:$0xff] }
  0x88   :  { %v142_v45 = vmul.f32 %v4463_v40, %v4463_v40  ;;  %v144_v48 = vmul.f32 %v4469_v43, %v4469_v43  ;;  %v479_v10 = vand.u32 4294901760, %v415_v8 }
  0x89   :  { %v146_v47 = vmul.f32 %v4467_v42, %v4467_v42  ;;  %v627_v9 = vsub.f32 %v416_v6, %v477_v7  ;;  %833 = vmatpush.msra.mxu3 %v477_v7  ;;  %478 = vmatpush.msra.mxu0 %v477_v7 }
  0x8a   :  { %v160_v46 = vsel %vm53_vm0, %v142_v45, 0.0  ;;  %v166_v52 = vsel %vm53_vm0, %v144_v48, 0.0 }
  0x8b   :  { %82 = vadd.xlane.f32.xlu1 %v81_v41  ;;  %76 = vadd.xlane.f32.xlu0 %v75_v44  ;;  %v172_v51 = vsel %vm53_vm0, %v146_v47, 0.0  ;;  %v74_v55 = vpop.xlane.xlu1 %73  ;;  %v628_v11 = vand.u32 4294901760, %v627_v9 }
  0x8c   :  { %161 = vadd.xlane.f32.xlu2 %v160_v46  ;;  %v115_v56 = vmul.f32 %v4442_v20, %v74_v55  ;;  %729 = vmatpush.msra.mxu2 %v627_v9 }
  0x8d   :  { %835 = vmatpush.msra.mxu3 %v479_v10  ;;  %480 = vmatpush.msra.mxu0 %v479_v10  ;;  %v629_v15 = vsub.f32 %v627_v9, %v628_v11 }
  0x8e   :  { %v4497_v60 = vsub.f32 %v43_v12, %v115_v56  ;;  %v633_v12 = vsub.f32 %v415_v8, %v479_v10 }
  0x8f   :  { %837 = vmatpush.msra.mxu3 %v481_v14  ;;  %482 = vmatpush.msra.mxu0 %v481_v14  ;;  %v630_v21 = vand.u32 4294901760, %v629_v15 }
  0x90   :  { %v147_v0 = vmul.f32 %v4497_v60, %v4497_v60  ;;  %v634_v16 = vand.u32 4294901760, %v633_v12  ;;  %732 = vmatpush.msra.mxu2 %v633_v12 }
  0x91   :  { %839 = vmatpush.msra.mxu3 %v483_v19  ;;  %631 = vmatpush.msra.mxu1 %v630_v21 }
  0x92   :  { %v175_v2 = vsel %vm53_vm0, %v147_v0, 0.0  ;;  %v635_v22 = vsub.f32 %v633_v12, %v634_v16  ;;  %735 = vmatpush.msra.mxu2 %v639_v18  ;;  %484 = vmatpush.msra.mxu0 %v483_v19 }
  0x93   :  { %173 = vadd.xlane.f32.xlu1 %v172_v51  ;;  %167 = vadd.xlane.f32.xlu0 %v166_v52 }
  0x94   :  { %79 = vadd.xlane.f32.xlu2 %v78_v54  ;;  %v636_v25 = vand.u32 4294901760, %v635_v22  ;;  %738 = vmatpush.msra.mxu2 %v645_v24 }
  0x95   :  { %952 = vmatpush.msrb.mxu0 %v628_v11  ;;  %v4553_v11 = vld [vmem:[#allocation2 + $0x70] sm:$0xff] }
  0x96   :  { %637 = vmatpush.msra.mxu1 %v636_v25 }
  0x97   :  { %956 = vmatpush.msrb.mxu0 %v634_v16 }
  0x98   :  { %643 = vmatpush.msra.mxu1 %v642_v30 }
  0x99   :  { %960 = vmatpush.msrb.mxu0 %v640_v23 }
  0x9a   :  { %649 = vmatpush.msra.mxu1 %v648_v32 }
  0x9b   :  { %85 = vadd.xlane.f32.xlu0 %v84_v61  ;;  %91 = vadd.xlane.f32.xlu1 %v90_v62 }
  0x9c   :  { %170 = vadd.xlane.f32.xlu2 %v169_v63  ;;  %964 = vmatpush.msrb.mxu0 %v646_v29 }
  0x9d   :  { %1043 = vmatpush.msrb.mxu1 %v477_v7 }
  0x9f   :  { %1045 = vmatpush.msrb.mxu1 %v479_v10 }
  0xa1   :  { %1047 = vmatpush.msrb.mxu1 %v481_v14 }
  0xa3   :  { %176 = vadd.xlane.f32.xlu0 %v175_v2  ;;  %1049 = vmatpush.msrb.mxu1 %v483_v19  ;;  %v96_v19 = vsel %vm53_vm0, %v4553_v11, 0.0 }
  0xa4   :  { %88 = vadd.xlane.f32.xlu2 %v87_v3 }
  0xab   :  { %94 = vadd.xlane.f32.xlu0 %v93_v5 }
  0xf6   :  { %v165_v33 = vpop.xlane.xlu1 %164  ;;  %v159_v34 = vpop.xlane.xlu0 %158 }
  0xf7   :  { %v207_v35 = vmul.f32 %v165_v33, %v4442_v20  ;;  %v205_v37 = vmul.f32 %v159_v34, %v4442_v20 }
  0xf9   :  { %v223_v38 = vadd.f32 1e-05, %v207_v35  ;;  %v221_v41 = vadd.f32 1e-05, %v205_v37 }
  0xfb   :  { %4261 = vrsqrt.f32 %v223_v38  ;;  %vm263_vm2 = vweird.f32 %v223_v38  ;;  %vm243_vm5 = vweird.f32 %v221_v41 }
  0xfc   :  { %4263 = vrsqrt.f32 %v221_v41 }
  0xfe   :  { %v83_v44 = vpop.xlane.xlu1 %82  ;;  %v77_v45 = vpop.xlane.xlu0 %76 }
  0xff   :  { %v118_v46 = vmul.f32 %v4442_v20, %v83_v44  ;;  %v162_v47 = vpop.xlane.xlu2 %161  ;;  %v116_v48 = vmul.f32 %v4442_v20, %v77_v45 }
 0x100   :  { %v206_v49 = vmul.f32 %v162_v47, %v4442_v20 }
 0x101   :  { %v4532_v51 = vpop.eup %4261  ;;  %v4535_v52 = vsub.f32 %v4457_v36, %v118_v46  ;;  %v4538_v54 = vsub.f32 %v4461_v39, %v116_v48 }
 0x102   :  { %v4264_v55 = vpop.eup %4263  ;;  %v258_v56 = vmul.f32 %v4532_v51, %v223_v38  ;;  %v4541_v58 = vadd.f32 1e-05, %v206_v49  ;;  %vm264_vm3 = vweird.f32 %v4532_v51 }
 0x103   :  { %v238_v61 = vmul.f32 %v4264_v55, %v221_v41  ;;  %v150_v62 = vmul.f32 %v4535_v52, %v4535_v52  ;;  %v148_v63 = vmul.f32 %v4538_v54, %v4538_v54  ;;  %vm244_vm4 = vweird.f32 %v4264_v55  ;;  %vm4567_vm6 = vmor %vm263_vm2, %vm264_vm3 }
 0x104   :  { %v259_v0 = vmul.f32 %v4532_v51, %v258_v56  ;;  %4265 = vrsqrt.f32 %v4541_v58  ;;  %vm245_vm7 = vmor %vm243_vm5, %vm244_vm4  ;;  %vm253_vm9 = vweird.f32 %v4541_v58 }
 0x105   :  { %v239_v36 = vmul.f32 %v4264_v55, %v238_v61  ;;  %v184_v39 = vsel %vm53_vm0, %v150_v62, 0.0  ;;  %v178_v2 = vsel %vm53_vm0, %v148_v63, 0.0 }
 0x106   :  { %v260_v3 = vmul.f32 0.5, %v259_v0  ;;  %v174_v5 = vpop.xlane.xlu1 %173  ;;  %185 = vadd.xlane.f32.xlu0 %v184_v39  ;;  %179 = vadd.xlane.f32.xlu2 %v178_v2  ;;  %v168_v6 = vpop.xlane.xlu0 %167 }
 0x107   :  { %v240_v7 = vmul.f32 0.5, %v239_v36  ;;  %v210_v8 = vmul.f32 %v174_v5, %v4442_v20  ;;  %v80_v9 = vpop.xlane.xlu2 %79  ;;  %v208_v10 = vmul.f32 %v168_v6, %v4442_v20 }
 0x108   :  { %v261_v12 = vsub.f32 1.5, %v260_v3  ;;  %v117_v13 = vmul.f32 %v4442_v20, %v80_v9 }
 0x109   :  { %v241_v14 = vsub.f32 1.5, %v240_v7  ;;  %v4557_v15 = vadd.f32 1e-05, %v210_v8  ;;  %v4559_v16 = vadd.f32 1e-05, %v208_v10 }
 0x10a   :  { %v4266_v17 = vpop.eup %4265  ;;  %v4562_v18 = vsub.f32 %v4481_v50, %v117_v13  ;;  %v262_v21 = vmul.f32 %v4532_v51, %v261_v12 }
 0x10b   :  { %v242_v23 = vmul.f32 %v4264_v55, %v241_v14  ;;  %v248_v24 = vmul.f32 %v4266_v17, %v4541_v58  ;;  %4267 = vrsqrt.f32 %v4557_v15  ;;  %vm254_vm8 = vweird.f32 %v4266_v17 }
 0x10c   :  { %4269 = vrsqrt.f32 %v4559_v16  ;;  %v149_v28 = vmul.f32 %v4562_v18, %v4562_v18  ;;  %v266_v32 = vsel %vm4567_vm6, %v4532_v51, %v262_v21  ;;  %vm255_vm10 = vmor %vm253_vm9, %vm254_vm8  ;;  %vm273_vm11 = vweird.f32 %v4559_v16 }
 0x10d   :  { %v246_v25 = vsel %vm245_vm7, %v4264_v55, %v242_v23  ;;  %v249_v50 = vmul.f32 %v4266_v17, %v248_v24  ;;  %v399_v49 = vmul.f32 %v266_v32, %v4446_v26  ;;  %v4595_v55 = vld [vmem:[#allocation2 + $0x78] sm:$0xff]  ;;  %vm293_vm1 = vweird.f32 %v4557_v15 }
 0x10e   :  { %v397_v29 = vmul.f32 %v246_v25, %v4448_v27  ;;  %97 = vadd.xlane.f32.xlu2 %v96_v19  ;;  %v86_v30 = vpop.xlane.xlu0 %85  ;;  %v92_v31 = vpop.xlane.xlu1 %91  ;;  %v181_v34 = vsel %vm53_vm0, %v149_v28, 0.0  ;;  %v99_v36 = vsel %vm53_vm0, %v4595_v55, 0.0 }
 0x10f   :  { %v250_v33 = vmul.f32 0.5, %v249_v50  ;;  %v171_v35 = vpop.xlane.xlu2 %170  ;;  %v119_v37 = vmul.f32 %v4442_v20, %v86_v30  ;;  %182 = vadd.xlane.f32.xlu1 %v181_v34  ;;  %v121_v27 = vmul.f32 %v4442_v20, %v92_v31 }
 0x110   :  { %v209_v38 = vmul.f32 %v171_v35, %v4442_v20  ;;  %v418_v41 = vsel %vm53_vm0, %v397_v29, 0 }
 0x111   :  { %v4585_v44 = vpop.eup %4267  ;;  %v251_v45 = vsub.f32 1.5, %v250_v33  ;;  %v4588_v46 = vsub.f32 %v4491_v57, %v119_v37  ;;  %v4590_v47 = vand.u32 4294901760, %v418_v41  ;;  %v4605_v26 = vsub.f32 %v4495_v59, %v121_v27 }
 0x112   :  { %v4270_v48 = vpop.eup %4269  ;;  %v4593_v51 = vadd.f32 1e-05, %v209_v38  ;;  %v288_v57 = vmul.f32 %v4585_v44, %v4557_v15  ;;  %v424_v59 = vsel %vm53_vm0, %v399_v49, 0  ;;  %vm294_vm2 = vweird.f32 %v4585_v44 }
 0x113   :  { %v252_v56 = vmul.f32 %v4266_v17, %v251_v45  ;;  %v268_v61 = vmul.f32 %v4270_v48, %v4559_v16  ;;  %651 = vmatmul.f32.vlgmr.msra.gmra.mxu1 %v4590_v47  ;;  %v486_v62 = vsub.f32 %v418_v41, %v4590_v47  ;;  %v151_v63 = vmul.f32 %v4588_v46, %v4588_v46  ;;  %vm4660_vm4 = vmor %vm293_vm1, %vm294_vm2 }
 0x114   :  { %4271 = vrsqrt.f32 %v4593_v51  ;;  %vm274_vm12 = vweird.f32 %v4270_v48  ;;  %v289_v10 = vmul.f32 %v4585_v44, %v288_v57  ;;  %v153_v13 = vmul.f32 %v4605_v26, %v4605_v26 }
 0x115   :  { %v256_v0 = vsel %vm255_vm10, %v4266_v17, %v252_v56  ;;  %v269_v58 = vmul.f32 %v4270_v48, %v268_v61  ;;  %741 = vmatmul.f32.vlgmr.msra.gmra.mxu2 %v486_v62  ;;  %v487_v39 = vand.u32 4294901760, %v486_v62  ;;  %v187_v3 = vsel %vm53_vm0, %v151_v63, 0.0  ;;  %vm275_vm13 = vmor %vm273_vm11, %vm274_vm12 }
 0x116   :  { %v398_v2 = vmul.f32 %v256_v0, %v4463_v40  ;;  %v177_v5 = vpop.xlane.xlu0 %176  ;;  %188 = vadd.xlane.f32.xlu2 %v187_v3  ;;  %v4631_v24 = vand.u32 4294901760, %v424_v59  ;;  %v290_v28 = vmul.f32 0.5, %v289_v10  ;;  %vm283_vm14 = vweird.f32 %v4593_v51 }
 0x117   :  { %v270_v6 = vmul.f32 0.5, %v269_v58  ;;  %v89_v7 = vpop.xlane.xlu2 %88  ;;  %843 = vmatmul.f32.vlgmr.msra.gmra.mxu3 %v487_v39  ;;  %v211_v8 = vmul.f32 %v177_v5, %v4442_v20  ;;  %v488_v9 = vsub.f32 %v486_v62, %v487_v39  ;;  %100 = vadd.xlane.f32.xlu1 %v99_v36 }
 0x118   :  { %v120_v40 = vmul.f32 %v4442_v20, %v89_v7  ;;  %v421_v12 = vsel %vm53_vm0, %v398_v2, 0  ;;  %v502_v37 = vsub.f32 %v424_v59, %v4631_v24  ;;  %v291_v27 = vsub.f32 1.5, %v290_v28 }
 0x119   :  { %v271_v14 = vsub.f32 1.5, %v270_v6  ;;  %v4621_v17 = vadd.f32 1e-05, %v211_v8  ;;  %v489_v19 = vand.u32 4294901760, %v488_v9  ;;  %v4623_v21 = vand.u32 4294901760, %v421_v12 }
 0x11a   :  { %v4272_v22 = vpop.eup %4271  ;;  %v4629_v23 = vsub.f32 %v4506_v1, %v120_v40  ;;  %v193_v1 = vsel %vm53_vm0, %v153_v13, 0.0  ;;  %v503_v62 = vand.u32 4294901760, %v502_v37  ;;  %v292_v58 = vmul.f32 %v4585_v44, %v291_v27 }
 0x11b   :  { %v272_v25 = vmul.f32 %v4270_v48, %v271_v14  ;;  %v278_v50 = vmul.f32 %v4272_v22, %v4593_v51  ;;  %4273 = vrsqrt.f32 %v4621_v17  ;;  %490 = vmatmul.f32.vlgmr.msra.gmra.mxu0 %v489_v19  ;;  %655 = vmatmul.f32.gmra.mxu1 %v4623_v21  ;;  %v494_v29 = vsub.f32 %v421_v12, %v4623_v21 }
 0x11c   :  { %v152_v16 = vmul.f32 %v4629_v23, %v4629_v23  ;;  %vm284_vm15 = vweird.f32 %v4272_v22  ;;  %v504_v59 = vsub.f32 %v502_v37, %v503_v62  ;;  %v296_v7 = vsel %vm4660_vm4, %v4585_v44, %v292_v58 }
 0x11d   :  { %v276_v30 = vsel %vm275_vm13, %v4270_v48, %v272_v25  ;;  %v279_v31 = vmul.f32 %v4272_v22, %v278_v50  ;;  %746 = vmatmul.f32.gmra.mxu2 %v494_v29  ;;  %v495_v34 = vand.u32 4294901760, %v494_v29  ;;  %vm285_vm3 = vmor %vm283_vm14, %vm284_vm15  ;;  %vm303_vm5 = vweird.f32 %v4621_v17 }
 0x11e   :  { %v400_v32 = vmul.f32 %v276_v30, %v4469_v43  ;;  %v190_v33 = vsel %vm53_vm0, %v152_v16, 0.0  ;;  %v95_v35 = vpop.xlane.xlu0 %94  ;;  %v505_v9 = vand.u32 4294901760, %v504_v59  ;;  %v402_v40 = vmul.f32 %v296_v7, %v4467_v42 }
 0x11f   :  { %v280_v38 = vmul.f32 0.5, %v279_v31  ;;  %191 = vadd.xlane.f32.xlu0 %v190_v33  ;;  %v122_v41 = vmul.f32 %v4442_v20, %v95_v35  ;;  %194 = vadd.xlane.f32.xlu1 %v193_v1  ;;  %v496_v45 = vsub.f32 %v494_v29, %v495_v34 }
 0x120   :  { %849 = vmatmul.f32.gmra.mxu3 %v495_v34  ;;  %v427_v43 = vsel %vm53_vm0, %v400_v32, 0  ;;  %v433_v14 = vsel %vm53_vm0, %v402_v40, 0 }
 0x121   :  { %v4274_v48 = vpop.eup %4273  ;;  %v281_v49 = vsub.f32 1.5, %v280_v38  ;;  %v4649_v56 = vsub.f32 %v4511_v4, %v122_v41  ;;  %v497_v61 = vand.u32 4294901760, %v496_v45  ;;  %v4652_v57 = vand.u32 4294901760, %v427_v43 }
 0x122   :  { %v298_v51 = vmul.f32 %v4274_v48, %v4621_v17  ;;  %vm304_vm6 = vweird.f32 %v4274_v48  ;;  %v4678_v25 = vand.u32 4294901760, %v433_v14 }
 0x123   :  { %v282_v63 = vmul.f32 %v4272_v22, %v281_v49  ;;  %659 = vmatmul.f32.gmra.mxu1 %v4631_v24  ;;  %v154_v0 = vmul.f32 %v4649_v56, %v4649_v56  ;;  %498 = vmatmul.f32.gmra.mxu0 %v497_v61  ;;  %v510_v6 = vsub.f32 %v427_v43, %v4652_v57  ;;  %vm305_vm7 = vmor %vm303_vm5, %vm304_vm6 }
 0x124   :  { %v299_v36 = vmul.f32 %v4274_v48, %v298_v51  ;;  %v526_v28 = vsub.f32 %v433_v14, %v4678_v25 }
 0x125   :  { %v286_v39 = vsel %vm285_vm3, %v4272_v22, %v282_v63  ;;  %v196_v2 = vsel %vm53_vm0, %v154_v0, 0.0  ;;  %751 = vmatmul.f32.gmra.mxu2 %v502_v37  ;;  %v511_v10 = vand.u32 4294901760, %v510_v6 }
 0x126   :  { %v401_v3 = vmul.f32 %v286_v39, %v4486_v53  ;;  %v300_v5 = vmul.f32 0.5, %v299_v36  ;;  %197 = vadd.xlane.f32.xlu2 %v196_v2  ;;  %v527_v30 = vand.u32 4294901760, %v526_v28 }
 0x127   :  { %v512_v44 = vsub.f32 %v510_v6, %v511_v10 }
 0x128   :  { %v301_v15 = vsub.f32 1.5, %v300_v5  ;;  %855 = vmatmul.f32.gmra.mxu3 %v503_v62  ;;  %v430_v8 = vsel %vm53_vm0, %v401_v3, 0  ;;  %v528_v1 = vsub.f32 %v526_v28, %v527_v30 }
 0x129   :  { %v4672_v53 = vand.u32 4294901760, %v430_v8  ;;  %v513_v17 = vand.u32 4294901760, %v512_v44 }
 0x12a   :  { %v302_v12 = vmul.f32 %v4274_v48, %v301_v15  ;;  %v529_v32 = vand.u32 4294901760, %v528_v1 }
 0x12b   :  { %663 = vmatmul.f32.gmra.mxu1 %v4652_v57  ;;  %506 = vmatmul.f32.gmra.mxu0 %v505_v9  ;;  %v518_v13 = vsub.f32 %v430_v8, %v4672_v53 }
 0x12c   :  { %v306_v19 = vsel %vm305_vm7, %v4274_v48, %v302_v12 }
 0x12d   :  { %756 = vmatmul.f32.gmra.mxu2 %v510_v6  ;;  %v519_v22 = vand.u32 4294901760, %v518_v13  ;;  %v403_v50 = vmul.f32 %v306_v19, %v4497_v60 }
 0x12f   :  { %v520_v42 = vsub.f32 %v518_v13, %v519_v22  ;;  %v436_v29 = vsel %vm53_vm0, %v403_v50, 0 }
 0x130   :  { %861 = vmatmul.f32.gmra.mxu3 %v511_v10  ;;  %v4684_v31 = vand.u32 4294901760, %v436_v29 }
 0x131   :  { %v521_v16 = vand.u32 4294901760, %v520_v42 }
 0x132   :  { %v534_v60 = vsub.f32 %v436_v29, %v4684_v31 }
 0x133   :  { %667 = vmatmul.f32.gmra.mxu1 %v4672_v53  ;;  %514 = vmatmul.f32.gmra.mxu0 %v513_v17 }
 0x134   :  { %v535_v33 = vand.u32 4294901760, %v534_v60 }
 0x135   :  { %761 = vmatmul.f32.gmra.mxu2 %v518_v13 }
 0x136   :  { %v536_v34 = vsub.f32 %v534_v60, %v535_v33 }
 0x138   :  { %867 = vmatmul.f32.gmra.mxu3 %v519_v22  ;;  %v537_v35 = vand.u32 4294901760, %v536_v34 }
 0x13b   :  { %671 = vmatmul.f32.gmra.mxu1 %v4678_v25  ;;  %522 = vmatmul.f32.gmra.mxu0 %v521_v16 }
 0x13d   :  { %766 = vmatmul.f32.gmra.mxu2 %v526_v28 }
 0x140   :  { %873 = vmatmul.f32.gmra.mxu3 %v527_v30 }
 0x143   :  { %675 = vmatmul.f32.gmra.mxu1 %v4684_v31  ;;  %530 = vmatmul.f32.gmra.mxu0 %v529_v32 }
 0x145   :  { %771 = vmatmul.f32.gmra.mxu2 %v534_v60 }
 0x148   :  { %879 = vmatmul.f32.gmra.mxu3 %v535_v33 }
 0x14b   :  { %538 = vmatmul.f32.gmra.mxu0 %v537_v35 }
 0x179   :  { %v180_v37 = vpop.xlane.xlu2 %179  ;;  %v186_v38 = vpop.xlane.xlu0 %185 }
 0x17a   :  { %v212_v41 = vmul.f32 %v180_v37, %v4442_v20  ;;  %v214_v27 = vmul.f32 %v186_v38, %v4442_v20 }
 0x17c   :  { %v228_v45 = vadd.f32 1e-05, %v212_v41  ;;  %v230_v43 = vadd.f32 1e-05, %v214_v27 }
 0x17e   :  { %4275 = vrsqrt.f32 %v228_v45  ;;  %vm333_vm9 = vweird.f32 %v230_v43  ;;  %vm313_vm11 = vweird.f32 %v228_v45 }
 0x17f   :  { %4277 = vrsqrt.f32 %v230_v43 }
 0x181   :  { %v98_v48 = vpop.xlane.xlu2 %97 }
 0x182   :  { %v123_v49 = vmul.f32 %v4442_v20, %v98_v48  ;;  %v183_v51 = vpop.xlane.xlu1 %182 }
 0x183   :  { %v213_v62 = vmul.f32 %v183_v51, %v4442_v20 }
 0x184   :  { %v4276_v61 = vpop.eup %4275  ;;  %v4694_v63 = vsub.f32 %v4553_v11, %v123_v49 }
 0x185   :  { %v4278_v0 = vpop.eup %4277  ;;  %v308_v58 = vmul.f32 %v4276_v61, %v228_v45  ;;  %v229_v4 = vadd.f32 1e-05, %v213_v62  ;;  %vm314_vm8 = vweird.f32 %v4276_v61 }
 0x186   :  { %v328_v36 = vmul.f32 %v4278_v0, %v230_v43  ;;  %v155_v39 = vmul.f32 %v4694_v63, %v4694_v63  ;;  %vm334_vm10 = vweird.f32 %v4278_v0  ;;  %vm315_vm12 = vmor %vm313_vm11, %vm314_vm8 }
 0x187   :  { %v309_v2 = vmul.f32 %v4276_v61, %v308_v58  ;;  %4279 = vrsqrt.f32 %v229_v4  ;;  %vm4704_vm13 = vmor %vm333_vm9, %vm334_vm10  ;;  %vm323_vm15 = vweird.f32 %v229_v4 }
 0x188   :  { %v329_v3 = vmul.f32 %v4278_v0, %v328_v36  ;;  %v199_v5 = vsel %vm53_vm0, %v155_v39, 0.0 }
 0x189   :  { %v310_v59 = vmul.f32 0.5, %v309_v2  ;;  %200 = vadd.xlane.f32.xlu0 %v199_v5  ;;  %v189_v7 = vpop.xlane.xlu2 %188 }
 0x18a   :  { %v330_v6 = vmul.f32 0.5, %v329_v3  ;;  %v101_v11 = vpop.xlane.xlu1 %100  ;;  %v215_v8 = vmul.f32 %v189_v7, %v4442_v20 }
 0x18b   :  { %v311_v15 = vsub.f32 1.5, %v310_v59  ;;  %v124_v10 = vmul.f32 %v4442_v20, %v101_v11 }
 0x18c   :  { %v331_v9 = vsub.f32 1.5, %v330_v6  ;;  %v231_v12 = vadd.f32 1e-05, %v215_v8 }
 0x18d   :  { %v312_v40 = vmul.f32 %v4276_v61, %v311_v15  ;;  %v4280_v44 = vpop.eup %4279  ;;  %v4702_v14 = vsub.f32 %v4595_v55, %v124_v10 }
 0x18e   :  { %v332_v13 = vmul.f32 %v4278_v0, %v331_v9  ;;  %v318_v22 = vmul.f32 %v4280_v44, %v229_v4  ;;  %4281 = vrsqrt.f32 %v231_v12  ;;  %vm324_vm14 = vweird.f32 %v4280_v44 }
 0x18f   :  { %v316_v19 = vsel %vm315_vm12, %v4276_v61, %v312_v40  ;;  %v156_v42 = vmul.f32 %v4702_v14, %v4702_v14  ;;  %vm325_vm1 = vmor %vm323_vm15, %vm324_vm14  ;;  %vm343_vm2 = vweird.f32 %v231_v12 }
 0x190   :  { %v404_v50 = vmul.f32 %v316_v19, %v4538_v54  ;;  %v319_v28 = vmul.f32 %v4280_v44, %v318_v22  ;;  %v336_v29 = vsel %vm4704_vm13, %v4278_v0, %v332_v13 }
 0x191   :  { %v202_v16 = vsel %vm53_vm0, %v156_v42, 0.0  ;;  %v406_v35 = vmul.f32 %v336_v29, %v4535_v52 }
 0x192   :  { %v192_v55 = vpop.xlane.xlu0 %191  ;;  %v439_v30 = vsel %vm53_vm0, %v404_v50, 0  ;;  %v320_v1 = vmul.f32 0.5, %v319_v28  ;;  %203 = vadd.xlane.f32.xlu1 %v202_v16  ;;  %v195_v60 = vpop.xlane.xlu1 %194 }
 0x193   :  { %v216_v32 = vmul.f32 %v192_v55, %v4442_v20  ;;  %v4716_v33 = vand.u32 4294901760, %v439_v30  ;;  %v217_v54 = vmul.f32 %v195_v60, %v4442_v20  ;;  %v445_v62 = vsel %vm53_vm0, %v406_v35, 0 }
 0x194   :  { %v4282_v34 = vpop.eup %4281  ;;  %v321_v37 = vsub.f32 1.5, %v320_v1  ;;  %v4732_v5 = vand.u32 4294901760, %v445_v62 }
 0x195   :  { %v232_v38 = vadd.f32 1e-05, %v216_v32  ;;  %679 = vmatmul.f32.gmra.mxu1 %v4716_v33  ;;  %v542_v41 = vsub.f32 %v439_v30, %v4716_v33  ;;  %v338_v27 = vmul.f32 %v4282_v34, %v231_v12  ;;  %v4722_v45 = vadd.f32 1e-05, %v217_v54 }
 0x196   :  { %v322_v43 = vmul.f32 %v4280_v44, %v321_v37  ;;  %vm344_vm3 = vweird.f32 %v4282_v34  ;;  %v558_v40 = vsub.f32 %v445_v62, %v4732_v5 }
 0x197   :  { %4283 = vrsqrt.f32 %v232_v38  ;;  %776 = vmatmul.f32.gmra.mxu2 %v542_v41  ;;  %v543_v48 = vand.u32 4294901760, %v542_v41  ;;  %v339_v49 = vmul.f32 %v4282_v34, %v338_v27  ;;  %vm345_vm4 = vmor %vm343_vm2, %vm344_vm3  ;;  %vm353_vm5 = vweird.f32 %v232_v38 }
 0x198   :  { %4285 = vrsqrt.f32 %v4722_v45  ;;  %v326_v52 = vsel %vm325_vm1, %v4280_v44, %v322_v43  ;;  %vm363_vm7 = vweird.f32 %v4722_v45  ;;  %v559_v29 = vand.u32 4294901760, %v558_v40 }
 0x199   :  { %885 = vmatmul.f32.gmra.mxu3 %v543_v48  ;;  %v198_v51 = vpop.xlane.xlu2 %197  ;;  %v544_v61 = vsub.f32 %v542_v41, %v543_v48  ;;  %v405_v0 = vmul.f32 %v326_v52, %v4562_v18  ;;  %v340_v58 = vmul.f32 0.5, %v339_v49 }
 0x19a   :  { %v218_v36 = vmul.f32 %v198_v51, %v4442_v20  ;;  %v560_v35 = vsub.f32 %v558_v40, %v559_v29 }
 0x19b   :  { %v545_v4 = vand.u32 4294901760, %v544_v61  ;;  %v341_v39 = vsub.f32 1.5, %v340_v58  ;;  %v442_v3 = vsel %vm53_vm0, %v405_v0, 0 }
 0x19c   :  { %v4729_v2 = vadd.f32 1e-05, %v218_v36  ;;  %v4735_v6 = vand.u32 4294901760, %v442_v3  ;;  %v561_v48 = vand.u32 4294901760, %v560_v35  ;;  %v4781_v35 = vpop.f32.mrf.mxu0 }
 0x19d   :  { %v4284_v59 = vpop.eup %4283  ;;  %546 = vmatmul.f32.gmra.mxu0 %v545_v4  ;;  %v342_v18 = vmul.f32 %v4282_v34, %v341_v39 }
 0x19e   :  { %v4286_v7 = vpop.eup %4285  ;;  %v348_v15 = vmul.f32 %v4284_v59, %v232_v38  ;;  %4287 = vrsqrt.f32 %v4729_v2  ;;  %683 = vmatmul.f32.gmra.mxu1 %v4735_v6  ;;  %v550_v8 = vsub.f32 %v442_v3, %v4735_v6  ;;  %vm354_vm6 = vweird.f32 %v4284_v59 }
 0x19f   :  { %v358_v11 = vmul.f32 %v4286_v7, %v4722_v45  ;;  %v346_v9 = vsel %vm345_vm4, %v4282_v34, %v342_v18  ;;  %vm364_vm8 = vweird.f32 %v4286_v7  ;;  %vm355_vm9 = vmor %vm353_vm5, %vm354_vm6  ;;  %vm373_vm11 = vweird.f32 %v4729_v2 }
 0x1a0   :  { %v349_v10 = vmul.f32 %v4284_v59, %v348_v15  ;;  %v407_v12 = vmul.f32 %v346_v9, %v4588_v46  ;;  %781 = vmatmul.f32.gmra.mxu2 %v550_v8  ;;  %v551_v13 = vand.u32 4294901760, %v550_v8  ;;  %vm4749_vm10 = vmor %vm363_vm7, %vm364_vm8  ;;  %vm1892_vm5 = vcmask 130048  }
 0x1a1   :  { %v359_v44 = vmul.f32 %v4286_v7, %v358_v11 }
 0x1a2   :  { %v350_v19 = vmul.f32 0.5, %v349_v10  ;;  %891 = vmatmul.f32.gmra.mxu3 %v551_v13  ;;  %v552_v22 = vsub.f32 %v550_v8, %v551_v13  ;;  %v448_v50 = vsel %vm53_vm0, %v407_v12, 0 }
 0x1a3   :  { %v360_v17 = vmul.f32 0.5, %v359_v44  ;;  %v4746_v30 = vand.u32 4294901760, %v448_v50 }
 0x1a4   :  { %v4288_v42 = vpop.eup %4287  ;;  %v351_v28 = vsub.f32 1.5, %v350_v19  ;;  %v553_v55 = vand.u32 4294901760, %v552_v22 }
 0x1a5   :  { %v361_v16 = vsub.f32 1.5, %v360_v17  ;;  %v368_v46 = vmul.f32 %v4288_v42, %v4729_v2  ;;  %v566_v41 = vsub.f32 %v448_v50, %v4746_v30  ;;  %vm374_vm12 = vweird.f32 %v4288_v42 }
 0x1a6   :  { %v352_v1 = vmul.f32 %v4284_v59, %v351_v28  ;;  %554 = vmatmul.f32.gmra.mxu0 %v553_v55  ;;  %687 = vmatmul.f32.gmra.mxu1 %v4732_v5  ;;  %vm375_vm13 = vmor %vm373_vm11, %vm374_vm12 }
 0x1a7   :  { %v362_v60 = vmul.f32 %v4286_v7, %v361_v16  ;;  %v369_v32 = vmul.f32 %v4288_v42, %v368_v46  ;;  %v567_v49 = vand.u32 4294901760, %v566_v41  ;;  %v4778_v16 = vpop.f32.mrf.mxu1 }
 0x1a8   :  { %v356_v34 = vsel %vm355_vm9, %v4284_v59, %v352_v1  ;;  %786 = vmatmul.f32.gmra.mxu2 %v558_v40 }
 0x1a9   :  { %v408_v37 = vmul.f32 %v356_v34, %v4629_v23  ;;  %v370_v38 = vmul.f32 0.5, %v369_v32  ;;  %v366_v27 = vsel %vm4749_vm10, %v4286_v7, %v362_v60  ;;  %v568_v61 = vsub.f32 %v566_v41, %v567_v49 }
 0x1aa   :  { %897 = vmatmul.f32.gmra.mxu3 %v559_v29  ;;  %v409_v23 = vmul.f32 %v366_v27, %v4605_v26 }
 0x1ab   :  { %v371_v45 = vsub.f32 1.5, %v370_v38  ;;  %v451_v43 = vsel %vm53_vm0, %v408_v37, 0  ;;  %v569_v36 = vand.u32 4294901760, %v568_v61  ;;  %v4791_v61 = vpop.f32.mrf.mxu0 }
 0x1ac   :  { %v4759_v52 = vand.u32 4294901760, %v451_v43  ;;  %v454_v0 = vsel %vm53_vm0, %v409_v23, 0 }
 0x1ad   :  { %v372_v51 = vmul.f32 %v4288_v42, %v371_v45  ;;  %v4765_v39 = vand.u32 4294901760, %v454_v0 }
 0x1ae   :  { %562 = vmatmul.f32.gmra.mxu0 %v561_v48  ;;  %691 = vmatmul.f32.gmra.mxu1 %v4746_v30  ;;  %v574_v62 = vsub.f32 %v451_v43, %v4759_v52 }
 0x1af   :  { %v376_v58 = vsel %vm375_vm13, %v4288_v42, %v372_v51  ;;  %v582_v3 = vsub.f32 %v454_v0, %v4765_v39 }
 0x1b0   :  { %791 = vmatmul.f32.gmra.mxu2 %v566_v41  ;;  %v575_v4 = vand.u32 4294901760, %v574_v62  ;;  %v410_v2 = vmul.f32 %v376_v58, %v4649_v56  ;;  %v4786_v41 = vpop.f32.mrf.mxu1 }
 0x1b1   :  { %v583_v18 = vand.u32 4294901760, %v582_v3 }
 0x1b2   :  { %903 = vmatmul.f32.gmra.mxu3 %v567_v49  ;;  %v576_v26 = vsub.f32 %v574_v62, %v575_v4  ;;  %v457_v59 = vsel %vm53_vm0, %v410_v2, 0 }
 0x1b3   :  { %v4771_v15 = vand.u32 4294901760, %v457_v59  ;;  %v584_v11 = vsub.f32 %v582_v3, %v583_v18 }
 0x1b4   :  { %v577_v7 = vand.u32 4294901760, %v576_v26 }
 0x1b5   :  { %v590_v56 = vsub.f32 %v457_v59, %v4771_v15  ;;  %v585_v8 = vand.u32 4294901760, %v584_v11  ;;  %v4815_v11 = vpop.f32.mrf.mxu0 }
 0x1b6   :  { %570 = vmatmul.f32.gmra.mxu0 %v569_v36  ;;  %695 = vmatmul.f32.gmra.mxu1 %v4759_v52  ;;  %v1122_v36 = vld [vmem:[%s5747_s1 + $0x38] sm:$0xff] }
 0x1b7   :  { %v591_v9 = vand.u32 4294901760, %v590_v56  ;;  %v4803_v2 = vand.u32 4294901760, %v1122_v36 }
 0x1b8   :  { %796 = vmatmul.f32.gmra.mxu2 %v574_v62  ;;  %v4796_v58 = vpop.f32.mrf.mxu1 }
 0x1b9   :  { %v592_v10 = vsub.f32 %v590_v56, %v591_v9  ;;  %v4806_v26 = vsub.f32 %v1122_v36, %v4803_v2  ;;  %1568 = vmatpush.msra.mxu1 %v4803_v2  ;;  %1181 = vmatpush.msrb.mxu2 %v4803_v2 }
 0x1ba   :  { %909 = vmatmul.f32.gmra.mxu3 %v575_v4 }
 0x1bb   :  { %v593_v40 = vand.u32 4294901760, %v592_v10  ;;  %v1335_v59 = vand.u32 4294901760, %v4806_v26  ;;  %1456 = vmatpush.msra.mxu0 %v4806_v26 }
 0x1be   :  { %578 = vmatmul.f32.gmra.mxu0 %v577_v7  ;;  %699 = vmatmul.f32.gmra.mxu1 %v4765_v39 }
 0x1c0   :  { %801 = vmatmul.f32.gmra.mxu2 %v582_v3 }
 0x1c2   :  { %915 = vmatmul.f32.gmra.mxu3 %v583_v18  ;;  %v1336_v18 = vsub.f32 %v4806_v26, %v1335_v59 }
 0x1c6   :  { %586 = vmatmul.f32.gmra.mxu0 %v585_v8  ;;  %703 = vmatmul.f32.gmra.mxu1 %v4771_v15  ;;  %v4818_v8 = vpop.f32.mrf.mxu1 }
 0x1c8   :  { %806 = vmatmul.f32.gmra.mxu2 %v590_v56  ;;  %v1337_v56 = vand.u32 4294901760, %v1336_v18 }
 0x1ca   :  { %921 = vmatmul.f32.gmra.mxu3 %v591_v9  ;;  %v1121_v9 = vld [vmem:[%s5747_s1 + $0x30] sm:$0xff] }
 0x1cb   :  { %1338 = vmatpush.msrb.mxu3 %v1337_v56  ;;  %v4825_v10 = vand.u32 4294901760, %v1121_v9 }
 0x1cd   :  { %1183 = vmatpush.msrb.mxu2 %v4825_v10  ;;  %1570 = vmatpush.msra.mxu1 %v4825_v10 }
 0x1ce   :  { %594 = vmatmul.f32.gmra.mxu0 %v593_v40  ;;  %v4827_v40 = vpop.f32.mrf.mxu0 }
 0x1fc   :  { %v201_v12 = vpop.xlane.xlu0 %200 }
 0x1fd   :  { %v219_v44 = vmul.f32 %v201_v12, %v4442_v20  ;;  %v4831_v12 = vsub.f32 %v1121_v9, %v4825_v10  ;;  %v1116_v9 = vld [vmem:[%s5747_s1 + $0x8] sm:$0xff] }
 0x1ff   :  { %v235_v13 = vadd.f32 1e-05, %v219_v44  ;;  %v4834_v44 = vpop.f32.mrf.mxu1  ;;  %1459 = vmatpush.msra.mxu0 %v4831_v12 }
 0x201   :  { %4289 = vrsqrt.f32 %v235_v13  ;;  %vm383_vm15 = vweird.f32 %v235_v13 }
 0x205   :  { %v204_v19 = vpop.xlane.xlu1 %203 }
 0x206   :  { %v220_v22 = vmul.f32 %v204_v19, %v4442_v20 }
 0x207   :  { %v4290_v17 = vpop.eup %4289 }
 0x208   :  { %v378_v50 = vmul.f32 %v4290_v17, %v235_v13  ;;  %v236_v42 = vadd.f32 1e-05, %v220_v22  ;;  %vm384_vm14 = vweird.f32 %v4290_v17  ;;  %v1341_v13 = vand.u32 4294901760, %v4831_v12 }
 0x209   :  { %vm385_vm1 = vmor %vm383_vm15, %vm384_vm14 }
 0x20a   :  { %v379_v28 = vmul.f32 %v4290_v17, %v378_v50  ;;  %4291 = vrsqrt.f32 %v236_v42  ;;  %vm393_vm3 = vweird.f32 %v236_v42  ;;  %v4848_v50 = vpop.f32.mrf.mxu0 }
 0x20c   :  { %v380_v29 = vmul.f32 0.5, %v379_v28 }
 0x20e   :  { %v381_v46 = vsub.f32 1.5, %v380_v29 }
 0x210   :  { %v382_v55 = vmul.f32 %v4290_v17, %v381_v46  ;;  %v4292_v1 = vpop.eup %4291 }
 0x211   :  { %v388_v32 = vmul.f32 %v4292_v1, %v236_v42  ;;  %vm394_vm2 = vweird.f32 %v4292_v1 }
 0x212   :  { %v386_v60 = vsel %vm385_vm1, %v4290_v17, %v382_v55  ;;  %vm395_vm4 = vmor %vm393_vm3, %vm394_vm2  ;;  %v1120_v17 = vld [vmem:[%s5747_s1 + $0x28] sm:$0xff]  ;;  %v4864_v55 = vpop.f32.mrf.mxu0 }
 0x213   :  { %v411_v54 = vmul.f32 %v386_v60, %v4694_v63  ;;  %v389_v34 = vmul.f32 %v4292_v1, %v388_v32  ;;  %v4846_v22 = vand.u32 4294901760, %v1120_v17  ;;  %v1119_v60 = vld [vmem:[%s5747_s1 + $0x20] sm:$0xff] }
 0x214   :  { %v4873_v32 = vand.u32 4294901760, %v1119_v60 }
 0x215   :  { %v460_v20 = vsel %vm53_vm0, %v411_v54, 0  ;;  %v390_v37 = vmul.f32 0.5, %v389_v34  ;;  %1185 = vmatpush.msrb.mxu2 %v4846_v22  ;;  %v4852_v42 = vsub.f32 %v1120_v17, %v4846_v22  ;;  %1572 = vmatpush.msra.mxu1 %v4846_v22 }
 0x216   :  { %v4784_v38 = vand.u32 4294901760, %v460_v20 }
 0x217   :  { %v391_v27 = vsub.f32 1.5, %v390_v37  ;;  %v1347_v28 = vand.u32 4294901760, %v4852_v42  ;;  %1462 = vmatpush.msra.mxu0 %v4852_v42  ;;  %1187 = vmatpush.msrb.mxu2 %v4873_v32 }
 0x218   :  { %707 = vmatmul.f32.gmra.mxu1 %v4784_v38  ;;  %v598_v45 = vsub.f32 %v460_v20, %v4784_v38 }
 0x219   :  { %v392_v43 = vmul.f32 %v4292_v1, %v391_v27  ;;  %v1348_v29 = vsub.f32 %v4852_v42, %v1347_v28  ;;  %1574 = vmatpush.msra.mxu1 %v4873_v32 }
 0x21a   :  { %811 = vmatmul.f32.gmra.mxu2 %v598_v45  ;;  %v599_v63 = vand.u32 4294901760, %v598_v45 }
 0x21b   :  { %v396_v48 = vsel %vm395_vm4, %v4292_v1, %v392_v43  ;;  %v1349_v46 = vand.u32 4294901760, %v1348_v29 }
 0x21c   :  { %927 = vmatmul.f32.gmra.mxu3 %v599_v63  ;;  %v600_v49 = vsub.f32 %v598_v45, %v599_v63  ;;  %v412_v23 = vmul.f32 %v396_v48, %v4702_v14  ;;  %v1118_v45 = vld [vmem:[%s5747_s1 + $0x18] sm:$0xff] }
 0x21d   :  { %v4900_v63 = vand.u32 4294901760, %v1118_v45 }
 0x21e   :  { %v601_v51 = vand.u32 4294901760, %v600_v49  ;;  %v463_v62 = vsel %vm53_vm0, %v412_v23, 0  ;;  %vm1123_vm0 = vcmask 523264  }
 0x21f   :  { %v4794_v0 = vand.u32 4294901760, %v463_v62  ;;  %1189 = vmatpush.msrb.mxu2 %v4900_v63  ;;  %1576 = vmatpush.msra.mxu1 %v4900_v63 }
 0x220   :  { %602 = vmatmul.f32.gmra.mxu0 %v601_v51 }
 0x221   :  { %711 = vmatmul.f32.gmra.mxu1 %v4794_v0  ;;  %v606_v4 = vsub.f32 %v463_v62, %v4794_v0  ;;  %v1117_v62 = vld [vmem:[%s5747_s1 + $0x10] sm:$0xff] }
 0x222   :  { %v4923_v36 = vand.u32 4294901760, %v1117_v62 }
 0x223   :  { %816 = vmatmul.f32.gmra.mxu2 %v606_v4  ;;  %v607_v14 = vand.u32 4294901760, %v606_v4 }
 0x224   :  { %1191 = vmatpush.msrb.mxu2 %v4923_v36  ;;  %1578 = vmatpush.msra.mxu1 %v4923_v36 }
 0x225   :  { %933 = vmatmul.f32.gmra.mxu3 %v607_v14  ;;  %v608_v3 = vsub.f32 %v606_v4, %v607_v14 }
 0x227   :  { %v609_v7 = vand.u32 4294901760, %v608_v3 }
 0x229   :  { %610 = vmatmul.f32.gmra.mxu0 %v609_v7  ;;  %1051 = vmatmul.f32.vlgmr.msrb.gmra.mxu1 %v4590_v47 }
 0x231   :  { %966 = vmatmul.f32.vlgmr.msrb.gmra.mxu0 %v4590_v47  ;;  %1055 = vmatmul.f32.gmra.mxu1 %v4623_v21  ;;  %v1342_v47 = vsub.f32 %v4831_v12, %v1341_v13 }
 0x233   :  { %v1343_v19 = vand.u32 4294901760, %v1342_v47 }
 0x235   :  { %1344 = vmatpush.msrb.mxu3 %v1343_v19  ;;  %v1192_v19 = vand.u32 4294901760, %v1116_v9 }
 0x237   :  { %1350 = vmatpush.msrb.mxu3 %v1349_v46  ;;  %1193 = vmatpush.msrb.mxu2 %v1192_v19  ;;  %v1370_v17 = vsub.f32 %v1116_v9, %v1192_v19 }
 0x238   :  { %1580 = vmatpush.msra.mxu1 %v1192_v19 }
 0x239   :  { %970 = vmatmul.f32.gmra.mxu0 %v4623_v21  ;;  %1059 = vmatmul.f32.gmra.mxu1 %v4631_v24  ;;  %v4855_v21 = vpop.f32.mrf.mxu1  ;;  %v1371_v29 = vand.u32 4294901760, %v1370_v17 }
 0x241   :  { %974 = vmatmul.f32.gmra.mxu0 %v4631_v24  ;;  %1063 = vmatmul.f32.gmra.mxu1 %v4652_v57  ;;  %v4866_v1 = vpop.f32.mrf.mxu1  ;;  %v4877_v24 = vsub.f32 %v1119_v60, %v4873_v32 }
 0x243   :  { %v1353_v54 = vand.u32 4294901760, %v4877_v24  ;;  %1465 = vmatpush.msra.mxu0 %v4877_v24 }
 0x245   :  { %v1354_v20 = vsub.f32 %v4877_v24, %v1353_v54 }
 0x247   :  { %v1355_v37 = vand.u32 4294901760, %v1354_v20 }
 0x249   :  { %978 = vmatmul.f32.gmra.mxu0 %v4652_v57  ;;  %1067 = vmatmul.f32.gmra.mxu1 %v4672_v53  ;;  %v4882_v57 = vpop.f32.mrf.mxu0  ;;  %v4884_v34 = vpop.f32.mrf.mxu1 }
 0x24a   :  { %1356 = vmatpush.msrb.mxu3 %v1355_v37  ;;  %v742_v37 = vpop.f32.mrf.mxu2 }
 0x251   :  { %982 = vmatmul.f32.gmra.mxu0 %v4672_v53  ;;  %1071 = vmatmul.f32.gmra.mxu1 %v4678_v25  ;;  %v4891_v27 = vpop.f32.mrf.mxu0  ;;  %v4898_v43 = vpop.f32.mrf.mxu1  ;;  %v4904_v53 = vsub.f32 %v1118_v45, %v4900_v63 }
 0x253   :  { %v1359_v48 = vand.u32 4294901760, %v4904_v53  ;;  %1468 = vmatpush.msra.mxu0 %v4904_v53 }
 0x259   :  { %986 = vmatmul.f32.gmra.mxu0 %v4678_v25  ;;  %1075 = vmatmul.f32.gmra.mxu1 %v4684_v31  ;;  %v1360_v25 = vsub.f32 %v4904_v53, %v1359_v48  ;;  %v4914_v49 = vpop.f32.mrf.mxu0  ;;  %v4916_v51 = vpop.f32.mrf.mxu1 }
 0x25b   :  { %v1361_v23 = vand.u32 4294901760, %v1360_v25 }
 0x25d   :  { %1362 = vmatpush.msrb.mxu3 %v1361_v23 }
 0x261   :  { %990 = vmatmul.f32.gmra.mxu0 %v4684_v31  ;;  %1079 = vmatmul.f32.gmra.mxu1 %v4716_v33  ;;  %v4925_v4 = vpop.f32.mrf.mxu0  ;;  %v1364_v31 = vsub.f32 %v1117_v62, %v4923_v36  ;;  %v4930_v14 = vpop.f32.mrf.mxu1 }
 0x263   :  { %v1365_v3 = vand.u32 4294901760, %v1364_v31  ;;  %1471 = vmatpush.msra.mxu0 %v1364_v31 }
 0x265   :  { %1474 = vmatpush.msra.mxu0 %v1370_v17 }
 0x269   :  { %994 = vmatmul.f32.gmra.mxu0 %v4716_v33  ;;  %1083 = vmatmul.f32.gmra.mxu1 %v4735_v6  ;;  %v1366_v33 = vsub.f32 %v1364_v31, %v1365_v3  ;;  %v4934_v18 = vpop.f32.mrf.mxu0  ;;  %v4936_v56 = vpop.f32.mrf.mxu1 }
 0x26b   :  { %v1367_v7 = vand.u32 4294901760, %v1366_v33 }
 0x26d   :  { %1368 = vmatpush.msrb.mxu3 %v1367_v7 }
 0x271   :  { %998 = vmatmul.f32.gmra.mxu0 %v4735_v6  ;;  %1087 = vmatmul.f32.gmra.mxu1 %v4732_v5  ;;  %v4943_v47 = vpop.f32.mrf.mxu0  ;;  %v4947_v6 = vpop.f32.mrf.mxu1 }
 0x279   :  { %1002 = vmatmul.f32.gmra.mxu0 %v4732_v5  ;;  %1091 = vmatmul.f32.gmra.mxu1 %v4746_v30  ;;  %v1372_v5 = vsub.f32 %v1370_v17, %v1371_v29  ;;  %v4951_v60 = vpop.f32.mrf.mxu0  ;;  %v4953_v20 = vpop.f32.mrf.mxu1 }
 0x27b   :  { %v1373_v46 = vand.u32 4294901760, %v1372_v5 }
 0x27d   :  { %1374 = vmatpush.msrb.mxu3 %v1373_v46 }
 0x281   :  { %1006 = vmatmul.f32.gmra.mxu0 %v4746_v30  ;;  %1095 = vmatmul.f32.gmra.mxu1 %v4759_v52  ;;  %v1115_v30 = vld [vmem:[%s5747_s1] sm:$0xff]  ;;  %v4962_v62 = vpop.f32.mrf.mxu0  ;;  %s4397_s1 = smov 64  }
 0x282   :  { %v1194_v45 = vand.u32 4294901760, %v1115_v30 }
 0x284   :  { %1195 = vmatpush.msrb.mxu2 %v1194_v45  ;;  %v1376_v25 = vsub.f32 %v1115_v30, %v1194_v45  ;;  %1582 = vmatpush.msra.mxu1 %v1194_v45 }
 0x286   :  { %v1377_v23 = vand.u32 4294901760, %v1376_v25  ;;  %1477 = vmatpush.msra.mxu0 %v1376_v25  ;;  %1691 = vmatpush.msra.mxu2 %v1335_v59 }
 0x288   :  { %v1378_v33 = vsub.f32 %v1376_v25, %v1377_v23  ;;  %1695 = vmatpush.msra.mxu2 %v1341_v13 }
 0x289   :  { %1010 = vmatmul.f32.gmra.mxu0 %v4759_v52  ;;  %1099 = vmatmul.f32.gmra.mxu1 %v4765_v39  ;;  %v844_v52 = vpop.f32.mrf.mxu3 }
 0x28a   :  { %v1379_v7 = vand.u32 4294901760, %v1378_v33  ;;  %1699 = vmatpush.msra.mxu2 %v1347_v28 }
 0x28c   :  { %1380 = vmatpush.msrb.mxu3 %v1379_v7  ;;  %1703 = vmatpush.msra.mxu2 %v1353_v54 }
 0x28e   :  { %1794 = vmatpush.msra.mxu3 %v4803_v2  ;;  %1707 = vmatpush.msra.mxu2 %v1359_v48  ;;  %v653_v2 = vadd.f32 %v4778_v16, %v4781_v35 }
 0x290   :  { %1796 = vmatpush.msra.mxu3 %v4825_v10  ;;  %1711 = vmatpush.msra.mxu2 %v1365_v3  ;;  %v743_v42 = vadd.f32 %v742_v37, %v653_v2  ;;  %v661_v3 = vadd.f32 %v4796_v58, %v4815_v11 }
 0x291   :  { %1014 = vmatmul.f32.gmra.mxu0 %v4765_v39  ;;  %1103 = vmatmul.f32.gmra.mxu1 %v4771_v15  ;;  %v747_v39 = vpop.f32.mrf.mxu2  ;;  %v850_v26 = vpop.f32.mrf.mxu3 }
 0x292   :  { %1798 = vmatpush.msra.mxu3 %v4846_v22  ;;  %1715 = vmatpush.msra.mxu2 %v1371_v29  ;;  %v845_v28 = vadd.f32 %v844_v52, %v743_v42  ;;  %v665_v52 = vadd.f32 %v4818_v8, %v4827_v40 }
 0x294   :  { %1800 = vmatpush.msra.mxu3 %v4873_v32  ;;  %1719 = vmatpush.msra.mxu2 %v1377_v23  ;;  %v657_v32 = vadd.f32 %v4786_v41, %v4791_v61 }
 0x295   :  { %v4964_v31 = vpop.f32.mrf.mxu1 }
 0x296   :  { %1802 = vmatpush.msra.mxu3 %v4900_v63  ;;  %v748_v16 = vadd.f32 %v747_v39, %v657_v32 }
 0x298   :  { %1804 = vmatpush.msra.mxu3 %v4923_v36 }
 0x299   :  { %1018 = vmatmul.f32.gmra.mxu0 %v4771_v15  ;;  %1107 = vmatmul.f32.gmra.mxu1 %v4784_v38  ;;  %v752_v15 = vpop.f32.mrf.mxu2  ;;  %v856_v10 = vpop.f32.mrf.mxu3 }
 0x29a   :  { %1806 = vmatpush.msra.mxu3 %v1192_v19  ;;  %v753_v5 = vadd.f32 %v752_v15, %v661_v3 }
 0x29c   :  { %1808 = vmatpush.msra.mxu3 %v1194_v45  ;;  %v857_v25 = vadd.f32 %v856_v10, %v753_v5 }
 0x29d   :  { %v4977_v59 = vpop.f32.mrf.mxu0 }
 0x29e   :  { %v4980_v12 = vpop.f32.mrf.mxu1 }
 0x2a1   :  { %1022 = vmatmul.f32.gmra.mxu0 %v4784_v38  ;;  %1111 = vmatmul.f32.gmra.mxu1 %v4794_v0  ;;  %v757_v38 = vpop.f32.mrf.mxu2  ;;  %v862_v53 = vpop.f32.mrf.mxu3 }
 0x2a2   :  { %v758_v2 = vadd.f32 %v757_v38, %v665_v52 }
 0x2a4   :  { %v863_v32 = vadd.f32 %v862_v53, %v758_v2 }
 0x2a6   :  { %v4990_v13 = vpop.f32.mrf.mxu0  ;;  %v1052_v22 = vpop.f32.mrf.mxu1 }
 0x2a9   :  { %1026 = vmatmul.f32.gmra.mxu0 %v4794_v0  ;;  %v851_v0 = vadd.f32 %v850_v26, %v748_v16  ;;  %v762_v9 = vpop.f32.mrf.mxu2  ;;  %v868_v30 = vpop.f32.mrf.mxu3 }
 0x2ae   :  { %v967_v24 = vpop.f32.mrf.mxu0  ;;  %v1056_v63 = vpop.f32.mrf.mxu1 }
 0x2af   :  { %v968_v54 = vadd.f32 %v967_v24, %v845_v28  ;;  %v669_v24 = vadd.f32 %v4834_v44, %v4848_v50 }
 0x2b1   :  { %v1053_v35 = vadd.f32 %v1052_v22, %v968_v54  ;;  %v767_v26 = vpop.f32.mrf.mxu2  ;;  %v874_v8 = vpop.f32.mrf.mxu3 }
 0x2b3   :  { %v1125_v48 = vsel %vm1123_vm0, %v1053_v35, 0  ;;  %2245 = vrot.lane.b32.xlu0 %v1053_v35, %s4397_s1 }
 0x2b4   :  { %v4997_v36 = vand.u32 4294901760, %v1125_v48 }
 0x2b6   :  { %v1197_v41 = vsub.f32 %v1125_v48, %v4997_v36  ;;  %v971_v61 = vpop.f32.mrf.mxu0  ;;  %1382 = vmatmul.f32.vlgmr.msrb.gmra.mxu3 %v4997_v36  ;;  %v1060_v17 = vpop.f32.mrf.mxu1  ;;  %v763_v48 = vadd.f32 %v762_v9, %v669_v24 }
 0x2b7   :  { %v972_v19 = vadd.f32 %v971_v61, %v851_v0 }
 0x2b8   :  { %v1198_v29 = vand.u32 4294901760, %v1197_v41  ;;  %1480 = vmatmul.f32.vlgmr.msra.gmra.mxu0 %v1197_v41  ;;  %v869_v61 = vadd.f32 %v868_v30, %v763_v48 }
 0x2b9   :  { %v1057_v46 = vadd.f32 %v1056_v63, %v972_v19  ;;  %v772_v3 = vpop.f32.mrf.mxu2  ;;  %v673_v19 = vadd.f32 %v4855_v21, %v4864_v55 }
 0x2ba   :  { %1586 = vmatmul.f32.vlgmr.msra.gmra.mxu1 %v1198_v29  ;;  %v1199_v37 = vsub.f32 %v1197_v41, %v1198_v29 }
 0x2bb   :  { %v1128_v45 = vsel %vm1123_vm0, %v1057_v46, 0  ;;  %2247 = vrot.lane.b32.xlu1 %v1057_v46, %s4397_s1 }
 0x2bc   :  { %v5005_v58 = vand.u32 4294901760, %v1128_v45  ;;  %v1200_v11 = vand.u32 4294901760, %v1199_v37 }
 0x2be   :  { %v975_v23 = vpop.f32.mrf.mxu0  ;;  %1201 = vmatmul.f32.vlgmr.msrb.gmra.mxu2 %v1200_v11  ;;  %1386 = vmatmul.f32.gmra.mxu3 %v5005_v58  ;;  %v1205_v33 = vsub.f32 %v1128_v45, %v5005_v58  ;;  %v1064_v39 = vpop.f32.mrf.mxu1  ;;  %v768_v45 = vadd.f32 %v767_v26, %v673_v19  ;;  %v685_v19 = vadd.f32 %v4898_v43, %v4914_v49 }
 0x2bf   :  { %v976_v7 = vadd.f32 %v975_v23, %v857_v25 }
 0x2c0   :  { %1485 = vmatmul.f32.gmra.mxu0 %v1205_v33  ;;  %v1206_v15 = vand.u32 4294901760, %v1205_v33  ;;  %v875_v23 = vadd.f32 %v874_v8, %v768_v45 }
 0x2c1   :  { %v1061_v22 = vadd.f32 %v1060_v17, %v976_v7  ;;  %v880_v17 = vpop.f32.mrf.mxu3  ;;  %v777_v25 = vpop.f32.mrf.mxu2 }
 0x2c2   :  { %1592 = vmatmul.f32.gmra.mxu1 %v1206_v15  ;;  %v1207_v42 = vsub.f32 %v1205_v33, %v1206_v15  ;;  %v677_v33 = vadd.f32 %v4866_v1, %v4882_v57 }
 0x2c3   :  { %v1131_v10 = vsel %vm1123_vm0, %v1061_v22, 0  ;;  %2479 = vrot.lane.b32.xlu1 %v1061_v22, %s4397_s1 }
 0x2c4   :  { %v5013_v40 = vand.u32 4294901760, %v1131_v10  ;;  %v1208_v28 = vand.u32 4294901760, %v1207_v42  ;;  %v773_v42 = vadd.f32 %v772_v3, %v677_v33 }
 0x2c6   :  { %v979_v54 = vpop.f32.mrf.mxu0  ;;  %1209 = vmatmul.f32.gmra.mxu2 %v1208_v28  ;;  %1390 = vmatmul.f32.gmra.mxu3 %v5013_v40  ;;  %v1213_v38 = vsub.f32 %v1131_v10, %v5013_v40  ;;  %v1068_v16 = vpop.f32.mrf.mxu1  ;;  %v881_v24 = vadd.f32 %v880_v17, %v773_v42 }
 0x2c7   :  { %v980_v63 = vadd.f32 %v979_v54, %v863_v32  ;;  %v681_v54 = vadd.f32 %v4884_v34, %v4891_v27 }
 0x2c8   :  { %1490 = vmatmul.f32.gmra.mxu0 %v1213_v38  ;;  %v1214_v35 = vand.u32 4294901760, %v1213_v38 }
 0x2c9   :  { %v1065_v0 = vadd.f32 %v1064_v39, %v980_v63  ;;  %v886_v7 = vpop.f32.mrf.mxu3  ;;  %v782_v1 = vpop.f32.mrf.mxu2  ;;  %v778_v3 = vadd.f32 %v777_v25, %v681_v54 }
 0x2ca   :  { %1598 = vmatmul.f32.gmra.mxu1 %v1214_v35  ;;  %v1215_v41 = vsub.f32 %v1213_v38, %v1214_v35  ;;  %v783_v45 = vadd.f32 %v782_v1, %v685_v19 }
 0x2cb   :  { %v1134_v53 = vsel %vm1123_vm0, %v1065_v0, 0  ;;  %2481 = vrot.lane.b32.xlu1 %v1065_v0, %s4397_s1 }
 0x2cc   :  { %v5021_v44 = vand.u32 4294901760, %v1134_v53  ;;  %v1216_v50 = vand.u32 4294901760, %v1215_v41 }
 0x2ce   :  { %v983_v29 = vpop.f32.mrf.mxu0  ;;  %1217 = vmatmul.f32.gmra.mxu2 %v1216_v50  ;;  %1394 = vmatmul.f32.gmra.mxu3 %v5021_v44  ;;  %v1221_v9 = vsub.f32 %v1134_v53, %v5021_v44  ;;  %v1072_v46 = vpop.f32.mrf.mxu1 }
 0x2cf   :  { %v984_v5 = vadd.f32 %v983_v29, %v869_v61  ;;  %v887_v61 = vadd.f32 %v886_v7, %v778_v3 }
 0x2d0   :  { %1495 = vmatmul.f32.gmra.mxu0 %v1221_v9  ;;  %v1222_v37 = vand.u32 4294901760, %v1221_v9 }
 0x2d1   :  { %v1069_v11 = vadd.f32 %v1068_v16, %v984_v5  ;;  %v892_v48 = vpop.f32.mrf.mxu3  ;;  %v787_v17 = vpop.f32.mrf.mxu2 }
 0x2d2   :  { %1604 = vmatmul.f32.gmra.mxu1 %v1222_v37  ;;  %v1223_v52 = vsub.f32 %v1221_v9, %v1222_v37 }
 0x2d3   :  { %v1137_v30 = vsel %vm1123_vm0, %v1069_v11, 0  ;;  %2713 = vrot.lane.b32.xlu2 %v1069_v11, %s4397_s1 }
 0x2d4   :  { %v5029_v21 = vand.u32 4294901760, %v1137_v30  ;;  %v1224_v55 = vand.u32 4294901760, %v1223_v52 }
 0x2d6   :  { %v987_v39 = vpop.f32.mrf.mxu0  ;;  %1225 = vmatmul.f32.gmra.mxu2 %v1224_v55  ;;  %1398 = vmatmul.f32.gmra.mxu3 %v5029_v21  ;;  %v1229_v26 = vsub.f32 %v1137_v30, %v5029_v21  ;;  %v1076_v2 = vpop.f32.mrf.mxu1  ;;  %v893_v55 = vadd.f32 %v892_v48, %v783_v45 }
 0x2d7   :  { %v988_v15 = vadd.f32 %v987_v39, %v875_v23  ;;  %v689_v23 = vadd.f32 %v4916_v51, %v4925_v4 }
 0x2d8   :  { %1500 = vmatmul.f32.gmra.mxu0 %v1229_v26  ;;  %v1230_v22 = vand.u32 4294901760, %v1229_v26 }
 0x2d9   :  { %v1073_v10 = vadd.f32 %v1072_v46, %v988_v15  ;;  %v898_v25 = vpop.f32.mrf.mxu3  ;;  %v792_v15 = vpop.f32.mrf.mxu2 }
 0x2da   :  { %1610 = vmatmul.f32.gmra.mxu1 %v1230_v22  ;;  %v1231_v28 = vsub.f32 %v1229_v26, %v1230_v22  ;;  %v788_v22 = vadd.f32 %v787_v17, %v689_v23 }
 0x2db   :  { %v1140_v8 = vsel %vm1123_vm0, %v1073_v10, 0  ;;  %2715 = vrot.lane.b32.xlu0 %v1073_v10, %s4397_s1 }
 0x2dc   :  { %v5037_v57 = vand.u32 4294901760, %v1140_v8  ;;  %v1232_v32 = vand.u32 4294901760, %v1231_v28  ;;  %v899_v1 = vadd.f32 %v898_v25, %v788_v22 }
 0x2de   :  { %v991_v38 = vpop.f32.mrf.mxu0  ;;  %1233 = vmatmul.f32.gmra.mxu2 %v1232_v32  ;;  %1402 = vmatmul.f32.gmra.mxu3 %v5037_v57  ;;  %v1237_v63 = vsub.f32 %v1140_v8, %v5037_v57  ;;  %v1080_v35 = vpop.f32.mrf.mxu1  ;;  %v693_v32 = vadd.f32 %v4930_v14, %v4934_v18 }
 0x2df   :  { %v992_v16 = vadd.f32 %v991_v38, %v881_v24 }
 0x2e0   :  { %1505 = vmatmul.f32.gmra.mxu0 %v1237_v63  ;;  %v1238_v0 = vand.u32 4294901760, %v1237_v63 }
 0x2e1   :  { %v1077_v41 = vadd.f32 %v1076_v2, %v992_v16  ;;  %v904_v51 = vpop.f32.mrf.mxu3 }
 0x2e2   :  { %1616 = vmatmul.f32.gmra.mxu1 %v1238_v0  ;;  %v1239_v53 = vsub.f32 %v1237_v63, %v1238_v0  ;;  %v797_v0 = vpop.f32.mrf.mxu2 }
 0x2e3   :  { %v1143_v50 = vsel %vm1123_vm0, %v1077_v41, 0  ;;  %2947 = vrot.lane.b32.xlu2 %v1077_v41, %s4397_s1 }
 0x2e4   :  { %v5045_v34 = vand.u32 4294901760, %v1143_v50  ;;  %v1240_v27 = vand.u32 4294901760, %v1239_v53 }
 0x2e6   :  { %v995_v29 = vpop.f32.mrf.mxu0  ;;  %1241 = vmatmul.f32.gmra.mxu2 %v1240_v27  ;;  %1406 = vmatmul.f32.gmra.mxu3 %v5045_v34  ;;  %v1245_v9 = vsub.f32 %v1143_v50, %v5045_v34  ;;  %v1084_v46 = vpop.f32.mrf.mxu1  ;;  %v697_v50 = vadd.f32 %v4936_v56, %v4943_v47 }
 0x2e7   :  { %v996_v5 = vadd.f32 %v995_v29, %v887_v61 }
 0x2e8   :  { %1510 = vmatmul.f32.gmra.mxu0 %v1245_v9  ;;  %v1246_v37 = vand.u32 4294901760, %v1245_v9 }
 0x2e9   :  { %v1081_v11 = vadd.f32 %v1080_v35, %v996_v5  ;;  %v793_v35 = vadd.f32 %v792_v15, %v693_v32  ;;  %v910_v27 = vpop.f32.mrf.mxu3  ;;  %v798_v5 = vadd.f32 %v797_v0, %v697_v50 }
 0x2ea   :  { %1622 = vmatmul.f32.gmra.mxu1 %v1246_v37  ;;  %v1247_v52 = vsub.f32 %v1245_v9, %v1246_v37  ;;  %v802_v56 = vpop.f32.mrf.mxu2 }
 0x2eb   :  { %v1146_v30 = vsel %vm1123_vm0, %v1081_v11, 0  ;;  %2949 = vrot.lane.b32.xlu1 %v1081_v11, %s4397_s1  ;;  %v905_v53 = vadd.f32 %v904_v51, %v793_v35  ;;  %v911_v25 = vadd.f32 %v910_v27, %v798_v5 }
 0x2ec   :  { %v5053_v43 = vand.u32 4294901760, %v1146_v30  ;;  %v1248_v49 = vand.u32 4294901760, %v1247_v52  ;;  %v701_v52 = vadd.f32 %v4947_v6, %v4951_v60 }
 0x2ee   :  { %v999_v33 = vpop.f32.mrf.mxu0  ;;  %1249 = vmatmul.f32.gmra.mxu2 %v1248_v49  ;;  %1410 = vmatmul.f32.gmra.mxu3 %v5053_v43  ;;  %v1253_v7 = vsub.f32 %v1146_v30, %v5053_v43  ;;  %v1088_v26 = vpop.f32.mrf.mxu1 }
 0x2ef   :  { %v1000_v39 = vadd.f32 %v999_v33, %v893_v55 }
 0x2f0   :  { %1515 = vmatmul.f32.gmra.mxu0 %v1253_v7  ;;  %v1254_v2 = vand.u32 4294901760, %v1253_v7 }
 0x2f1   :  { %v1085_v42 = vadd.f32 %v1084_v46, %v1000_v39  ;;  %v916_v23 = vpop.f32.mrf.mxu3 }
 0x2f2   :  { %1628 = vmatmul.f32.gmra.mxu1 %v1254_v2  ;;  %v1255_v10 = vsub.f32 %v1253_v7, %v1254_v2  ;;  %v803_v7 = vadd.f32 %v802_v56, %v701_v52 }
 0x2f3   :  { %v1149_v28 = vsel %vm1123_vm0, %v1085_v42, 0  ;;  %3181 = vrot.lane.b32.xlu0 %v1085_v42, %s4397_s1  ;;  %v705_v42 = vadd.f32 %v4953_v20, %v4962_v62 }
 0x2f4   :  { %v5061_v4 = vand.u32 4294901760, %v1149_v28  ;;  %v1256_v8 = vand.u32 4294901760, %v1255_v10  ;;  %v917_v22 = vadd.f32 %v916_v23, %v803_v7  ;;  %v807_v10 = vpop.f32.mrf.mxu2 }
 0x2f5   :  { %v808_v32 = vadd.f32 %v807_v10, %v705_v42 }
 0x2f6   :  { %v1003_v24 = vpop.f32.mrf.mxu0  ;;  %1257 = vmatmul.f32.gmra.mxu2 %v1256_v8  ;;  %1414 = vmatmul.f32.gmra.mxu3 %v5061_v4  ;;  %v1261_v54 = vsub.f32 %v1149_v28, %v5061_v4  ;;  %v1092_v63 = vpop.f32.mrf.mxu1 }
 0x2f7   :  { %v1004_v38 = vadd.f32 %v1003_v24, %v899_v1 }
 0x2f8   :  { %1520 = vmatmul.f32.gmra.mxu0 %v1261_v54  ;;  %v1262_v16 = vand.u32 4294901760, %v1261_v54 }
 0x2f9   :  { %v1089_v48 = vadd.f32 %v1088_v26, %v1004_v38 }
 0x2fa   :  { %1634 = vmatmul.f32.gmra.mxu1 %v1262_v16  ;;  %v1263_v3 = vsub.f32 %v1261_v54, %v1262_v16  ;;  %v922_v54 = vpop.f32.mrf.mxu3 }
 0x2fb   :  { %v1152_v41 = vsel %vm1123_vm0, %v1089_v48, 0  ;;  %3183 = vrot.lane.b32.xlu0 %v1089_v48, %s4397_s1  ;;  %v923_v35 = vadd.f32 %v922_v54, %v808_v32  ;;  %v709_v48 = vadd.f32 %v4964_v31, %v4977_v59 }
 0x2fc   :  { %v5069_v14 = vand.u32 4294901760, %v1152_v41  ;;  %v1264_v18 = vand.u32 4294901760, %v1263_v3  ;;  %v812_v0 = vpop.f32.mrf.mxu2 }
 0x2fd   :  { %v813_v50 = vadd.f32 %v812_v0, %v709_v48 }
 0x2fe   :  { %v1007_v61 = vpop.f32.mrf.mxu0  ;;  %1265 = vmatmul.f32.gmra.mxu2 %v1264_v18  ;;  %1418 = vmatmul.f32.gmra.mxu3 %v5069_v14  ;;  %v1269_v19 = vsub.f32 %v1152_v41, %v5069_v14  ;;  %v1096_v29 = vpop.f32.mrf.mxu1 }
 0x2ff   :  { %v1008_v17 = vadd.f32 %v1007_v61, %v905_v53 }
 0x300   :  { %1525 = vmatmul.f32.gmra.mxu0 %v1269_v19  ;;  %v1270_v9 = vand.u32 4294901760, %v1269_v19 }
 0x301   :  { %v1093_v46 = vadd.f32 %v1092_v63, %v1008_v17 }
 0x302   :  { %1640 = vmatmul.f32.gmra.mxu1 %v1270_v9  ;;  %v1271_v37 = vsub.f32 %v1269_v19, %v1270_v9  ;;  %v928_v61 = vpop.f32.mrf.mxu3  ;;  %v713_v9 = vadd.f32 %v4980_v12, %v4990_v13 }
 0x303   :  { %v1155_v45 = vsel %vm1123_vm0, %v1093_v46, 0  ;;  %3415 = vrot.lane.b32.xlu1 %v1093_v46, %s4397_s1 }
 0x304   :  { %v5077_v47 = vand.u32 4294901760, %v1155_v45  ;;  %v1272_v11 = vand.u32 4294901760, %v1271_v37  ;;  %v817_v56 = vpop.f32.mrf.mxu2 }
 0x306   :  { %v1011_v30 = vpop.f32.mrf.mxu0  ;;  %1273 = vmatmul.f32.gmra.mxu2 %v1272_v11  ;;  %1422 = vmatmul.f32.gmra.mxu3 %v5077_v47  ;;  %v1277_v49 = vsub.f32 %v1155_v45, %v5077_v47  ;;  %v1100_v26 = vpop.f32.mrf.mxu1 }
 0x307   :  { %v1012_v55 = vadd.f32 %v1011_v30, %v911_v25  ;;  %v818_v25 = vadd.f32 %v817_v56, %v713_v9 }
 0x308   :  { %1530 = vmatmul.f32.gmra.mxu0 %v1277_v49  ;;  %v1278_v33 = vand.u32 4294901760, %v1277_v49 }
 0x309   :  { %v1097_v39 = vadd.f32 %v1096_v29, %v1012_v55  ;;  %v929_v29 = vadd.f32 %v928_v61, %v813_v50 }
 0x30a   :  { %1646 = vmatmul.f32.gmra.mxu1 %v1278_v33  ;;  %v1279_v15 = vsub.f32 %v1277_v49, %v1278_v33  ;;  %v934_v12 = vpop.f32.mrf.mxu3 }
 0x30b   :  { %v1158_v2 = vsel %vm1123_vm0, %v1097_v39, 0  ;;  %3417 = vrot.lane.b32.xlu0 %v1097_v39, %s4397_s1  ;;  %v935_v23 = vadd.f32 %v934_v12, %v818_v25 }
 0x30c   :  { %v5085_v6 = vand.u32 4294901760, %v1158_v2  ;;  %v1280_v60 = vand.u32 4294901760, %v1279_v15 }
 0x30e   :  { %v1015_v28 = vpop.f32.mrf.mxu0  ;;  %1281 = vmatmul.f32.gmra.mxu2 %v1280_v60  ;;  %1426 = vmatmul.f32.gmra.mxu3 %v5085_v6  ;;  %v1285_v51 = vsub.f32 %v1158_v2, %v5085_v6  ;;  %v1104_v62 = vpop.f32.mrf.mxu1 }
 0x30f   :  { %v1016_v8 = vadd.f32 %v1015_v28, %v917_v22 }
 0x310   :  { %1535 = vmatmul.f32.gmra.mxu0 %v1285_v51  ;;  %v1286_v1 = vand.u32 4294901760, %v1285_v51 }
 0x311   :  { %v5091_v24 = vadd.f32 %v1100_v26, %v1016_v8 }
 0x312   :  { %1652 = vmatmul.f32.gmra.mxu1 %v1286_v1  ;;  %v1287_v38 = vsub.f32 %v1285_v51, %v1286_v1 }
 0x313   :  { %v1161_v63 = vsel %vm1123_vm0, %v5091_v24, 0 }
 0x314   :  { %v5095_v20 = vand.u32 4294901760, %v1161_v63  ;;  %v1288_v16 = vand.u32 4294901760, %v1287_v38 }
 0x316   :  { %v1019_v3 = vpop.f32.mrf.mxu0  ;;  %1289 = vmatmul.f32.gmra.mxu2 %v1288_v16  ;;  %1430 = vmatmul.f32.gmra.mxu3 %v5095_v20  ;;  %v1293_v41 = vsub.f32 %v1161_v63, %v5095_v20  ;;  %v1108_v5 = vpop.f32.mrf.mxu1 }
 0x317   :  { %v1020_v18 = vadd.f32 %v1019_v3, %v923_v35 }
 0x318   :  { %1540 = vmatmul.f32.gmra.mxu0 %v1293_v41  ;;  %v1294_v53 = vand.u32 4294901760, %v1293_v41 }
 0x319   :  { %v1105_v27 = vadd.f32 %v1104_v62, %v1020_v18 }
 0x31a   :  { %1658 = vmatmul.f32.gmra.mxu1 %v1294_v53  ;;  %v1295_v19 = vsub.f32 %v1293_v41, %v1294_v53 }
 0x31b   :  { %v1164_v17 = vsel %vm1123_vm0, %v1105_v27, 0  ;;  %3651 = vrot.lane.b32.xlu2 %v1105_v27, %s4397_s1 }
 0x31c   :  { %v5103_v31 = vand.u32 4294901760, %v1164_v17  ;;  %v1296_v59 = vand.u32 4294901760, %v1295_v19 }
 0x31e   :  { %v1023_v46 = vpop.f32.mrf.mxu0  ;;  %1297 = vmatmul.f32.gmra.mxu2 %v1296_v59  ;;  %1434 = vmatmul.f32.gmra.mxu3 %v5103_v31  ;;  %v1301_v37 = vsub.f32 %v1164_v17, %v5103_v31  ;;  %v1112_v15 = vpop.f32.mrf.mxu1 }
 0x31f   :  { %v1024_v45 = vadd.f32 %v1023_v46, %v929_v29 }
 0x320   :  { %1545 = vmatmul.f32.gmra.mxu0 %v1301_v37  ;;  %v1302_v11 = vand.u32 4294901760, %v1301_v37 }
 0x321   :  { %v5109_v52 = vadd.f32 %v1108_v5, %v1024_v45 }
 0x322   :  { %1664 = vmatmul.f32.gmra.mxu1 %v1302_v11  ;;  %v1303_v30 = vsub.f32 %v1301_v37, %v1302_v11 }
 0x323   :  { %v1167_v49 = vsel %vm1123_vm0, %v5109_v52, 0 }
 0x324   :  { %v5113_v13 = vand.u32 4294901760, %v1167_v49  ;;  %v1304_v55 = vand.u32 4294901760, %v1303_v30 }
 0x325   :  { %v2246_v33 = vpop.permute.xlu0 %2245 }
 0x326   :  { %v1027_v7 = vpop.f32.mrf.mxu0  ;;  %1305 = vmatmul.f32.gmra.mxu2 %v1304_v55  ;;  %1438 = vmatmul.f32.gmra.mxu3 %v5113_v13  ;;  %v1309_v39 = vsub.f32 %v1167_v49, %v5113_v13  ;;  %v2273_v2 = vand.u32 4294901760, %v2246_v33 }
 0x327   :  { %v1028_v26 = vadd.f32 %v1027_v7, %v935_v23 }
 0x328   :  { %1550 = vmatmul.f32.gmra.mxu0 %v1309_v39  ;;  %v1310_v60 = vand.u32 4294901760, %v1309_v39  ;;  %v2313_v28 = vsub.f32 %v2246_v33, %v2273_v2 }
 0x329   :  { %v5117_v22 = vadd.f32 %v1112_v15, %v1028_v26 }
 0x32a   :  { %1670 = vmatmul.f32.gmra.mxu1 %v1310_v60  ;;  %v1311_v42 = vsub.f32 %v1309_v39, %v1310_v60  ;;  %v2314_v62 = vand.u32 4294901760, %v2313_v28 }
 0x32b   :  { %v1170_v10 = vsel %vm1123_vm0, %v5117_v22, 0 }
 0x32c   :  { %v5121_v51 = vand.u32 4294901760, %v1170_v10  ;;  %v1312_v8 = vand.u32 4294901760, %v1311_v42  ;;  %v2315_v3 = vsub.f32 %v2313_v28, %v2314_v62 }
 0x32d   :  { %v2248_v1 = vpop.permute.xlu1 %2247 }
 0x32e   :  { %v2271_v32 = vand.u32 4294901760, %v2248_v1  ;;  %1313 = vmatmul.f32.gmra.mxu2 %v1312_v8  ;;  %1442 = vmatmul.f32.gmra.mxu3 %v5121_v51  ;;  %v1317_v54 = vsub.f32 %v1170_v10, %v5121_v51  ;;  %v2316_v50 = vand.u32 4294901760, %v2315_v3 }
 0x330   :  { %v2307_v38 = vsub.f32 %v2248_v1, %v2271_v32  ;;  %1555 = vmatmul.f32.gmra.mxu0 %v1317_v54  ;;  %2373 = vmatpush.msrb.mxu3 %v2271_v32  ;;  %v1318_v63 = vand.u32 4294901760, %v1317_v54 }
 0x331   :  { %2272 = vmatpush.msrb.mxu0 %v2271_v32 }
 0x332   :  { %v2308_v16 = vand.u32 4294901760, %v2307_v38  ;;  %1676 = vmatmul.f32.gmra.mxu1 %v1318_v63  ;;  %2343 = vmatpush.msrb.mxu2 %v2307_v38  ;;  %v1319_v35 = vsub.f32 %v1317_v54, %v1318_v63 }
 0x333   :  { %2274 = vmatpush.msrb.mxu0 %v2273_v2  ;;  %2375 = vmatpush.msrb.mxu3 %v2273_v2 }
 0x334   :  { %v2309_v48 = vsub.f32 %v2307_v38, %v2308_v16  ;;  %2346 = vmatpush.msrb.mxu2 %v2313_v28  ;;  %v1320_v0 = vand.u32 4294901760, %v1319_v35 }
 0x335   :  { %2406 = vmatpush.msra.mxu0 %v2308_v16  ;;  %v2480_v41 = vpop.permute.xlu1 %2479  ;;  %v1481_v63 = vpop.f32.mrf.mxu0 }
 0x336   :  { %v2310_v18 = vand.u32 4294901760, %v2309_v48  ;;  %1321 = vmatmul.f32.gmra.mxu2 %v1320_v0  ;;  %1810 = vmatmul.f32.vlgmr.msra.gmra.mxu3 %v4997_v36  ;;  %v5126_v53 = vand.u32 4294901760, %v2480_v41 }
 0x337   :  { %2410 = vmatpush.msra.mxu0 %v2314_v62 }
 0x338   :  { %2311 = vmatpush.msrb.mxu1 %v2310_v18  ;;  %v5129_v61 = vsub.f32 %v2480_v41, %v5126_v53 }
 0x339   :  { %v1383_v27 = vpop.f32.mrf.mxu3 }
 0x33a   :  { %2317 = vmatpush.msrb.mxu1 %v2316_v50  ;;  %v2548_v59 = vand.u32 4294901760, %v5129_v61 }
 0x33c   :  { %2435 = vmatpush.msra.mxu1 %v2271_v32  ;;  %v2549_v45 = vsub.f32 %v5129_v61, %v2548_v59 }
 0x33d   :  { %v2482_v19 = vpop.permute.xlu1 %2481  ;;  %v1486_v35 = vpop.f32.mrf.mxu0 }
 0x33e   :  { %2437 = vmatpush.msra.mxu1 %v2273_v2  ;;  %v5131_v17 = vand.u32 4294901760, %v2482_v19  ;;  %1721 = vmatmul.f32.vlgmr.msra.gmra.mxu2 %v4997_v36  ;;  %v2550_v11 = vand.u32 4294901760, %v2549_v45 }
 0x33f   :  { %1814 = vmatmul.f32.gmra.mxu3 %v5005_v58 }
 0x340   :  { %v5137_v29 = vsub.f32 %v2482_v19, %v5131_v17  ;;  %2506 = vmatpush.msra.mxu2 %v5131_v17 }
 0x341   :  { %v1202_v9 = vpop.f32.mrf.mxu2  ;;  %v1387_v5 = vpop.f32.mrf.mxu3 }
 0x342   :  { %v2542_v46 = vand.u32 4294901760, %v5137_v29  ;;  %v5141_v37 = vadd.f32 %v1383_v27, %v1202_v9  ;;  %2508 = vmatpush.msra.mxu2 %v5126_v53 }
 0x344   :  { %v2543_v36 = vsub.f32 %v5137_v29, %v2542_v46  ;;  %v1482_v50 = vadd.f32 %v1481_v63, %v5141_v37  ;;  %v5235_v37 = vld [vmem:[%s5749_s3 + $0x8] sm:$0xff] }
 0x346   :  { %v2544_v56 = vand.u32 4294901760, %v2543_v36  ;;  %1725 = vmatmul.f32.gmra.mxu2 %v5005_v58 }
 0x347   :  { %1818 = vmatmul.f32.gmra.mxu3 %v5013_v40 }
 0x348   :  { %2545 = vmatpush.msra.mxu3 %v2544_v56 }
 0x349   :  { %v1210_v25 = vpop.f32.mrf.mxu2  ;;  %v1391_v30 = vpop.f32.mrf.mxu3 }
 0x34a   :  { %v5152_v49 = vadd.f32 %v1387_v5, %v1210_v25  ;;  %2551 = vmatpush.msra.mxu3 %v2550_v11 }
 0x34c   :  { %v1487_v5 = vadd.f32 %v1486_v35, %v5152_v49 }
 0x34e   :  { %1729 = vmatmul.f32.gmra.mxu2 %v5013_v40 }
 0x34f   :  { %1822 = vmatmul.f32.gmra.mxu3 %v5021_v44 }
 0x351   :  { %v1218_v12 = vpop.f32.mrf.mxu2  ;;  %v1395_v55 = vpop.f32.mrf.mxu3 }
 0x352   :  { %v5156_v23 = vadd.f32 %v1391_v30, %v1218_v12 }
 0x356   :  { %1733 = vmatmul.f32.gmra.mxu2 %v5021_v44 }
 0x357   :  { %1826 = vmatmul.f32.gmra.mxu3 %v5029_v21 }
 0x359   :  { %v1226_v58 = vpop.f32.mrf.mxu2  ;;  %v1399_v33 = vpop.f32.mrf.mxu3 }
 0x35a   :  { %v5160_v7 = vadd.f32 %v1395_v55, %v1226_v58 }
 0x35e   :  { %1737 = vmatmul.f32.gmra.mxu2 %v5029_v21 }
 0x35f   :  { %1830 = vmatmul.f32.gmra.mxu3 %v5037_v57 }
 0x361   :  { %v1234_v39 = vpop.f32.mrf.mxu2  ;;  %v1403_v40 = vpop.f32.mrf.mxu3 }
 0x362   :  { %v5164_v26 = vadd.f32 %v1399_v33, %v1234_v39 }
 0x366   :  { %1741 = vmatmul.f32.gmra.mxu2 %v5037_v57 }
 0x367   :  { %1834 = vmatmul.f32.gmra.mxu3 %v5045_v34 }
 0x369   :  { %v1242_v15 = vpop.f32.mrf.mxu2  ;;  %v1407_v44 = vpop.f32.mrf.mxu3 }
 0x36a   :  { %v5168_v2 = vadd.f32 %v1403_v40, %v1242_v15 }
 0x36e   :  { %1745 = vmatmul.f32.gmra.mxu2 %v5045_v34 }
 0x36f   :  { %1838 = vmatmul.f32.gmra.mxu3 %v5053_v43 }
 0x371   :  { %v1250_v60 = vpop.f32.mrf.mxu2  ;;  %v1411_v21 = vpop.f32.mrf.mxu3 }
 0x372   :  { %v5172_v42 = vadd.f32 %v1407_v44, %v1250_v60 }
 0x376   :  { %1749 = vmatmul.f32.gmra.mxu2 %v5053_v43 }
 0x377   :  { %1842 = vmatmul.f32.gmra.mxu3 %v5061_v4 }
 0x379   :  { %v1258_v10 = vpop.f32.mrf.mxu2  ;;  %v5176_v57 = vpop.f32.mrf.mxu3 }
 0x37a   :  { %v5178_v28 = vadd.f32 %v1411_v21, %v1258_v10 }
 0x37e   :  { %1753 = vmatmul.f32.gmra.mxu2 %v5061_v4 }
 0x37f   :  { %1846 = vmatmul.f32.gmra.mxu3 %v5069_v14 }
 0x381   :  { %v5182_v34 = vpop.f32.mrf.mxu2  ;;  %v5184_v8 = vpop.f32.mrf.mxu3 }
 0x386   :  { %1757 = vmatmul.f32.gmra.mxu2 %v5069_v14 }
 0x387   :  { %1850 = vmatmul.f32.gmra.mxu3 %v5077_v47 }
 0x389   :  { %v5188_v43 = vpop.f32.mrf.mxu2  ;;  %v5190_v1 = vpop.f32.mrf.mxu3 }
 0x38e   :  { %1761 = vmatmul.f32.gmra.mxu2 %v5077_v47 }
 0x38f   :  { %1854 = vmatmul.f32.gmra.mxu3 %v5085_v6 }
 0x391   :  { %v5194_v32 = vpop.f32.mrf.mxu2  ;;  %v5196_v4 = vpop.f32.mrf.mxu3 }
 0x396   :  { %1765 = vmatmul.f32.gmra.mxu2 %v5085_v6  ;;  %v1587_v6 = vpop.f32.mrf.mxu1 }
 0x397   :  { %1858 = vmatmul.f32.gmra.mxu3 %v5095_v20 }
 0x399   :  { %v5200_v54 = vpop.f32.mrf.mxu2  ;;  %v5202_v14 = vpop.f32.mrf.mxu3 }
 0x39e   :  { %1769 = vmatmul.f32.gmra.mxu2 %v5095_v20  ;;  %v1593_v0 = vpop.f32.mrf.mxu1 }
 0x39f   :  { %1862 = vmatmul.f32.gmra.mxu3 %v5103_v31  ;;  %v1594_v11 = vadd.f32 %v1593_v0, %v1487_v5 }
 0x3a1   :  { %v5206_v38 = vpop.f32.mrf.mxu2  ;;  %v5208_v47 = vpop.f32.mrf.mxu3 }
 0x3a6   :  { %1773 = vmatmul.f32.gmra.mxu2 %v5103_v31  ;;  %v1491_v31 = vpop.f32.mrf.mxu0  ;;  %v1599_v18 = vpop.f32.mrf.mxu1 }
 0x3a7   :  { %1866 = vmatmul.f32.gmra.mxu3 %v5113_v13  ;;  %v1492_v33 = vadd.f32 %v1491_v31, %v5156_v23 }
 0x3a9   :  { %v5212_v62 = vpop.f32.mrf.mxu2  ;;  %v5214_v16 = vpop.f32.mrf.mxu3  ;;  %v1600_v63 = vadd.f32 %v1599_v18, %v1492_v33 }
 0x3ae   :  { %1777 = vmatmul.f32.gmra.mxu2 %v5113_v13  ;;  %v1496_v9 = vpop.f32.mrf.mxu0  ;;  %v1588_v13 = vadd.f32 %v1587_v6, %v1482_v50  ;;  %v1605_v45 = vpop.f32.mrf.mxu1 }
 0x3af   :  { %1870 = vmatmul.f32.gmra.mxu3 %v5121_v51  ;;  %v1497_v35 = vadd.f32 %v1496_v9, %v5160_v7 }
 0x3b1   :  { %v5218_v20 = vpop.f32.mrf.mxu2  ;;  %v5220_v48 = vpop.f32.mrf.mxu3  ;;  %v1606_v23 = vadd.f32 %v1605_v45, %v1497_v35 }
 0x3b6   :  { %1781 = vmatmul.f32.gmra.mxu2 %v5121_v51  ;;  %v5230_v51 = vld [vmem:[%s5749_s3] sm:$0xff]  ;;  %v1501_v55 = vpop.f32.mrf.mxu0  ;;  %v1611_v40 = vpop.f32.mrf.mxu1 }
 0x3b7   :  { %v1502_v18 = vadd.f32 %v1501_v55, %v5164_v26 }
 0x3b9   :  { %v5223_v3 = vpop.f32.mrf.mxu2  ;;  %v1811_v41 = vpop.f32.mrf.mxu3  ;;  %v1612_v35 = vadd.f32 %v1611_v40, %v1502_v18 }
 0x3be   :  { %v1506_v50 = vpop.f32.mrf.mxu0 }
 0x3c1   :  { %v1722_v27 = vpop.f32.mrf.mxu2 }
 0x3c2   :  { %v1815_v19 = vpop.f32.mrf.mxu3  ;;  %v1723_v36 = vadd.f32 %v1722_v27, %v1588_v13 }
 0x3c4   :  { %v1812_v56 = vadd.f32 %v1811_v41, %v1723_v36 }
 0x3c6   :  { %v1876_v49 = vadd.f32 %v5230_v51, %v1812_v56  ;;  %v1617_v56 = vpop.f32.mrf.mxu1 }
 0x3c8   :  { %v1893_v15 = vsel %vm1892_vm5, %v1876_v49, -inf }
 0x3c9   :  { %v1726_v25 = vpop.f32.mrf.mxu2 }
 0x3ca   :  { %v1819_v30 = vpop.f32.mrf.mxu3  ;;  %v1727_v12 = vadd.f32 %v1726_v25, %v1594_v11 }
 0x3cc   :  { %v1816_v58 = vadd.f32 %v1815_v19, %v1727_v12 }
 0x3ce   :  { %v1877_v39 = vadd.f32 %v5235_v37, %v1816_v58  ;;  %v1623_v55 = vpop.f32.mrf.mxu1 }
 0x3d0   :  { %v1894_v44 = vsel %vm1892_vm5, %v1877_v39, -inf }
 0x3d1   :  { %v1895_v60 = vmax.f32 %v1893_v15, %v1894_v44  ;;  %v1730_v21 = vpop.f32.mrf.mxu2  ;;  %v1511_v15 = vpop.f32.mrf.mxu0 }
 0x3d2   :  { %v1823_v10 = vpop.f32.mrf.mxu3  ;;  %v1731_v0 = vadd.f32 %v1730_v21, %v1600_v63 }
 0x3d3   :  { %v1896_v6 = vrot.slane %v1895_v60, 4 }
 0x3d4   :  { %v1820_v19 = vadd.f32 %v1819_v30, %v1731_v0  ;;  %v1507_v0 = vadd.f32 %v1506_v50, %v5168_v2 }
 0x3d5   :  { %v1897_v41 = vmax.f32 %v1895_v60, %v1896_v6 }
 0x3d6   :  { %v1878_v25 = vadd.f32 %v5230_v51, %v1820_v19 }
 0x3d7   :  { %v1898_v27 = vrot.slane %v1897_v41, 2 }
 0x3d8   :  { %v1902_v30 = vsel %vm1892_vm5, %v1878_v25, -inf }
 0x3d9   :  { %v1899_v31 = vmax.f32 %v1897_v41, %v1898_v27  ;;  %v1734_v13 = vpop.f32.mrf.mxu2  ;;  %v1618_v27 = vadd.f32 %v1617_v56, %v1507_v0 }
 0x3da   :  { %v1827_v5 = vpop.f32.mrf.mxu3  ;;  %v1735_v36 = vadd.f32 %v1734_v13, %v1606_v23 }
 0x3db   :  { %v1900_v11 = vrot.slane %v1899_v31, 1 }
 0x3dc   :  { %v1824_v12 = vadd.f32 %v1823_v10, %v1735_v36 }
 0x3dd   :  { %v1901_v58 = vmax.f32 %v1899_v31, %v1900_v11  ;;  %v1516_v11 = vpop.f32.mrf.mxu0 }
 0x3de   :  { %v1879_v7 = vadd.f32 %v5235_v37, %v1824_v12 }
 0x3df   :  { %v1966_v9 = vsub.f32 %v1877_v39, %v1901_v58  ;;  %v1965_v33 = vsub.f32 %v1876_v49, %v1901_v58 }
 0x3e0   :  { %v1903_v45 = vsel %vm1892_vm5, %v1879_v7, -inf }
 0x3e1   :  { %v1983_v44 = vmul.f32 1.442695, %v1966_v9  ;;  %v1904_v60 = vmax.f32 %v1902_v30, %v1903_v45  ;;  %v1738_v21 = vpop.f32.mrf.mxu2  ;;  %v1981_v6 = vmul.f32 1.442695, %v1965_v33  ;;  %v1512_v9 = vadd.f32 %v1511_v15, %v5172_v42  ;;  %v1629_v45 = vpop.f32.mrf.mxu1 }
 0x3e2   :  { %v1831_v63 = vpop.f32.mrf.mxu3  ;;  %v1739_v26 = vadd.f32 %v1738_v21, %v1612_v35 }
 0x3e3   :  { %4293 = vpow2.f32 %v1983_v44  ;;  %v1905_v10 = vrot.slane %v1904_v60, 4 }
 0x3e4   :  { %4295 = vpow2.f32 %v1981_v6  ;;  %v1828_v41 = vadd.f32 %v1827_v5, %v1739_v26 }
 0x3e5   :  { %v1906_v39 = vmax.f32 %v1904_v60, %v1905_v10 }
 0x3e6   :  { %v5258_v58 = vadd.f32 %v5230_v51, %v1828_v41  ;;  %v1521_v41 = vpop.f32.mrf.mxu0 }
 0x3e7   :  { %v1907_v49 = vrot.slane %v1906_v39, 2 }
 0x3e8   :  { %v1911_v21 = vsel %vm1892_vm5, %v5258_v58, -inf }
 0x3e9   :  { %v5249_v19 = vpop.eup %4293  ;;  %v1908_v23 = vmax.f32 %v1906_v39, %v1907_v49  ;;  %v1742_v31 = vpop.f32.mrf.mxu2  ;;  %v1624_v39 = vadd.f32 %v1623_v55, %v1512_v9 }
 0x3ea   :  { %v1835_v13 = vpop.f32.mrf.mxu3  ;;  %v5251_v36 = vpop.eup %4295  ;;  %v2014_v40 = vsel %vm1892_vm5, %v5249_v19, 0.0  ;;  %v1743_v12 = vadd.f32 %v1742_v31, %v1618_v27  ;;  %v1517_v27 = vadd.f32 %v1516_v11, %v5178_v28  ;;  %v1416_v28 = vadd.f32 %v5176_v57, %v5182_v34 }
 0x3eb   :  { %v1909_v2 = vrot.slane %v1908_v23, 1  ;;  %v2013_v50 = vsel %vm1892_vm5, %v5251_v36, 0.0  ;;  %v1635_v55 = vpop.f32.mrf.mxu1 }
 0x3ec   :  { %v1832_v5 = vadd.f32 %v1831_v63, %v1743_v12  ;;  %v2015_v56 = vadd.f32 %v2014_v40, %v2013_v50 }
 0x3ed   :  { %v1910_v18 = vmax.f32 %v1908_v23, %v1909_v2  ;;  %v1630_v2 = vadd.f32 %v1629_v45, %v1517_v27 }
 0x3ee   :  { %v1881_v33 = vadd.f32 %v5235_v37, %v1832_v5  ;;  %v2016_v30 = vrot.slane %v2015_v56, 4 }
 0x3ef   :  { %v1968_v44 = vsub.f32 %v1879_v7, %v1910_v18  ;;  %v1967_v60 = vsub.f32 %v1878_v25, %v1910_v18 }
 0x3f0   :  { %v1912_v6 = vsel %vm1892_vm5, %v1881_v33, -inf  ;;  %v2017_v35 = vadd.f32 %v2016_v30, %v2015_v56 }
 0x3f1   :  { %v1987_v10 = vmul.f32 1.442695, %v1968_v44  ;;  %v1913_v0 = vmax.f32 %v1911_v21, %v1912_v6  ;;  %v1746_v26 = vpop.f32.mrf.mxu2  ;;  %v1985_v63 = vmul.f32 1.442695, %v1967_v60 }
 0x3f2   :  { %v2018_v49 = vrot.slane %v2017_v35, 2  ;;  %v1839_v15 = vpop.f32.mrf.mxu3  ;;  %v1747_v7 = vadd.f32 %v1746_v26, %v1624_v39  ;;  %v1420_v26 = vadd.f32 %v5184_v8, %v5188_v43 }
 0x3f3   :  { %4297 = vpow2.f32 %v1987_v10  ;;  %v1914_v42 = vrot.slane %v1913_v0, 4  ;;  %v1526_v10 = vpop.f32.mrf.mxu0  ;;  %v1641_v8 = vpop.f32.mrf.mxu1 }
 0x3f4   :  { %v2019_v25 = vadd.f32 %v2018_v49, %v2017_v35  ;;  %4299 = vpow2.f32 %v1985_v63  ;;  %v1836_v12 = vadd.f32 %v1835_v13, %v1747_v7  ;;  %v1527_v43 = vadd.f32 %v1526_v10, %v1420_v26 }
 0x3f5   :  { %v1915_v23 = vmax.f32 %v1913_v0, %v1914_v42  ;;  %v1522_v0 = vadd.f32 %v1521_v41, %v1416_v28 }
 0x3f6   :  { %v2020_v31 = vrot.slane %v2019_v25, 1  ;;  %v5280_v44 = vadd.f32 %v5230_v51, %v1836_v12  ;;  %v1642_v10 = vadd.f32 %v1641_v8, %v1527_v43 }
 0x3f7   :  { %v1916_v40 = vrot.slane %v1915_v23, 2 }
 0x3f8   :  { %v5266_v50 = vadd.f32 %v2020_v31, %v2019_v25  ;;  %v1920_v42 = vsel %vm1892_vm5, %v5280_v44, -inf  ;;  %v1636_v31 = vadd.f32 %v1635_v55, %v1522_v0 }
 0x3f9   :  { %v5268_v5 = vpop.eup %4297  ;;  %v1917_v56 = vmax.f32 %v1915_v23, %v1916_v40  ;;  %v1750_v18 = vpop.f32.mrf.mxu2 }
 0x3fa   :  { %v5270_v9 = vpop.eup %4299  ;;  %v2023_v11 = vsel %vm1892_vm5, %v5268_v5, 0.0  ;;  %v1751_v30 = vadd.f32 %v1750_v18, %v1630_v2  ;;  %4301 = vrcp.f32 %v5266_v50  ;;  %v1843_v35 = vpop.f32.mrf.mxu3  ;;  %vm2090_vm7 = vweird.f32 %v5266_v50 }
 0x3fb   :  { %v1918_v13 = vrot.slane %v1917_v56, 1  ;;  %v2022_v45 = vsel %vm1892_vm5, %v5270_v9, 0.0 }
 0x3fc   :  { %v1840_v60 = vadd.f32 %v1839_v15, %v1751_v30  ;;  %v2024_v21 = vadd.f32 %v2023_v11, %v2022_v45  ;;  %v2094_v30 = vand.u32 2147483647, %v5266_v50 }
 0x3fd   :  { %v1919_v6 = vmax.f32 %v1917_v56, %v1918_v13  ;;  %v2096_v56 = vand.u32 2147483648, %v5266_v50 }
 0x3fe   :  { %v5283_v57 = vadd.f32 %v5235_v37, %v1840_v60  ;;  %v2025_v34 = vrot.slane %v2024_v21, 4  ;;  %vm2095_vm9 = vcmp.eq.f32.partialorder %v2094_v30, 8.507059e+37 }
 0x3ff   :  { %v1970_v63 = vsub.f32 %v1881_v33, %v1919_v6  ;;  %v1969_v39 = vsub.f32 %v5258_v58, %v1919_v6  ;;  %v2097_v0 = vor.u32 1.1754944e-38, %v2096_v56 }
 0x400   :  { %v4302_v49 = vpop.eup %4301  ;;  %v1921_v15 = vsel %vm1892_vm5, %v5283_v57, -inf  ;;  %v2026_v27 = vadd.f32 %v2025_v34, %v2024_v21  ;;  %v1531_v21 = vpop.f32.mrf.mxu0 }
 0x401   :  { %v1991_v7 = vmul.f32 1.442695, %v1970_v63  ;;  %v1922_v41 = vmax.f32 %v1920_v42, %v1921_v15  ;;  %v1754_v25 = vpop.f32.mrf.mxu2  ;;  %v2086_v23 = vmul.f32 %v4302_v49, %v5266_v50  ;;  %v1989_v12 = vmul.f32 1.442695, %v1969_v39 }
 0x402   :  { %v2027_v40 = vrot.slane %v2026_v27, 2  ;;  %v1755_v2 = vadd.f32 %v1754_v25, %v1636_v31  ;;  %vm2091_vm6 = vweird.f32 %v4302_v49  ;;  %v1847_v55 = vpop.f32.mrf.mxu3  ;;  %v1424_v63 = vadd.f32 %v5190_v1, %v5194_v32  ;;  %v1647_v31 = vpop.f32.mrf.mxu1 }
 0x403   :  { %4303 = vpow2.f32 %v1991_v7  ;;  %v1923_v58 = vrot.slane %v1922_v41, 4  ;;  %v2087_v33 = vsub.f32 1.0, %v2086_v23  ;;  %vm2092_vm8 = vmor %vm2090_vm7, %vm2091_vm6 }
 0x404   :  { %v2028_v18 = vadd.f32 %v2027_v40, %v2026_v27  ;;  %4305 = vpow2.f32 %v1989_v12  ;;  %v1844_v6 = vadd.f32 %v1843_v35, %v1755_v2  ;;  %v1532_v8 = vadd.f32 %v1531_v21, %v1424_v63 }
 0x405   :  { %v1924_v28 = vmax.f32 %v1922_v41, %v1923_v58  ;;  %v2088_v11 = vmul.f32 %v4302_v49, %v2087_v33 }
 0x406   :  { %v2029_v13 = vrot.slane %v2028_v18, 1  ;;  %v5310_v1 = vadd.f32 %v5230_v51, %v1844_v6 }
 0x407   :  { %v1925_v45 = vrot.slane %v1924_v28, 2  ;;  %v2089_v60 = vadd.f32 %v4302_v49, %v2088_v11 }
 0x408   :  { %v5296_v34 = vadd.f32 %v2029_v13, %v2028_v18  ;;  %v1929_v56 = vsel %vm1892_vm5, %v5310_v1, -inf }
 0x409   :  { %v5298_v26 = vpop.eup %4303  ;;  %v1926_v39 = vmax.f32 %v1924_v28, %v1925_v45  ;;  %v1758_v42 = vpop.f32.mrf.mxu2  ;;  %v2093_v15 = vsel %vm2092_vm8, %v4302_v49, %v2089_v60 }
 0x40a   :  { %v5302_v27 = vpop.eup %4305  ;;  %v2032_v50 = vsel %vm1892_vm5, %v5298_v26, 0.0  ;;  %v1759_v35 = vadd.f32 %v1758_v42, %v1642_v10  ;;  %v2098_v7 = vsel %vm2095_vm9, %v2097_v0, %v2093_v15  ;;  %4307 = vrcp.f32 %v5296_v34  ;;  %v1851_v30 = vpop.f32.mrf.mxu3 }
 0x40b   :  { %v1927_v41 = vrot.slane %v1926_v39, 1  ;;  %v2099_v25 = vmul.f32 %v5251_v36, %v2098_v7  ;;  %v2100_v23 = vmul.f32 %v5249_v19, %v2098_v7  ;;  %v2031_v49 = vsel %vm1892_vm5, %v5302_v27, 0.0 }
 0x40c   :  { %v1848_v32 = vadd.f32 %v1847_v55, %v1759_v35  ;;  %v2033_v12 = vadd.f32 %v2032_v50, %v2031_v49  ;;  %v1428_v36 = vadd.f32 %v5196_v4, %v5200_v54  ;;  %v1536_v55 = vpop.f32.mrf.mxu0  ;;  %v1648_v4 = vadd.f32 %v1647_v31, %v1532_v8  ;;  %v1653_v50 = vpop.f32.mrf.mxu1 }
 0x40d   :  { %v1928_v40 = vmax.f32 %v1926_v39, %v1927_v41  ;;  %2213 = vxpose.xlu2.b32.start [1/2] (short) (narrow) %v2099_v25, 16  ;;  %v2112_v10 = vand.u32 2147483648, %v5296_v34  ;;  %v2110_v42 = vand.u32 2147483647, %v5296_v34  ;;  %vm2106_vm11 = vweird.f32 %v5296_v34 }
 0x40e   :  { %v5315_v43 = vadd.f32 %v5235_v37, %v1848_v32  ;;  %v2034_v58 = vrot.slane %v2033_v12, 4  ;;  %v1537_v60 = vadd.f32 %v1536_v55, %v1428_v36 }
 0x40f   :  { %v1972_v19 = vsub.f32 %v5283_v57, %v1928_v40  ;;  %v1971_v33 = vsub.f32 %v5280_v44, %v1928_v40  ;;  %v2113_v32 = vor.u32 1.1754944e-38, %v2112_v10  ;;  %vm2111_vm13 = vcmp.eq.f32.partialorder %v2110_v42, 8.507059e+37 }
 0x410   :  { %v4308_v2 = vpop.eup %4307  ;;  %v1930_v18 = vsel %vm1892_vm5, %v5315_v43, -inf  ;;  %v2035_v54 = vadd.f32 %v2034_v58, %v2033_v12  ;;  %v1654_v25 = vadd.f32 %v1653_v50, %v1537_v60 }
 0x411   :  { %v1995_v28 = vmul.f32 1.442695, %v1972_v19  ;;  %v1931_v11 = vmax.f32 %v1929_v56, %v1930_v18  ;;  %v1762_v13 = vpop.f32.mrf.mxu2  ;;  %v2102_v45 = vmul.f32 %v4308_v2, %v5296_v34  ;;  %v1993_v57 = vmul.f32 1.442695, %v1971_v33 }
 0x412   :  { %v1763_v6 = vadd.f32 %v1762_v13, %v1648_v4  ;;  %v2036_v0 = vrot.slane %v2035_v54, 2  ;;  %vm2107_vm10 = vweird.f32 %v4308_v2  ;;  %v1855_v56 = vpop.f32.mrf.mxu3 }
 0x413   :  { %4309 = vpow2.f32 %v1995_v28  ;;  %v1932_v44 = vrot.slane %v1931_v11, 4  ;;  %v2103_v21 = vsub.f32 1.0, %v2102_v45  ;;  %vm2108_vm12 = vmor %vm2106_vm11, %vm2107_vm10 }
 0x414   :  { %4311 = vpow2.f32 %v1993_v57  ;;  %v2037_v15 = vadd.f32 %v2036_v0, %v2035_v54  ;;  %v1852_v41 = vadd.f32 %v1851_v30, %v1763_v6 }
 0x415   :  { %v1933_v63 = vmax.f32 %v1931_v11, %v1932_v44  ;;  %2214 = vxpose.xlu2.b32.end [2/2] (short) (narrow) %v2100_v23, 16  ;;  %v2104_v39 = vmul.f32 %v4308_v2, %v2103_v21 }
 0x416   :  { %v2038_v49 = vrot.slane %v2037_v15, 1 }
 0x417   :  { %v1934_v35 = vrot.slane %v1933_v63, 2  ;;  %v2105_v7 = vadd.f32 %v4308_v2, %v2104_v39 }
 0x418   :  { %v2039_v33 = vadd.f32 %v2038_v49, %v2037_v15 }
 0x419   :  { %v5329_v31 = vpop.eup %4309  ;;  %v1935_v40 = vmax.f32 %v1933_v63, %v1934_v35  ;;  %v1766_v12 = vpop.f32.mrf.mxu2  ;;  %v2109_v23 = vsel %vm2108_vm12, %v4308_v2, %v2105_v7  ;;  %v1886_v2 = vadd.f32 %v5230_v51, %v1852_v41 }
 0x41a   :  { %v5331_v8 = vpop.eup %4311  ;;  %v2041_v36 = vsel %vm1892_vm5, %v5329_v31, 0.0  ;;  %v1767_v19 = vadd.f32 %v1766_v12, %v1654_v25  ;;  %v2114_v58 = vsel %vm2111_vm13, %v2113_v32, %v2109_v23  ;;  %4313 = vrcp.f32 %v2039_v33 }
 0x41b   :  { %v1936_v34 = vrot.slane %v1935_v40, 1  ;;  %v2115_v18 = vmul.f32 %v5270_v9, %v2114_v58  ;;  %v2116_v28 = vmul.f32 %v5268_v5, %v2114_v58  ;;  %v2040_v11 = vsel %vm1892_vm5, %v5331_v8, 0.0 }
 0x41c   :  { %v1856_v30 = vadd.f32 %v1855_v56, %v1767_v19  ;;  %v2042_v45 = vadd.f32 %v2041_v36, %v2040_v11  ;;  %v1938_v9 = vsel %vm1892_vm5, %v1886_v2, -inf  ;;  %v2126_v15 = vand.u32 2147483647, %v2039_v33 }
 0x41d   :  { %v1937_v13 = vmax.f32 %v1935_v40, %v1936_v34  ;;  %2447 = vxpose.xlu0.b32.start [1/2] (short) (narrow) %v2115_v18, 16  ;;  %v2128_v50 = vand.u32 2147483648, %v2039_v33  ;;  %vm2122_vm15 = vweird.f32 %v2039_v33 }
 0x41e   :  { %v1887_v55 = vadd.f32 %v5235_v37, %v1856_v30  ;;  %v2043_v54 = vrot.slane %v2042_v45, 4  ;;  %vm2127_vm2 = vcmp.eq.f32.partialorder %v2126_v15, 8.507059e+37 }
 0x41f   :  { %v1974_v4 = vsub.f32 %v5315_v43, %v1937_v13  ;;  %v1973_v57 = vsub.f32 %v5310_v1, %v1937_v13  ;;  %v2129_v12 = vor.u32 1.1754944e-38, %v2128_v50 }
 0x420   :  { %v1939_v5 = vsel %vm1892_vm5, %v1887_v55, -inf  ;;  %v2044_v21 = vadd.f32 %v2043_v54, %v2042_v45  ;;  %v4314_v10 = vpop.eup %4313 }
 0x421   :  { %v1999_v60 = vmul.f32 1.442695, %v1974_v4  ;;  %v1940_v44 = vmax.f32 %v1938_v9, %v1939_v5  ;;  %v1997_v6 = vmul.f32 1.442695, %v1973_v57  ;;  %v2118_v63 = vmul.f32 %v4314_v10, %v2039_v33 }
 0x422   :  { %v2045_v39 = vrot.slane %v2044_v21, 2  ;;  %vm2123_vm14 = vweird.f32 %v4314_v10 }
 0x423   :  { %4315 = vpow2.f32 %v1999_v60  ;;  %v1941_v0 = vrot.slane %v1940_v44, 4  ;;  %v2119_v43 = vsub.f32 1.0, %v2118_v63  ;;  %vm2124_vm1 = vmor %vm2122_vm15, %vm2123_vm14 }
 0x424   :  { %4317 = vpow2.f32 %v1997_v6  ;;  %v2046_v1 = vadd.f32 %v2045_v39, %v2044_v21 }
 0x425   :  { %v1942_v42 = vmax.f32 %v1940_v44, %v1941_v0  ;;  %2448 = vxpose.xlu0.b32.end [2/2] (short) (narrow) %v2116_v28, 16  ;;  %v2120_v7 = vmul.f32 %v4314_v10, %v2119_v43 }
 0x426   :  { %v2047_v41 = vrot.slane %v2046_v1, 1 }
 0x427   :  { %v1943_v35 = vrot.slane %v1942_v42, 2  ;;  %v2121_v49 = vadd.f32 %v4314_v10, %v2120_v7 }
 0x428   :  { %v2048_v23 = vadd.f32 %v2047_v41, %v2046_v1 }
 0x429   :  { %v5345_v25 = vpop.eup %4315  ;;  %v1944_v32 = vmax.f32 %v1942_v42, %v1943_v35  ;;  %v2125_v58 = vsel %vm2124_vm1, %v4314_v10, %v2121_v49 }
 0x42a   :  { %v5347_v40 = vpop.eup %4317  ;;  %v2050_v36 = vsel %vm1892_vm5, %v5345_v25, 0.0  ;;  %v2130_v56 = vsel %vm2127_vm2, %v2129_v12, %v2125_v58  ;;  %4319 = vrcp.f32 %v2048_v23  ;;  %v2144_v21 = vand.u32 2147483648, %v2048_v23 }
 0x42b   :  { %v1945_v19 = vrot.slane %v1944_v32, 1  ;;  %v2049_v34 = vsel %vm1892_vm5, %v5347_v40, 0.0  ;;  %v2131_v28 = vmul.f32 %v5302_v27, %v2130_v56  ;;  %v2132_v33 = vmul.f32 %v5298_v26, %v2130_v56 }
 0x42c   :  { %v2051_v11 = vadd.f32 %v2050_v36, %v2049_v34  ;;  %v2142_v26 = vand.u32 2147483647, %v2048_v23  ;;  %vm2138_vm4 = vweird.f32 %v2048_v23  ;;  %v2145_v63 = vor.u32 1.1754944e-38, %v2144_v21  ;;  %v1541_v36 = vpop.f32.mrf.mxu0 }
 0x42d   :  { %v1946_v18 = vmax.f32 %v1944_v32, %v1945_v19  ;;  %2681 = vxpose.xlu1.b32.start [1/2] (short) (narrow) %v2131_v28, 16 }
 0x42e   :  { %v2052_v45 = vrot.slane %v2051_v11, 4  ;;  %vm2143_vm7 = vcmp.eq.f32.partialorder %v2142_v26, 8.507059e+37 }
 0x42f   :  { %v1976_v30 = vsub.f32 %v1887_v55, %v1946_v18  ;;  %v1975_v13 = vsub.f32 %v1886_v2, %v1946_v18 }
 0x430   :  { %v4320_v57 = vpop.eup %4319  ;;  %v2053_v9 = vadd.f32 %v2052_v45, %v2051_v11 }
 0x431   :  { %v2003_v4 = vmul.f32 1.442695, %v1976_v30  ;;  %v2001_v54 = vmul.f32 1.442695, %v1975_v13  ;;  %v2134_v5 = vmul.f32 %v4320_v57, %v2048_v23  ;;  %vm2139_vm3 = vweird.f32 %v4320_v57 }
 0x432   :  { %v2054_v60 = vrot.slane %v2053_v9, 2  ;;  %vm2140_vm6 = vmor %vm2138_vm4, %vm2139_vm3 }
 0x433   :  { %4321 = vpow2.f32 %v2003_v4  ;;  %v2135_v44 = vsub.f32 1.0, %v2134_v5  ;;  %v1432_v5 = vadd.f32 %v5202_v14, %v5206_v38 }
 0x434   :  { %4323 = vpow2.f32 %v2001_v54  ;;  %v2055_v6 = vadd.f32 %v2054_v60, %v2053_v9  ;;  %v1546_v54 = vpop.f32.mrf.mxu0  ;;  %v1859_v9 = vpop.f32.mrf.mxu3 }
 0x435   :  { %2682 = vxpose.xlu1.b32.end [2/2] (short) (narrow) %v2132_v33, 16  ;;  %v2136_v27 = vmul.f32 %v4320_v57, %v2135_v44  ;;  %v1659_v33 = vpop.f32.mrf.mxu1  ;;  %v1542_v26 = vadd.f32 %v1541_v36, %v1432_v5  ;;  %v1440_v36 = vadd.f32 %v5214_v16, %v5218_v20 }
 0x436   :  { %v2056_v10 = vrot.slane %v2055_v6, 1 }
 0x437   :  { %v2137_v2 = vadd.f32 %v4320_v57, %v2136_v27 }
 0x438   :  { %v2057_v39 = vadd.f32 %v2056_v10, %v2055_v6 }
 0x439   :  { %v5355_v55 = vpop.eup %4321  ;;  %v2141_v43 = vsel %vm2140_vm6, %v4320_v57, %v2137_v2  ;;  %v1436_v57 = vadd.f32 %v5208_v47, %v5212_v62 }
 0x43a   :  { %v5357_v0 = vpop.eup %4323  ;;  %v2059_v42 = vsel %vm1892_vm5, %v5355_v55, 0.0  ;;  %v2146_v50 = vsel %vm2143_vm7, %v2145_v63, %v2141_v43  ;;  %4325 = vrcp.f32 %v2057_v39  ;;  %v2160_v58 = vand.u32 2147483648, %v2057_v39 }
 0x43b   :  { %v2058_v15 = vsel %vm1892_vm5, %v5357_v0, 0.0  ;;  %v2147_v1 = vmul.f32 %v5331_v8, %v2146_v50  ;;  %v2148_v35 = vmul.f32 %v5329_v31, %v2146_v50  ;;  %v2158_v18 = vand.u32 2147483647, %v2057_v39  ;;  %v1770_v8 = vpop.f32.mrf.mxu2 }
 0x43c   :  { %v2060_v7 = vadd.f32 %v2059_v42, %v2058_v15  ;;  %vm2154_vm9 = vweird.f32 %v2057_v39  ;;  %v2161_v31 = vor.u32 1.1754944e-38, %v2160_v58  ;;  %v1547_v21 = vadd.f32 %v1546_v54, %v1436_v57  ;;  %v1551_v62 = vpop.f32.mrf.mxu0  ;;  %v1863_v43 = vpop.f32.mrf.mxu3 }
 0x43d   :  { %2915 = vxpose.xlu2.b32.start [1/2] (short) (narrow) %v2147_v1, 16  ;;  %vm2159_vm11 = vcmp.eq.f32.partialorder %v2158_v18, 8.507059e+37  ;;  %v1665_v44 = vpop.f32.mrf.mxu1  ;;  %v1660_v42 = vadd.f32 %v1659_v33, %v1542_v26 }
 0x43e   :  { %v2061_v41 = vrot.slane %v2060_v7, 4 }
 0x43f   :  { %v1771_v50 = vadd.f32 %v1770_v8, %v1660_v42 }
 0x440   :  { %v4326_v32 = vpop.eup %4325  ;;  %v2062_v49 = vadd.f32 %v2061_v41, %v2060_v7 }
 0x441   :  { %v2150_v12 = vmul.f32 %v4326_v32, %v2057_v39  ;;  %vm2155_vm8 = vweird.f32 %v4326_v32 }
 0x442   :  { %v2063_v23 = vrot.slane %v2062_v49, 2  ;;  %vm2156_vm10 = vmor %vm2154_vm9, %vm2155_vm8 }
 0x443   :  { %v2151_v19 = vsub.f32 1.0, %v2150_v12  ;;  %v1774_v6 = vpop.f32.mrf.mxu2  ;;  %v1444_v12 = vadd.f32 %v5220_v48, %v5223_v3 }
 0x444   :  { %v2064_v34 = vadd.f32 %v2063_v23, %v2062_v49  ;;  %v1860_v49 = vadd.f32 %v1859_v9, %v1771_v50 }
 0x445   :  { %2916 = vxpose.xlu2.b32.end [2/2] (short) (narrow) %v2148_v35, 16  ;;  %v2152_v56 = vmul.f32 %v4326_v32, %v2151_v19  ;;  %v1556_v19 = vpop.f32.mrf.mxu0 }
 0x446   :  { %v2065_v28 = vrot.slane %v2064_v34, 1  ;;  %v1888_v58 = vadd.f32 %v5230_v51, %v1860_v49 }
 0x447   :  { %v2153_v11 = vadd.f32 %v4326_v32, %v2152_v56  ;;  %v1557_v56 = vadd.f32 %v1556_v19, %v1444_v12  ;;  %v2716_v12 = vpop.permute.xlu0 %2715 }
 0x448   :  { %v2066_v30 = vadd.f32 %v2065_v28, %v2064_v34  ;;  %v1867_v34 = vpop.f32.mrf.mxu3  ;;  %v1947_v8 = vsel %vm1892_vm5, %v1888_v58, -inf }
 0x449   :  { %v2157_v13 = vsel %vm2156_vm10, %v4326_v32, %v2153_v11  ;;  %vm4178_vm10 = vcmask 195712  }
 0x44a   :  { %v2162_v45 = vsel %vm2159_vm11, %v2161_v31, %v2157_v13  ;;  %4327 = vrcp.f32 %v2066_v30  ;;  %v2176_v63 = vand.u32 2147483648, %v2066_v30  ;;  %v2174_v47 = vand.u32 2147483647, %v2066_v30 }
 0x44b   :  { %v2163_v4 = vmul.f32 %v5347_v40, %v2162_v45  ;;  %v2164_v10 = vmul.f32 %v5345_v25, %v2162_v45  ;;  %v1666_v40 = vadd.f32 %v1665_v44, %v1547_v21  ;;  %vm2170_vm13 = vweird.f32 %v2066_v30  ;;  %v1671_v25 = vpop.f32.mrf.mxu1  ;;  %v1778_v41 = vpop.f32.mrf.mxu2 }
 0x44c   :  { %v2177_v38 = vor.u32 1.1754944e-38, %v2176_v63  ;;  %vm2175_vm15 = vcmp.eq.f32.partialorder %v2174_v47, 8.507059e+37  ;;  %vm4182_vm11 = vcmask 261312  }
 0x44d   :  { %3149 = vxpose.xlu0.b32.start [1/2] (short) (narrow) %v2163_v4, 16  ;;  %v1775_v15 = vadd.f32 %v1774_v6, %v1666_v40 }
 0x44f   :  { %v1864_v7 = vadd.f32 %v1863_v43, %v1775_v15 }
 0x450   :  { %v4328_v60 = vpop.eup %4327  ;;  %v1871_v13 = vpop.f32.mrf.mxu3 }
 0x451   :  { %v2166_v27 = vmul.f32 %v4328_v60, %v2066_v30  ;;  %vm2171_vm12 = vweird.f32 %v4328_v60  ;;  %v1889_v23 = vadd.f32 %v5235_v37, %v1864_v7 }
 0x452   :  { %vm2172_vm14 = vmor %vm2170_vm13, %vm2171_vm12  ;;  %vm4190_vm12 = vcmask 392512   ;;  %vm4194_vm13 = vcmask 458112  }
 0x453   :  { %v2167_v2 = vsub.f32 1.0, %v2166_v27  ;;  %v1948_v18 = vsel %vm1892_vm5, %v1889_v23, -inf  ;;  %v1677_v33 = vpop.f32.mrf.mxu1  ;;  %v1782_v11 = vpop.f32.mrf.mxu2 }
 0x454   :  { %v1949_v48 = vmax.f32 %v1947_v8, %v1948_v18  ;;  %v1678_v3 = vadd.f32 %v1677_v33, %v1557_v56  ;;  %v5401_v56 = vpop.permute.xlu0 %3181  ;;  %v5408_v8 = vand.u32 4294901760, %v2716_v12 }
 0x455   :  { %3150 = vxpose.xlu0.b32.end [2/2] (short) (narrow) %v2164_v10, 16  ;;  %v2168_v39 = vmul.f32 %v4328_v60, %v2167_v2 }
 0x456   :  { %v1783_v30 = vadd.f32 %v1782_v11, %v1678_v3  ;;  %v1950_v16 = vrot.slane %v1949_v48, 4 }
 0x457   :  { %v2169_v14 = vadd.f32 %v4328_v60, %v2168_v39 }
 0x458   :  { %v1872_v45 = vadd.f32 %v1871_v13, %v1783_v30  ;;  %v1951_v4 = vmax.f32 %v1949_v48, %v1950_v16  ;;  %v5414_v16 = vsub.f32 %v2716_v12, %v5408_v8 }
 0x459   :  { %v2173_v1 = vsel %vm2172_vm14, %v4328_v60, %v2169_v14  ;;  %vm4198_vm14 = vcmask 523712  }
 0x45a   :  { %v2178_v35 = vsel %vm2175_vm15, %v2177_v38, %v2173_v1  ;;  %v1891_v57 = vadd.f32 %v5235_v37, %v1872_v45  ;;  %v1952_v9 = vrot.slane %v1951_v4, 2  ;;  %vm4202_vm15 = vcmask 589312  }
 0x45b   :  { %v2179_v32 = vmul.f32 %v5357_v0, %v2178_v35  ;;  %v2180_v28 = vmul.f32 %v5355_v55, %v2178_v35  ;;  %v1552_v0 = vadd.f32 %v1551_v62, %v1440_v36 }
 0x45c   :  { %v1957_v5 = vsel %vm1892_vm5, %v1891_v57, -inf  ;;  %v1953_v60 = vmax.f32 %v1951_v4, %v1952_v9 }
 0x45d   :  { %3383 = vxpose.xlu1.b32.start [1/2] (short) (narrow) %v2179_v32, 16  ;;  %v1672_v31 = vadd.f32 %v1671_v25, %v1552_v0 }
 0x45e   :  { %v1954_v6 = vrot.slane %v1953_v60, 1 }
 0x45f   :  { %v1779_v20 = vadd.f32 %v1778_v41, %v1672_v31 }
 0x460   :  { %v1955_v26 = vmax.f32 %v1953_v60, %v1954_v6 }
 0x461   :  { %v1868_v54 = vadd.f32 %v1867_v34, %v1779_v20 }
 0x462   :  { %v1978_v2 = vsub.f32 %v1889_v23, %v1955_v26  ;;  %v1977_v63 = vsub.f32 %v1888_v58, %v1955_v26 }
 0x463   :  { %v1890_v55 = vadd.f32 %v5230_v51, %v1868_v54  ;;  %v2714_v51 = vpop.permute.xlu2 %2713 }
 0x464   :  { %v2007_v39 = vmul.f32 1.442695, %v1978_v2  ;;  %v2005_v62 = vmul.f32 1.442695, %v1977_v63  ;;  %v5410_v31 = vand.u32 4294901760, %v2714_v51 }
 0x465   :  { %3384 = vxpose.xlu1.b32.end [2/2] (short) (narrow) %v2180_v28, 16  ;;  %v1956_v44 = vsel %vm1892_vm5, %v1890_v55, -inf }
 0x466   :  { %v1958_v21 = vmax.f32 %v1956_v44, %v1957_v5  ;;  %4329 = vpow2.f32 %v2007_v39  ;;  %v5420_v54 = vsub.f32 %v2714_v51, %v5410_v31  ;;  %v5429_v5 = vpop.permute.xlu0 %3183 }
 0x467   :  { %4331 = vpow2.f32 %v2005_v62  ;;  %v2950_v62 = vpop.permute.xlu1 %2949 }
 0x468   :  { %v1959_v27 = vrot.slane %v1958_v21, 4 }
 0x46a   :  { %v1960_v10 = vmax.f32 %v1958_v21, %v1959_v27 }
 0x46b   :  { %v5389_v38 = vpop.permute.xlu2 %2947 }
 0x46c   :  { %v1961_v40 = vrot.slane %v1960_v10, 2  ;;  %v5385_v43 = vpop.eup %4329 }
 0x46d   :  { %v5387_v15 = vpop.eup %4331  ;;  %v2068_v50 = vsel %vm1892_vm5, %v5385_v43, 0.0 }
 0x46e   :  { %v1962_v47 = vmax.f32 %v1960_v10, %v1961_v40  ;;  %v2067_v35 = vsel %vm1892_vm5, %v5387_v15, 0.0 }
 0x46f   :  { %v2069_v7 = vadd.f32 %v2068_v50, %v2067_v35  ;;  %v5455_v50 = vand.u32 4294901760, %v2950_v62  ;;  %v5464_v35 = vand.u32 4294901760, %v5389_v38 }
 0x470   :  { %v1963_v37 = vrot.slane %v1962_v47, 1 }
 0x471   :  { %v2070_v32 = vrot.slane %v2069_v7, 4 }
 0x472   :  { %v1964_v42 = vmax.f32 %v1962_v47, %v1963_v37 }
 0x473   :  { %v5395_v49 = vpop.permute.xlu2 %3651  ;;  %v2071_v23 = vadd.f32 %v2070_v32, %v2069_v7  ;;  %v5468_v7 = vsub.f32 %v2950_v62, %v5455_v50 }
 0x474   :  { %v1980_v14 = vsub.f32 %v1891_v57, %v1964_v42  ;;  %v1979_v1 = vsub.f32 %v1890_v55, %v1964_v42  ;;  %v2776_v55 = vand.u32 4294901760, %v5414_v16 }
 0x475   :  { %v2072_v58 = vrot.slane %v2071_v23, 2 }
 0x476   :  { %v2011_v25 = vmul.f32 1.442695, %v1980_v14  ;;  %v2009_v41 = vmul.f32 1.442695, %v1979_v1 }
 0x477   :  { %v2073_v11 = vadd.f32 %v2072_v58, %v2071_v23  ;;  %v5474_v23 = vsub.f32 %v5389_v38, %v5464_v35  ;;  %v5476_v58 = vpop.permute.xlu1 %3415 }
 0x478   :  { %4333 = vpow2.f32 %v2011_v25 }
 0x479   :  { %4335 = vpow2.f32 %v2009_v41  ;;  %v2074_v20 = vrot.slane %v2073_v11, 1 }
 0x47b   :  { %v5432_v60 = vadd.f32 %v2074_v20, %v2073_v11  ;;  %v3010_v11 = vand.u32 4294901760, %v5468_v7 }
 0x47d   :  { %4337 = vrcp.f32 %v5432_v60  ;;  %vm2186_vm2 = vweird.f32 %v5432_v60 }
 0x47e   :  { %v5397_v36 = vpop.eup %4333 }
 0x47f   :  { %v5399_v19 = vpop.eup %4335  ;;  %v2077_v18 = vsel %vm1892_vm5, %v5397_v36, 0.0 }
 0x480   :  { %v2076_v0 = vsel %vm1892_vm5, %v5399_v19, 0.0 }
 0x481   :  { %v2078_v3 = vadd.f32 %v2077_v18, %v2076_v0 }
 0x483   :  { %v2079_v4 = vrot.slane %v2078_v3, 4  ;;  %v4338_v63 = vpop.eup %4337 }
 0x484   :  { %vm2187_vm1 = vweird.f32 %v4338_v63 }
 0x485   :  { %vm2188_vm3 = vmor %vm2186_vm2, %vm2187_vm1  ;;  %vm4206_vm1 = vcmask 654912   ;;  %vm4210_vm2 = vcmask 720512  }
 0x4a6   :  { %v2229_v34 = vpop.trf.xlu2 }
 0x4a7   :  { %v2252_v28 = vsel %vm1892_vm5, %v2229_v34, 0 }
 0x4a8   :  { %v2275_v33 = vand.u32 4294901760, %v2252_v28 }
 0x4aa   :  { %v2276_v48 = vsub.f32 %v2252_v28, %v2275_v33  ;;  %2319 = vmatmul.f32.vlgmr.msrb.gmra.mxu1 %v2275_v33  ;;  %v2192_v28 = vand.u32 2147483648, %v5432_v60 }
 0x4ab   :  { %2607 = vmatpush.msrb.mxu1 %v5131_v17 }
 0x4ac   :  { %v2277_v30 = vand.u32 4294901760, %v2276_v48  ;;  %2349 = vmatmul.f32.vlgmr.msrb.gmra.mxu2 %v2276_v48 }
 0x4ad   :  { %2609 = vmatpush.msrb.mxu1 %v5126_v53  ;;  %2640 = vmatpush.msrb.mxu2 %v2542_v46 }
 0x4ae   :  { %v2278_v13 = vsub.f32 %v2276_v48, %v2277_v30  ;;  %2379 = vmatmul.f32.vlgmr.msrb.gmra.mxu3 %v2277_v30  ;;  %v2230_v45 = vpop.trf.xlu2  ;;  %3883 = vrot.lane.b32.xlu2 %v5109_v52, %s4397_s1  ;;  %v2777_v52 = vsub.f32 %v5414_v16, %v2776_v55  ;;  %v3016_v48 = vand.u32 4294901760, %v5474_v23  ;;  %v2193_v30 = vor.u32 1.1754944e-38, %v2192_v28 }
 0x4af   :  { %2644 = vmatpush.msrb.mxu2 %v2548_v59  ;;  %2669 = vmatpush.msrb.mxu3 %v5131_v17  ;;  %v2255_v57 = vsel %vm1892_vm5, %v2230_v45, 0  ;;  %v2080_v59 = vadd.f32 %v2079_v4, %v2078_v3  ;;  %v2782_v17 = vand.u32 4294901760, %v5420_v54 }
 0x4b0   :  { %v2279_v9 = vand.u32 4294901760, %v2278_v13  ;;  %v2283_v46 = vand.u32 4294901760, %v2255_v57  ;;  %v2778_v10 = vand.u32 4294901760, %v2777_v52 }
 0x4b1   :  { %2671 = vmatpush.msrb.mxu3 %v5126_v53  ;;  %v2081_v6 = vrot.slane %v2080_v59, 2  ;;  %v2783_v27 = vsub.f32 %v5420_v54, %v2782_v17 }
 0x4b2   :  { %v2284_v44 = vsub.f32 %v2255_v57, %v2283_v46  ;;  %2280 = vmatmul.f32.vlgmr.msrb.gmra.mxu0 %v2279_v9  ;;  %2323 = vmatmul.f32.gmra.mxu1 %v2283_v46  ;;  %v3017_v9 = vsub.f32 %v5474_v23, %v3016_v48 }
 0x4b3   :  { %2577 = vmatpush.msrb.mxu0 %v5137_v29  ;;  %v5444_v29 = vpop.permute.xlu0 %3417  ;;  %v2082_v2 = vadd.f32 %v2081_v6, %v2080_v59  ;;  %v2784_v40 = vand.u32 4294901760, %v2783_v27 }
 0x4b4   :  { %v2285_v21 = vand.u32 4294901760, %v2284_v44  ;;  %2354 = vmatmul.f32.gmra.mxu2 %v2284_v44 }
 0x4b5   :  { %2580 = vmatpush.msrb.mxu0 %v5129_v61  ;;  %v2182_v61 = vmul.f32 %v4338_v63, %v5432_v60  ;;  %v2083_v39 = vrot.slane %v2082_v2, 1 }
 0x4b6   :  { %v2286_v53 = vsub.f32 %v2284_v44, %v2285_v21  ;;  %2385 = vmatmul.f32.gmra.mxu3 %v2285_v21 }
 0x4b7   :  { %v2183_v51 = vsub.f32 1.0, %v2182_v61  ;;  %v5450_v42 = vadd.f32 %v2083_v39, %v2082_v2 }
 0x4b8   :  { %v2287_v26 = vand.u32 4294901760, %v2286_v53 }
 0x4b9   :  { %4339 = vrcp.f32 %v5450_v42  ;;  %v2208_v2 = vand.u32 2147483648, %v5450_v42  ;;  %vm2202_vm7 = vweird.f32 %v5450_v42  ;;  %v2206_v61 = vand.u32 2147483647, %v5450_v42 }
 0x4ba   :  { %2288 = vmatmul.f32.gmra.mxu0 %v2287_v26  ;;  %2439 = vmatmul.f32.vlgmr.msra.gmra.mxu1 %v2275_v33 }
 0x4bb   :  { %2779 = vmatpush.msra.mxu1 %v2778_v10  ;;  %v2209_v62 = vor.u32 1.1754944e-38, %v2208_v2  ;;  %vm2207_vm9 = vcmp.eq.f32.partialorder %v2206_v61, 8.507059e+37 }
 0x4bd   :  { %2785 = vmatpush.msra.mxu1 %v2784_v40 }
 0x4bf   :  { %3885 = vrot.lane.b32.xlu1 %v5117_v22, %s4397_s1  ;;  %v2184_v22 = vmul.f32 %v4338_v63, %v2183_v51  ;;  %v5482_v0 = vpop.eup %4339 }
 0x4c0   :  { %v2198_v20 = vmul.f32 %v5482_v0, %v5450_v42  ;;  %vm2203_vm6 = vweird.f32 %v5482_v0 }
 0x4c1   :  { %v2463_v47 = vpop.trf.xlu0  ;;  %v2185_v12 = vadd.f32 %v4338_v63, %v2184_v22  ;;  %vm2204_vm8 = vmor %vm2202_vm7, %vm2203_vm6  ;;  %vm4222_vm6 = vcmask 917312   ;;  %vm4226_vm7 = vcmask 982912  }
 0x4c2   :  { %v2486_v37 = vsel %vm1892_vm5, %v2463_v47, 0  ;;  %2412 = vmatmul.f32.vlgmr.msra.gmra.mxu0 %v2275_v33  ;;  %2443 = vmatmul.f32.gmra.mxu1 %v2283_v46  ;;  %v2190_v33 = vand.u32 2147483647, %v5432_v60 }
 0x4c3   :  { %v5452_v14 = vand.u32 4294901760, %v2486_v37  ;;  %2740 = vmatpush.msra.mxu0 %v5408_v8  ;;  %3649 = vrot.lane.b32.xlu0 %v5091_v24, %s4397_s1 }
 0x4c4   :  { %vm2191_vm4 = vcmp.eq.f32.partialorder %v2190_v33, 8.507059e+37 }
 0x4c5   :  { %v2510_v1 = vsub.f32 %v2486_v37, %v5452_v14  ;;  %2742 = vmatpush.msra.mxu0 %v5410_v31  ;;  %2553 = vmatmul.f32.vlgmr.msra.gmra.mxu3 %v5452_v14 }
 0x4c6   :  { %2841 = vmatpush.msra.mxu3 %v5408_v8 }
 0x4c7   :  { %v2511_v25 = vand.u32 4294901760, %v2510_v1 }
 0x4c8   :  { %2843 = vmatpush.msra.mxu3 %v5410_v31 }
 0x4c9   :  { %v2512_v41 = vsub.f32 %v2510_v1, %v2511_v25  ;;  %v2464_v24 = vpop.trf.xlu0 }
 0x4ca   :  { %v2489_v32 = vsel %vm1892_vm5, %v2464_v24, 0  ;;  %2416 = vmatmul.f32.gmra.mxu0 %v2283_v46  ;;  %2613 = vmatmul.f32.vlgmr.msrb.gmra.mxu1 %v2511_v25  ;;  %v2199_v46 = vsub.f32 1.0, %v2198_v20 }
 0x4cb   :  { %v2513_v34 = vand.u32 4294901760, %v2512_v41  ;;  %v5478_v18 = vand.u32 4294901760, %v2489_v32  ;;  %2903 = vmatpush.msrb.mxu1 %v5408_v8  ;;  %v2189_v8 = vsel %vm2188_vm3, %v4338_v63, %v2185_v12  ;;  %vm4214_vm3 = vcmask 786112  }
 0x4cc   :  { %v2194_v13 = vsel %vm2191_vm4, %v2193_v30, %v2189_v8  ;;  %v2200_v52 = vmul.f32 %v5482_v0, %v2199_v46  ;;  %vm4218_vm4 = vcmask 851712  }
 0x4cd   :  { %v2518_v38 = vsub.f32 %v2489_v32, %v5478_v18  ;;  %2905 = vmatpush.msrb.mxu1 %v5410_v31  ;;  %2514 = vmatmul.f32.vlgmr.msra.gmra.mxu2 %v2513_v34  ;;  %v3011_v31 = vsub.f32 %v5468_v7, %v3010_v11  ;;  %v2195_v60 = vmul.f32 %v5387_v15, %v2194_v13  ;;  %v5513_v15 = vand.u32 4294901760, %v5429_v5 }
 0x4ce   :  { %2557 = vmatmul.f32.gmra.mxu3 %v5478_v18  ;;  %2811 = vmatpush.msra.mxu2 %v5414_v16  ;;  %v2201_v27 = vadd.f32 %v5482_v0, %v2200_v52  ;;  %v2196_v26 = vmul.f32 %v5385_v43, %v2194_v13 }
 0x4cf   :  { %v2519_v3 = vand.u32 4294901760, %v2518_v38  ;;  %v3012_v59 = vand.u32 4294901760, %v3011_v31  ;;  %v5527_v63 = vsub.f32 %v5429_v5, %v5513_v15 }
 0x4d0   :  { %2814 = vmatpush.msra.mxu2 %v5420_v54  ;;  %v5517_v54 = vand.u32 4294901760, %v5401_v56  ;;  %v2205_v47 = vsel %vm2204_vm8, %v5482_v0, %v2201_v27  ;;  %vm4230_vm8 = vcmask 1048512  }
 0x4d1   :  { %v2520_v45 = vsub.f32 %v2518_v38, %v2519_v3  ;;  %v2697_v57 = vpop.trf.xlu1  ;;  %v3244_v37 = vand.u32 4294901760, %v5527_v63 }
 0x4d2   :  { %2583 = vmatmul.f32.vlgmr.msrb.gmra.mxu0 %v2510_v1  ;;  %2619 = vmatmul.f32.gmra.mxu1 %v2519_v3  ;;  %v2720_v44 = vsel %vm1892_vm5, %v2697_v57, 0  ;;  %v5538_v43 = vsub.f32 %v5401_v56, %v5517_v54 }
 0x4d3   :  { %2874 = vmatpush.msrb.mxu0 %v2776_v55  ;;  %v2521_v4 = vand.u32 4294901760, %v2520_v45  ;;  %v5507_v21 = vand.u32 4294901760, %v2720_v44  ;;  %v3018_v55 = vand.u32 4294901760, %v3017_v9  ;;  %v3245_v22 = vsub.f32 %v5527_v63, %v3244_v37 }
 0x4d4   :  { %3617 = vxpose.xlu2.b32.start [1/2] (short) (narrow) %v2195_v60, 16  ;;  %v3250_v56 = vand.u32 4294901760, %v5538_v43 }
 0x4d5   :  { %2878 = vmatpush.msrb.mxu0 %v2782_v17  ;;  %2522 = vmatmul.f32.gmra.mxu2 %v2521_v4  ;;  %v2744_v16 = vsub.f32 %v2720_v44, %v5507_v21  ;;  %v3246_v12 = vand.u32 4294901760, %v3245_v22 }
 0x4d6   :  { %2673 = vmatmul.f32.vlgmr.msrb.gmra.mxu3 %v5452_v14  ;;  %v2931_v42 = vpop.trf.xlu2  ;;  %v3251_v32 = vsub.f32 %v5538_v43, %v3250_v56 }
 0x4d7   :  { %3013 = vmatpush.msrb.mxu3 %v3012_v59  ;;  %v2745_v53 = vand.u32 4294901760, %v2744_v16  ;;  %v2954_v24 = vsel %vm1892_vm5, %v2931_v42, 0 }
 0x4d8   :  { %v5560_v34 = vand.u32 4294901760, %v2954_v24 }
 0x4d9   :  { %3019 = vmatpush.msrb.mxu3 %v3018_v55  ;;  %v2746_v17 = vsub.f32 %v2744_v16, %v2745_v53  ;;  %v2698_v6 = vpop.trf.xlu1  ;;  %v5614_v55 = vand.u32 4294901760, %v5395_v49 }
 0x4da   :  { %2588 = vmatmul.f32.gmra.mxu0 %v2518_v38  ;;  %2787 = vmatmul.f32.vlgmr.msra.gmra.mxu1 %v5507_v21  ;;  %v2723_v10 = vsel %vm1892_vm5, %v2698_v6, 0  ;;  %v5582_v38 = vand.u32 4294901760, %v5476_v58 }
 0x4db   :  { %3075 = vmatpush.msra.mxu1 %v5455_v50  ;;  %v5531_v40 = vand.u32 4294901760, %v2723_v10  ;;  %v2747_v39 = vand.u32 4294901760, %v2746_v17 }
 0x4dc   :  { %3618 = vxpose.xlu2.b32.end [2/2] (short) (narrow) %v2196_v26, 16  ;;  %v5593_v30 = vsub.f32 %v5476_v58, %v5582_v38 }
 0x4dd   :  { %3077 = vmatpush.msra.mxu1 %v5464_v35  ;;  %2646 = vmatmul.f32.vlgmr.msrb.gmra.mxu2 %v5452_v14  ;;  %v2752_v5 = vsub.f32 %v2723_v10, %v5531_v40  ;;  %v2210_v14 = vsel %vm2207_vm9, %v2209_v62, %v2205_v47 }
 0x4de   :  { %2677 = vmatmul.f32.gmra.mxu3 %v5478_v18  ;;  %2974 = vmatpush.msrb.mxu2 %v5455_v50  ;;  %v2211_v25 = vmul.f32 %v5399_v19, %v2210_v14  ;;  %v3252_v19 = vand.u32 4294901760, %v3251_v32  ;;  %v2212_v28 = vmul.f32 %v5397_v36, %v2210_v14  ;;  %v5576_v36 = vand.u32 4294901760, %v5444_v29 }
 0x4df   :  { %v2753_v51 = vand.u32 4294901760, %v2752_v5  ;;  %v3484_v45 = vand.u32 4294901760, %v5593_v30 }
 0x4e0   :  { %2976 = vmatpush.msrb.mxu2 %v5464_v35  ;;  %v5587_v8 = vsub.f32 %v5444_v29, %v5576_v36 }
 0x4e1   :  { %v2754_v1 = vsub.f32 %v2752_v5, %v2753_v51  ;;  %v3485_v46 = vsub.f32 %v5593_v30, %v3484_v45 }
 0x4e2   :  { %2748 = vmatmul.f32.vlgmr.msra.gmra.mxu0 %v2747_v39  ;;  %2791 = vmatmul.f32.gmra.mxu1 %v5531_v40  ;;  %v3478_v31 = vand.u32 4294901760, %v5587_v8 }
 0x4e3   :  { %3045 = vmatpush.msra.mxu0 %v5468_v7  ;;  %v2755_v41 = vand.u32 4294901760, %v2754_v1 }
 0x4e4   :  { %v3479_v4 = vsub.f32 %v5587_v8, %v3478_v31 }
 0x4e5   :  { %3048 = vmatpush.msra.mxu0 %v5474_v23  ;;  %2650 = vmatmul.f32.gmra.mxu2 %v5478_v18  ;;  %v2932_v18 = vpop.trf.xlu2 }
 0x4e6   :  { %2847 = vmatmul.f32.vlgmr.msra.gmra.mxu3 %v2745_v53  ;;  %3851 = vxpose.xlu0.b32.start [1/2] (short) (narrow) %v2211_v25, 16  ;;  %v3480_v44 = vand.u32 4294901760, %v3479_v4  ;;  %v5619_v53 = vsub.f32 %v5395_v49, %v5614_v55 }
 0x4e7   :  { %3137 = vmatpush.msra.mxu3 %v5455_v50  ;;  %v2978_v50 = vsub.f32 %v2954_v24, %v5560_v34 }
 0x4e8   :  { %v3712_v6 = vand.u32 4294901760, %v5619_v53 }
 0x4e9   :  { %3139 = vmatpush.msra.mxu3 %v5464_v35  ;;  %v2957_v35 = vsel %vm1892_vm5, %v2932_v18, 0  ;;  %v2979_v0 = vand.u32 4294901760, %v2978_v50 }
 0x4ea   :  { %2756 = vmatmul.f32.gmra.mxu0 %v2755_v41  ;;  %2907 = vmatmul.f32.vlgmr.msrb.gmra.mxu1 %v5507_v21  ;;  %v5570_v33 = vand.u32 4294901760, %v2957_v35  ;;  %v3713_v49 = vsub.f32 %v5619_v53, %v3712_v6 }
 0x4eb   :  { %3247 = vmatpush.msrb.mxu1 %v3246_v12  ;;  %v2980_v7 = vsub.f32 %v2978_v50, %v2979_v0 }
 0x4ed   :  { %3253 = vmatpush.msrb.mxu1 %v3252_v19  ;;  %2817 = vmatmul.f32.vlgmr.msra.gmra.mxu2 %v2744_v16  ;;  %v3486_v16 = vand.u32 4294901760, %v3485_v46 }
 0x4ee   :  { %2853 = vmatmul.f32.gmra.mxu3 %v2753_v51  ;;  %3108 = vmatpush.msra.mxu2 %v3010_v11  ;;  %v2986_v11 = vsub.f32 %v2957_v35, %v5570_v33 }
 0x4ef   :  { %3852 = vxpose.xlu0.b32.end [2/2] (short) (narrow) %v2212_v28, 16 }
 0x4f0   :  { %3112 = vmatpush.msra.mxu2 %v3016_v48  ;;  %v2981_v48 = vand.u32 4294901760, %v2980_v7  ;;  %v2987_v3 = vand.u32 4294901760, %v2986_v11 }
 0x4f1   :  { %v3165_v23 = vpop.trf.xlu0 }
 0x4f2   :  { %2880 = vmatmul.f32.vlgmr.msrb.gmra.mxu0 %v5507_v21  ;;  %2911 = vmatmul.f32.gmra.mxu1 %v5531_v40  ;;  %v3188_v20 = vsel %vm1892_vm5, %v3165_v23, 0  ;;  %v2988_v29 = vsub.f32 %v2986_v11, %v2987_v3 }
 0x4f3   :  { %3208 = vmatpush.msrb.mxu0 %v5513_v15  ;;  %v3211_v13 = vand.u32 4294901760, %v3188_v20 }
 0x4f4   :  { %v2989_v57 = vand.u32 4294901760, %v2988_v29 }
 0x4f5   :  { %3210 = vmatpush.msrb.mxu0 %v5517_v54  ;;  %2822 = vmatmul.f32.gmra.mxu2 %v2752_v5  ;;  %v3212_v9 = vsub.f32 %v3188_v20, %v3211_v13 }
 0x4f6   :  { %3021 = vmatmul.f32.vlgmr.msrb.gmra.mxu3 %v5560_v34 }
 0x4f7   :  { %3309 = vmatpush.msrb.mxu3 %v5513_v15  ;;  %v3213_v59 = vand.u32 4294901760, %v3212_v9 }
 0x4f9   :  { %3311 = vmatpush.msrb.mxu3 %v5517_v54  ;;  %v3166_v58 = vpop.trf.xlu0  ;;  %v3214_v52 = vsub.f32 %v3212_v9, %v3213_v59 }
 0x4fa   :  { %2884 = vmatmul.f32.gmra.mxu0 %v5531_v40  ;;  %3081 = vmatmul.f32.vlgmr.msra.gmra.mxu1 %v2979_v0  ;;  %v3191_v60 = vsel %vm1892_vm5, %v3166_v58, 0 }
 0x4fb   :  { %3371 = vmatpush.msra.mxu1 %v5513_v15  ;;  %v3219_v21 = vand.u32 4294901760, %v3191_v60 }
 0x4fd   :  { %3373 = vmatpush.msra.mxu1 %v5517_v54  ;;  %2982 = vmatmul.f32.vlgmr.msrb.gmra.mxu2 %v2981_v48  ;;  %v3220_v15 = vsub.f32 %v3191_v60, %v3219_v21  ;;  %v3215_v54 = vand.u32 4294901760, %v3214_v52 }
 0x4fe   :  { %3025 = vmatmul.f32.gmra.mxu3 %v5570_v33  ;;  %3279 = vmatpush.msrb.mxu2 %v5527_v63  ;;  %v3714_v63 = vand.u32 4294901760, %v3713_v49 }
 0x4ff   :  { %v3221_v17 = vand.u32 4294901760, %v3220_v15 }
 0x500   :  { %3282 = vmatpush.msrb.mxu2 %v5538_v43 }
 0x501   :  { %v3399_v27 = vpop.trf.xlu1  ;;  %v3222_v26 = vsub.f32 %v3220_v15, %v3221_v17 }
 0x502   :  { %3051 = vmatmul.f32.vlgmr.msra.gmra.mxu0 %v2978_v50  ;;  %3087 = vmatmul.f32.gmra.mxu1 %v2987_v3  ;;  %v3422_v2 = vsel %vm1892_vm5, %v3399_v27, 0 }
 0x503   :  { %3342 = vmatpush.msra.mxu0 %v3244_v37  ;;  %v3223_v10 = vand.u32 4294901760, %v3222_v26  ;;  %v3445_v40 = vand.u32 4294901760, %v3422_v2 }
 0x505   :  { %3346 = vmatpush.msra.mxu0 %v3250_v56  ;;  %2990 = vmatmul.f32.gmra.mxu2 %v2989_v57  ;;  %v3446_v39 = vsub.f32 %v3422_v2, %v3445_v40 }
 0x506   :  { %3141 = vmatmul.f32.vlgmr.msra.gmra.mxu3 %v5560_v34 }
 0x507   :  { %3481 = vmatpush.msra.mxu3 %v3480_v44  ;;  %v3447_v5 = vand.u32 4294901760, %v3446_v39 }
 0x508   :  { %v3884_v56 = vpop.permute.xlu2 %3883 }
 0x509   :  { %3487 = vmatpush.msra.mxu3 %v3486_v16  ;;  %v3400_v61 = vpop.trf.xlu1  ;;  %v3448_v62 = vsub.f32 %v3446_v39, %v3447_v5  ;;  %v5644_v22 = vand.u32 4294901760, %v3884_v56 }
 0x50a   :  { %3056 = vmatmul.f32.gmra.mxu0 %v2986_v11  ;;  %3255 = vmatmul.f32.vlgmr.msrb.gmra.mxu1 %v3211_v13  ;;  %v3425_v43 = vsel %vm1892_vm5, %v3400_v61, 0 }
 0x50b   :  { %3543 = vmatpush.msrb.mxu1 %v5576_v36  ;;  %v5639_v47 = vand.u32 4294901760, %v3425_v43  ;;  %v3449_v42 = vand.u32 4294901760, %v3448_v62  ;;  %v5649_v32 = vsub.f32 %v3884_v56, %v5644_v22 }
 0x50d   :  { %3545 = vmatpush.msrb.mxu1 %v5582_v38  ;;  %3114 = vmatmul.f32.vlgmr.msra.gmra.mxu2 %v5560_v34  ;;  %v3454_v37 = vsub.f32 %v3425_v43, %v5639_v47  ;;  %v3952_v18 = vand.u32 4294901760, %v5649_v32 }
 0x50e   :  { %3145 = vmatmul.f32.gmra.mxu3 %v5570_v33  ;;  %3442 = vmatpush.msra.mxu2 %v5576_v36 }
 0x50f   :  { %v3455_v14 = vand.u32 4294901760, %v3454_v37 }
 0x510   :  { %3444 = vmatpush.msra.mxu2 %v5582_v38 }
 0x511   :  { %v3456_v1 = vsub.f32 %v3454_v37, %v3455_v14 }
 0x512   :  { %3216 = vmatmul.f32.vlgmr.msrb.gmra.mxu0 %v3215_v54  ;;  %3259 = vmatmul.f32.gmra.mxu1 %v3219_v21 }
 0x513   :  { %3513 = vmatpush.msrb.mxu0 %v5587_v8  ;;  %v3457_v24 = vand.u32 4294901760, %v3456_v1  ;;  %v3953_v8 = vsub.f32 %v5649_v32, %v3952_v18 }
 0x515   :  { %3516 = vmatpush.msrb.mxu0 %v5593_v30  ;;  %3118 = vmatmul.f32.gmra.mxu2 %v5570_v33  ;;  %v3954_v20 = vand.u32 4294901760, %v3953_v8 }
 0x516   :  { %3315 = vmatmul.f32.vlgmr.msrb.gmra.mxu3 %v3213_v59 }
 0x517   :  { %3605 = vmatpush.msrb.mxu3 %v5576_v36 }
 0x519   :  { %3607 = vmatpush.msrb.mxu3 %v5582_v38 }
 0x51a   :  { %3224 = vmatmul.f32.gmra.mxu0 %v3223_v10  ;;  %3375 = vmatmul.f32.vlgmr.msra.gmra.mxu1 %v3211_v13 }
 0x51b   :  { %3715 = vmatpush.msra.mxu1 %v3714_v63 }
 0x51d   :  { %3285 = vmatmul.f32.vlgmr.msrb.gmra.mxu2 %v3212_v9 }
 0x51e   :  { %3321 = vmatmul.f32.gmra.mxu3 %v3221_v17  ;;  %3576 = vmatpush.msrb.mxu2 %v3478_v31 }
 0x520   :  { %3580 = vmatpush.msrb.mxu2 %v3484_v45 }
 0x522   :  { %3348 = vmatmul.f32.vlgmr.msra.gmra.mxu0 %v3211_v13  ;;  %3379 = vmatmul.f32.gmra.mxu1 %v3219_v21 }
 0x523   :  { %3676 = vmatpush.msra.mxu0 %v5614_v55 }
 0x525   :  { %3290 = vmatmul.f32.gmra.mxu2 %v3220_v15 }
 0x526   :  { %3489 = vmatmul.f32.vlgmr.msra.gmra.mxu3 %v3445_v40 }
 0x527   :  { %3777 = vmatpush.msra.mxu3 %v5614_v55  ;;  %v2320_v51 = vpop.f32.mrf.mxu1 }
 0x52a   :  { %3352 = vmatmul.f32.gmra.mxu0 %v3219_v21  ;;  %3549 = vmatmul.f32.vlgmr.msrb.gmra.mxu1 %v3447_v5 }
 0x52d   :  { %3450 = vmatmul.f32.vlgmr.msra.gmra.mxu2 %v3449_v42 }
 0x52e   :  { %3747 = vmatpush.msra.mxu2 %v5619_v53  ;;  %3493 = vmatmul.f32.gmra.mxu3 %v5639_v47  ;;  %v5674_v53 = vld [vmem:[%s5750_s4] ss:$0 sm:$0xff]  ;;  %s4398_s4 = smov [#allocation5]  }
 0x52f   :  { %v2281_v25 = vpop.f32.mrf.mxu0  ;;  %v2324_v41 = vpop.f32.mrf.mxu1  ;;  %s4239_s26 = sshll.u32 %s4398_s4, 4  ;;  %s4240_s26 = int_to_ptr.vmem [resolvable:$true] %s4239_s26 }
 0x530   :  { %v2350_v36 = vpop.f32.mrf.mxu2  ;;  %v2321_v11 = vadd.f32 %v2320_v51, %v2281_v25 }
 0x531   :  { %v3886_v12 = vpop.permute.xlu1 %3885  ;;  %v2380_v19 = vpop.f32.mrf.mxu3 }
 0x532   :  { %3519 = vmatmul.f32.vlgmr.msrb.gmra.mxu0 %v3446_v39  ;;  %3555 = vmatmul.f32.gmra.mxu1 %v3455_v14  ;;  %v5651_v34 = vand.u32 4294901760, %v3886_v12  ;;  %v2351_v30 = vadd.f32 %v2350_v36, %v2321_v11 }
 0x534   :  { %v5655_v28 = vsub.f32 %v3886_v12, %v5651_v34  ;;  %v2381_v57 = vadd.f32 %v2380_v19, %v2351_v30 }
 0x535   :  { %3458 = vmatmul.f32.gmra.mxu2 %v3457_v24  ;;  %v3650_v50 = vpop.permute.xlu0 %3649 }
 0x536   :  { %3609 = vmatmul.f32.vlgmr.msrb.gmra.mxu3 %v3445_v40  ;;  %v3946_v0 = vand.u32 4294901760, %v5655_v28  ;;  %v3677_v33 = vand.u32 4294901760, %v3650_v50 }
 0x537   :  { %v2289_v35 = vpop.f32.mrf.mxu0  ;;  %v2440_v7 = vpop.f32.mrf.mxu1 }
 0x538   :  { %v3947_v23 = vsub.f32 %v5655_v28, %v3946_v0  ;;  %v3717_v38 = vsub.f32 %v3650_v50, %v3677_v33  ;;  %3678 = vmatpush.msra.mxu0 %v3677_v33  ;;  %3779 = vmatpush.msra.mxu3 %v3677_v33  ;;  %v2325_v29 = vadd.f32 %v2324_v41, %v2289_v35  ;;  %v2355_v9 = vpop.f32.mrf.mxu2 }
 0x539   :  { %v2386_v45 = vpop.f32.mrf.mxu3 }
 0x53a   :  { %3810 = vmatpush.msrb.mxu0 %v3712_v6  ;;  %v3948_v48 = vand.u32 4294901760, %v3947_v23  ;;  %3750 = vmatpush.msra.mxu2 %v3717_v38  ;;  %v3718_v3 = vand.u32 4294901760, %v3717_v38  ;;  %v2356_v46 = vadd.f32 %v2355_v9, %v2325_v29 }
 0x53b   :  { %3524 = vmatmul.f32.gmra.mxu0 %v3454_v37 }
 0x53c   :  { %3814 = vmatpush.msrb.mxu0 %v3718_v3  ;;  %3949 = vmatpush.msrb.mxu3 %v3948_v48  ;;  %v3719_v31 = vsub.f32 %v3717_v38, %v3718_v3  ;;  %v2387_v44 = vadd.f32 %v2386_v45, %v2356_v46 }
 0x53d   :  { %3582 = vmatmul.f32.vlgmr.msrb.gmra.mxu2 %v3445_v40 }
 0x53e   :  { %3910 = vmatpush.msrb.mxu2 %v5651_v34  ;;  %3613 = vmatmul.f32.gmra.mxu3 %v5639_v47  ;;  %v3720_v58 = vand.u32 4294901760, %v3719_v31 }
 0x53f   :  { %v2413_v13 = vpop.f32.mrf.mxu0  ;;  %3955 = vmatpush.msrb.mxu3 %v3954_v20  ;;  %v2444_v4 = vpop.f32.mrf.mxu1 }
 0x540   :  { %3912 = vmatpush.msrb.mxu2 %v5644_v22  ;;  %3721 = vmatpush.msra.mxu1 %v3720_v58  ;;  %v2414_v60 = vadd.f32 %v2413_v13, %v2381_v57 }
 0x542   :  { %3839 = vmatpush.msrb.mxu1 %v5614_v55  ;;  %v2441_v16 = vadd.f32 %v2440_v7, %v2414_v60 }
 0x544   :  { %3841 = vmatpush.msrb.mxu1 %v3677_v33  ;;  %v4089_v54 = vmul.f32 %v5674_v53, %v2441_v16 }
 0x545   :  { %3586 = vmatmul.f32.gmra.mxu2 %v5639_v47 }
 0x546   :  { %v4105_v6 = vsel %vm1123_vm0, %v4089_v54, 0.0 }
 0x547   :  { %v2417_v59 = vpop.f32.mrf.mxu0  ;;  %v2614_v21 = vpop.f32.mrf.mxu1  ;;  %4106 = vadd.xlane.f32.xlu1 %v4105_v6 }
 0x548   :  { %v2554_v52 = vpop.f32.mrf.mxu3  ;;  %v2418_v15 = vadd.f32 %v2417_v59, %v2387_v44 }
 0x54a   :  { %v2445_v17 = vadd.f32 %v2444_v4, %v2418_v15 }
 0x54c   :  { %v4090_v10 = vmul.f32 %v5674_v53, %v2445_v17 }
 0x54e   :  { %v4108_v63 = vsel %vm1123_vm0, %v4090_v10, 0.0 }
 0x54f   :  { %v2584_v55 = vpop.f32.mrf.mxu0  ;;  %v2620_v26 = vpop.f32.mrf.mxu1  ;;  %4109 = vadd.xlane.f32.xlu2 %v4108_v63 }
 0x550   :  { %v2515_v27 = vpop.f32.mrf.mxu2 }
 0x551   :  { %v2558_v49 = vpop.f32.mrf.mxu3  ;;  %v2555_v2 = vadd.f32 %v2554_v52, %v2515_v27 }
 0x553   :  { %v2585_v43 = vadd.f32 %v2584_v55, %v2555_v2 }
 0x555   :  { %v2615_v47 = vadd.f32 %v2614_v21, %v2585_v43 }
 0x557   :  { %v2589_v40 = vpop.f32.mrf.mxu0  ;;  %v2788_v39 = vpop.f32.mrf.mxu1 }
 0x558   :  { %v2523_v61 = vpop.f32.mrf.mxu2 }
 0x559   :  { %v2674_v5 = vpop.f32.mrf.mxu3  ;;  %v2559_v62 = vadd.f32 %v2558_v49, %v2523_v61 }
 0x55b   :  { %v2590_v14 = vadd.f32 %v2589_v40, %v2559_v62 }
 0x55d   :  { %v2621_v41 = vadd.f32 %v2620_v26, %v2590_v14 }
 0x55f   :  { %v2749_v37 = vpop.f32.mrf.mxu0  ;;  %v2792_v42 = vpop.f32.mrf.mxu1 }
 0x560   :  { %v2647_v51 = vpop.f32.mrf.mxu2  ;;  %v2789_v11 = vadd.f32 %v2788_v39, %v2749_v37 }
 0x561   :  { %v2648_v56 = vadd.f32 %v2647_v51, %v2615_v47  ;;  %v2678_v1 = vpop.f32.mrf.mxu3 }
 0x563   :  { %v2675_v25 = vadd.f32 %v2674_v5, %v2648_v56 }
 0x565   :  { %v4091_v24 = vmul.f32 %v5674_v53, %v2675_v25 }
 0x567   :  { %v2757_v12 = vpop.f32.mrf.mxu0  ;;  %v4111_v19 = vsel %vm1123_vm0, %v4091_v24, 0.0  ;;  %v2908_v35 = vpop.f32.mrf.mxu1 }
 0x568   :  { %v2651_v50 = vpop.f32.mrf.mxu2  ;;  %4112 = vadd.xlane.f32.xlu0 %v4111_v19  ;;  %v2793_v57 = vadd.f32 %v2792_v42, %v2757_v12 }
 0x569   :  { %v2652_v33 = vadd.f32 %v2651_v50, %v2621_v41  ;;  %v2848_v36 = vpop.f32.mrf.mxu3 }
 0x56b   :  { %v2679_v7 = vadd.f32 %v2678_v1, %v2652_v33 }
 0x56d   :  { %v4092_v23 = vmul.f32 %v5674_v53, %v2679_v7  ;;  %v3633_v38 = vpop.trf.xlu2 }
 0x56e   :  { %v3656_v3 = vsel %vm1892_vm5, %v3633_v38, 0 }
 0x56f   :  { %v2881_v8 = vpop.f32.mrf.mxu0  ;;  %v4114_v48 = vsel %vm1123_vm0, %v4092_v23, 0.0  ;;  %v2912_v20 = vpop.f32.mrf.mxu1  ;;  %v3679_v31 = vand.u32 4294901760, %v3656_v3 }
 0x570   :  { %v2818_v30 = vpop.f32.mrf.mxu2  ;;  %4115 = vadd.xlane.f32.xlu1 %v4114_v48 }
 0x571   :  { %v2819_v29 = vadd.f32 %v2818_v30, %v2789_v11  ;;  %v2854_v13 = vpop.f32.mrf.mxu3  ;;  %v3680_v45 = vsub.f32 %v3656_v3, %v3679_v31  ;;  %3723 = vmatmul.f32.vlgmr.msra.gmra.mxu1 %v3679_v31 }
 0x572   :  { %4011 = vmatpush.msra.mxu1 %v5651_v34 }
 0x573   :  { %v2849_v58 = vadd.f32 %v2848_v36, %v2819_v29  ;;  %v3681_v4 = vand.u32 4294901760, %v3680_v45  ;;  %3753 = vmatmul.f32.vlgmr.msra.gmra.mxu2 %v3680_v45 }
 0x574   :  { %4013 = vmatpush.msra.mxu1 %v5644_v22  ;;  %4044 = vmatpush.msra.mxu2 %v3946_v0 }
 0x575   :  { %v2882_v9 = vadd.f32 %v2881_v8, %v2849_v58  ;;  %v3682_v46 = vsub.f32 %v3680_v45, %v3681_v4  ;;  %3783 = vmatmul.f32.vlgmr.msra.gmra.mxu3 %v3681_v4  ;;  %v3634_v60 = vpop.trf.xlu2 }
 0x576   :  { %4048 = vmatpush.msra.mxu2 %v3952_v18  ;;  %4073 = vmatpush.msra.mxu3 %v5651_v34  ;;  %v3659_v21 = vsel %vm1892_vm5, %v3634_v60, 0 }
 0x577   :  { %v2909_v44 = vadd.f32 %v2908_v35, %v2882_v9  ;;  %v2885_v59 = vpop.f32.mrf.mxu0  ;;  %v3683_v52 = vand.u32 4294901760, %v3682_v46  ;;  %v3687_v15 = vand.u32 4294901760, %v3659_v21  ;;  %v3082_v0 = vpop.f32.mrf.mxu1 }
 0x578   :  { %v2823_v16 = vpop.f32.mrf.mxu2  ;;  %4075 = vmatpush.msra.mxu3 %v5644_v22 }
 0x579   :  { %v2824_v54 = vadd.f32 %v2823_v16, %v2793_v57  ;;  %v4093_v17 = vmul.f32 %v5674_v53, %v2909_v44  ;;  %v3022_v55 = vpop.f32.mrf.mxu3  ;;  %v3688_v6 = vsub.f32 %v3659_v21, %v3687_v15  ;;  %3684 = vmatmul.f32.vlgmr.msra.gmra.mxu0 %v3683_v52  ;;  %3727 = vmatmul.f32.gmra.mxu1 %v3687_v15 }
 0x57a   :  { %3981 = vmatpush.msra.mxu0 %v5655_v28 }
 0x57b   :  { %v2855_v27 = vadd.f32 %v2854_v13, %v2824_v54  ;;  %v4117_v18 = vsel %vm1123_vm0, %v4093_v17, 0.0  ;;  %v3689_v34 = vand.u32 4294901760, %v3688_v6  ;;  %3758 = vmatmul.f32.gmra.mxu2 %v3688_v6 }
 0x57c   :  { %4118 = vadd.xlane.f32.xlu1 %v4117_v18  ;;  %3984 = vmatpush.msra.mxu0 %v5649_v32 }
 0x57d   :  { %v2886_v26 = vadd.f32 %v2885_v59, %v2855_v27  ;;  %v3690_v10 = vsub.f32 %v3688_v6, %v3689_v34  ;;  %3789 = vmatmul.f32.gmra.mxu3 %v3689_v34 }
 0x57f   :  { %v2913_v49 = vadd.f32 %v2912_v20, %v2886_v26  ;;  %v3052_v2 = vpop.f32.mrf.mxu0  ;;  %v3691_v63 = vand.u32 4294901760, %v3690_v10  ;;  %v3088_v28 = vpop.f32.mrf.mxu1 }
 0x580   :  { %v2983_v22 = vpop.f32.mrf.mxu2 }
 0x581   :  { %v4094_v40 = vmul.f32 %v5674_v53, %v2913_v49  ;;  %v3026_v61 = vpop.f32.mrf.mxu3  ;;  %3692 = vmatmul.f32.gmra.mxu0 %v3691_v63  ;;  %3843 = vmatmul.f32.vlgmr.msrb.gmra.mxu1 %v3679_v31  ;;  %v3023_v43 = vadd.f32 %v3022_v55, %v2983_v22 }
 0x583   :  { %v4120_v39 = vsel %vm1123_vm0, %v4094_v40, 0.0  ;;  %v3053_v62 = vadd.f32 %v3052_v2, %v3023_v43 }
 0x584   :  { %4121 = vadd.xlane.f32.xlu1 %v4120_v39 }
 0x585   :  { %v3083_v42 = vadd.f32 %v3082_v0, %v3053_v62 }
 0x587   :  { %v3057_v5 = vpop.f32.mrf.mxu0  ;;  %v3256_v1 = vpop.f32.mrf.mxu1 }
 0x588   :  { %v2991_v47 = vpop.f32.mrf.mxu2 }
 0x589   :  { %v3142_v32 = vpop.f32.mrf.mxu3  ;;  %3816 = vmatmul.f32.vlgmr.msrb.gmra.mxu0 %v3679_v31  ;;  %3847 = vmatmul.f32.gmra.mxu1 %v3687_v15  ;;  %v3027_v56 = vadd.f32 %v3026_v61, %v2991_v47 }
 0x58b   :  { %v3867_v37 = vpop.trf.xlu0  ;;  %v3058_v19 = vadd.f32 %v3057_v5, %v3027_v56 }
 0x58c   :  { %v3890_v51 = vsel %vm1892_vm5, %v3867_v37, 0 }
 0x58d   :  { %v3913_v14 = vand.u32 4294901760, %v3890_v51  ;;  %v3089_v38 = vadd.f32 %v3088_v28, %v3058_v19 }
 0x58f   :  { %v3914_v25 = vsub.f32 %v3890_v51, %v3913_v14  ;;  %3957 = vmatmul.f32.vlgmr.msrb.gmra.mxu3 %v3913_v14  ;;  %v3217_v41 = vpop.f32.mrf.mxu0  ;;  %v3260_v29 = vpop.f32.mrf.mxu1 }
 0x590   :  { %v3115_v24 = vpop.f32.mrf.mxu2  ;;  %v3257_v9 = vadd.f32 %v3256_v1, %v3217_v41 }
 0x591   :  { %v3915_v12 = vand.u32 4294901760, %v3914_v25  ;;  %v3116_v50 = vadd.f32 %v3115_v24, %v3083_v42  ;;  %v3146_v35 = vpop.f32.mrf.mxu3  ;;  %3820 = vmatmul.f32.gmra.mxu0 %v3687_v15 }
 0x593   :  { %v3916_v33 = vsub.f32 %v3914_v25, %v3915_v12  ;;  %4017 = vmatmul.f32.vlgmr.msra.gmra.mxu1 %v3915_v12  ;;  %v3868_v36 = vpop.trf.xlu0  ;;  %v3143_v7 = vadd.f32 %v3142_v32, %v3116_v50 }
 0x594   :  { %v3893_v11 = vsel %vm1892_vm5, %v3868_v36, 0  ;;  %vm4174_vm5 = vcmask 130112  }
 0x595   :  { %v3917_v23 = vand.u32 4294901760, %v3916_v33  ;;  %v3921_v8 = vand.u32 4294901760, %v3893_v11  ;;  %v4095_v48 = vmul.f32 %v5674_v53, %v3143_v7 }
 0x597   :  { %v3922_v3 = vsub.f32 %v3893_v11, %v3921_v8  ;;  %3918 = vmatmul.f32.vlgmr.msrb.gmra.mxu2 %v3917_v23  ;;  %3961 = vmatmul.f32.gmra.mxu3 %v3921_v8  ;;  %v4123_v30 = vsel %vm1123_vm0, %v4095_v48, 0.0  ;;  %v3225_v20 = vpop.f32.mrf.mxu0  ;;  %v3376_v15 = vpop.f32.mrf.mxu1 }
 0x598   :  { %v3119_v31 = vpop.f32.mrf.mxu2  ;;  %4124 = vadd.xlane.f32.xlu1 %v4123_v30  ;;  %v3261_v17 = vadd.f32 %v3260_v29, %v3225_v20 }
 0x599   :  { %v3120_v13 = vadd.f32 %v3119_v31, %v3089_v38  ;;  %v3923_v45 = vand.u32 4294901760, %v3922_v3  ;;  %v3316_v58 = vpop.f32.mrf.mxu3  ;;  %3987 = vmatmul.f32.vlgmr.msra.gmra.mxu0 %v3914_v25  ;;  %v4169_v38 = vlaneseq }
 0x59b   :  { %4023 = vmatmul.f32.gmra.mxu1 %v3923_v45  ;;  %v3147_v4 = vadd.f32 %v3146_v35, %v3120_v13  ;;  %v3924_v57 = vsub.f32 %v3922_v3, %v3923_v45 }
 0x59d   :  { %v3925_v46 = vand.u32 4294901760, %v3924_v57  ;;  %v4096_v60 = vmul.f32 %v5674_v53, %v3147_v4 }
 0x59f   :  { %3926 = vmatmul.f32.gmra.mxu2 %v3925_v46  ;;  %4077 = vmatmul.f32.vlgmr.msra.gmra.mxu3 %v3913_v14  ;;  %v4126_v44 = vsel %vm1123_vm0, %v4096_v60, 0.0  ;;  %v3349_v21 = vpop.f32.mrf.mxu0  ;;  %v3380_v2 = vpop.f32.mrf.mxu1 }
 0x5a0   :  { %v3286_v59 = vpop.f32.mrf.mxu2  ;;  %4127 = vadd.xlane.f32.xlu1 %v4126_v44 }
 0x5a1   :  { %v3287_v16 = vadd.f32 %v3286_v59, %v3257_v9  ;;  %v3322_v52 = vpop.f32.mrf.mxu3  ;;  %3992 = vmatmul.f32.gmra.mxu0 %v3922_v3 }
 0x5a3   :  { %v3317_v54 = vadd.f32 %v3316_v58, %v3287_v16 }
 0x5a5   :  { %v3350_v55 = vadd.f32 %v3349_v21, %v3317_v54 }
 0x5a7   :  { %4050 = vmatmul.f32.vlgmr.msra.gmra.mxu2 %v3913_v14  ;;  %4081 = vmatmul.f32.gmra.mxu3 %v3921_v8  ;;  %v3377_v0 = vadd.f32 %v3376_v15, %v3350_v55  ;;  %v3353_v34 = vpop.f32.mrf.mxu0  ;;  %v3550_v62 = vpop.f32.mrf.mxu1 }
 0x5a8   :  { %v3291_v6 = vpop.f32.mrf.mxu2 }
 0x5a9   :  { %v3292_v27 = vadd.f32 %v3291_v6, %v3261_v17  ;;  %v4097_v18 = vmul.f32 %v5674_v53, %v3377_v0  ;;  %v3490_v26 = vpop.f32.mrf.mxu3 }
 0x5ab   :  { %v3323_v49 = vadd.f32 %v3322_v52, %v3292_v27  ;;  %v4129_v10 = vsel %vm1123_vm0, %v4097_v18, 0.0 }
 0x5ac   :  { %4130 = vadd.xlane.f32.xlu1 %v4129_v10 }
 0x5ad   :  { %v3354_v22 = vadd.f32 %v3353_v34, %v3323_v49 }
 0x5af   :  { %4054 = vmatmul.f32.gmra.mxu2 %v3921_v8  ;;  %v3381_v63 = vadd.f32 %v3380_v2, %v3354_v22  ;;  %v3520_v43 = vpop.f32.mrf.mxu0  ;;  %v3556_v41 = vpop.f32.mrf.mxu1  ;;  %v5714_v8 = vand.u32 127, %v4169_v38 }
 0x5b0   :  { %v3451_v40 = vpop.f32.mrf.mxu2 }
 0x5b1   :  { %v4098_v61 = vmul.f32 %v5674_v53, %v3381_v63  ;;  %v3494_v28 = vpop.f32.mrf.mxu3  ;;  %v3491_v5 = vadd.f32 %v3490_v26, %v3451_v40  ;;  %v4172_v48 = vadd.s32 4294967288, %v5714_v8  ;;  %v4176_v20 = vadd.s32 4294967280, %v5714_v8 }
 0x5b2   :  { %v4180_v4 = vadd.s32 4294967272, %v5714_v8 }
 0x5b3   :  { %v4132_v39 = vsel %vm1123_vm0, %v4098_v61, 0.0  ;;  %v3521_v32 = vadd.f32 %v3520_v43, %v3491_v5 }
 0x5b4   :  { %4133 = vadd.xlane.f32.xlu1 %v4132_v39 }
 0x5b5   :  { %v3551_v51 = vadd.f32 %v3550_v62, %v3521_v32 }
 0x5b8   :  { %v3459_v47 = vpop.f32.mrf.mxu2  ;;  %v3525_v14 = vpop.f32.mrf.mxu0 }
 0x5b9   :  { %v3495_v37 = vadd.f32 %v3494_v28, %v3459_v47  ;;  %v3610_v42 = vpop.f32.mrf.mxu3 }
 0x5ba   :  { %v4107_v3 = vpop.xlane.xlu1 %4106 }
 0x5bb   :  { %v3526_v25 = vadd.f32 %v3525_v14, %v3495_v37  ;;  %v4171_v31 = vperm.slane %v4107_v3, %v5714_v8 }
 0x5bd   :  { %v3557_v12 = vadd.f32 %v3556_v41, %v3526_v25 }
 0x5c0   :  { %v3583_v56 = vpop.f32.mrf.mxu2 }
 0x5c1   :  { %v3584_v1 = vadd.f32 %v3583_v56, %v3551_v51  ;;  %v3614_v33 = vpop.f32.mrf.mxu3 }
 0x5c2   :  { %v4110_v30 = vpop.xlane.xlu2 %4109 }
 0x5c3   :  { %v3611_v24 = vadd.f32 %v3610_v42, %v3584_v1  ;;  %v4173_v29 = vperm.slane %v4110_v30, %v4172_v48 }
 0x5c5   :  { %v4099_v19 = vmul.f32 %v5674_v53, %v3611_v24  ;;  %v4175_v58 = vsel %vm4174_vm5, %v4173_v29, %v4171_v31 }
 0x5c7   :  { %v4135_v50 = vsel %vm1123_vm0, %v4099_v19, 0.0 }
 0x5c8   :  { %v3587_v35 = vpop.f32.mrf.mxu2  ;;  %4136 = vadd.xlane.f32.xlu1 %v4135_v50 }
 0x5c9   :  { %v3588_v36 = vadd.f32 %v3587_v35, %v3557_v12 }
 0x5cb   :  { %v3615_v7 = vadd.f32 %v3614_v33, %v3588_v36 }
 0x5cd   :  { %v4100_v11 = vmul.f32 %v5674_v53, %v3615_v7 }
 0x5cf   :  { %v4138_v23 = vsel %vm1123_vm0, %v4100_v11, 0.0 }
 0x5d0   :  { %4139 = vadd.xlane.f32.xlu1 %v4138_v23 }
 0x5db   :  { %v4113_v13 = vpop.xlane.xlu0 %4112 }
 0x5dc   :  { %v4177_v45 = vperm.slane %v4113_v13, %v4176_v20 }
 0x5de   :  { %v4179_v57 = vsel %vm4178_vm10, %v4177_v45, %v4175_v58 }
 0x5e3   :  { %v4116_v9 = vpop.xlane.xlu1 %4115 }
 0x5e4   :  { %v4181_v46 = vperm.slane %v4116_v9, %v4180_v4 }
 0x5e6   :  { %v5720_v60 = vsel %vm4182_vm11, %v4181_v46, %v4179_v57  ;;  %v4184_v46 = vadd.s32 4294967264, %v5714_v8 }
 0x5ee   :  { %v3724_v44 = vpop.f32.mrf.mxu1 }
 0x5ef   :  { %v4119_v31 = vpop.xlane.xlu1 %4118 }
 0x5f6   :  { %v3685_v59 = vpop.f32.mrf.mxu0  ;;  %v3728_v21 = vpop.f32.mrf.mxu1 }
 0x5f7   :  { %v3754_v16 = vpop.f32.mrf.mxu2  ;;  %v3725_v52 = vadd.f32 %v3724_v44, %v3685_v59  ;;  %v4122_v29 = vpop.xlane.xlu1 %4121  ;;  %v4188_v44 = vadd.s32 4294967256, %v5714_v8  ;;  %v4192_v59 = vadd.s32 4294967248, %v5714_v8 }
 0x5f8   :  { %v3784_v54 = vpop.f32.mrf.mxu3 }
 0x5f9   :  { %v3755_v17 = vadd.f32 %v3754_v16, %v3725_v52  ;;  %v4185_v16 = vperm.slane %v4119_v31, %v4184_v46  ;;  %v4200_v52 = vadd.s32 4294967232, %v5714_v8 }
 0x5fb   :  { %v3785_v6 = vadd.f32 %v3784_v54, %v3755_v17  ;;  %v4204_v54 = vadd.s32 4294967224, %v5714_v8 }
 0x5fe   :  { %v3693_v15 = vpop.f32.mrf.mxu0  ;;  %v3844_v0 = vpop.f32.mrf.mxu1 }
 0x5ff   :  { %v3729_v55 = vadd.f32 %v3728_v21, %v3693_v15  ;;  %v3759_v27 = vpop.f32.mrf.mxu2  ;;  %v4196_v21 = vadd.s32 4294967240, %v5714_v8  ;;  %v4189_v15 = vperm.slane %v4122_v29, %v4188_v44 }
 0x600   :  { %v3790_v10 = vpop.f32.mrf.mxu3 }
 0x601   :  { %v3760_v26 = vadd.f32 %v3759_v27, %v3729_v55  ;;  %v4208_v55 = vadd.s32 4294967216, %v5714_v8 }
 0x603   :  { %v3791_v22 = vadd.f32 %v3790_v10, %v3760_v26 }
 0x606   :  { %v3817_v18 = vpop.f32.mrf.mxu0  ;;  %v3848_v39 = vpop.f32.mrf.mxu1 }
 0x607   :  { %v3818_v34 = vadd.f32 %v3817_v18, %v3785_v6  ;;  %v4212_v6 = vadd.s32 4294967208, %v5714_v8 }
 0x609   :  { %v3845_v49 = vadd.f32 %v3844_v0, %v3818_v34  ;;  %v4216_v34 = vadd.s32 4294967200, %v5714_v8 }
 0x60b   :  { %v4101_v2 = vmul.f32 %v5674_v53, %v3845_v49  ;;  %v4125_v13 = vpop.xlane.xlu1 %4124 }
 0x60c   :  { %v4193_v17 = vperm.slane %v4125_v13, %v4192_v59 }
 0x60d   :  { %v4141_v63 = vsel %vm1123_vm0, %v4101_v2, 0.0  ;;  %v4220_v2 = vadd.s32 4294967192, %v5714_v8 }
 0x60e   :  { %v3821_v40 = vpop.f32.mrf.mxu0  ;;  %4142 = vadd.xlane.f32.xlu1 %v4141_v63 }
 0x60f   :  { %v3822_v61 = vadd.f32 %v3821_v40, %v3791_v22  ;;  %v4224_v40 = vadd.s32 4294967184, %v5714_v8 }
 0x610   :  { %v4018_v56 = vpop.f32.mrf.mxu1 }
 0x611   :  { %v3849_v28 = vadd.f32 %v3848_v39, %v3822_v61 }
 0x612   :  { %v3958_v5 = vpop.f32.mrf.mxu3 }
 0x613   :  { %v4102_v43 = vmul.f32 %v5674_v53, %v3849_v28  ;;  %v4128_v45 = vpop.xlane.xlu1 %4127 }
 0x614   :  { %v4197_v0 = vperm.slane %v4128_v45, %v4196_v21 }
 0x615   :  { %v4144_v47 = vsel %vm1123_vm0, %v4102_v43, 0.0 }
 0x616   :  { %4145 = vadd.xlane.f32.xlu2 %v4144_v47  ;;  %v3988_v51 = vpop.f32.mrf.mxu0 }
 0x618   :  { %v4024_v36 = vpop.f32.mrf.mxu1 }
 0x61a   :  { %v3919_v62 = vpop.f32.mrf.mxu2  ;;  %v3962_v32 = vpop.f32.mrf.mxu3 }
 0x61b   :  { %v3959_v37 = vadd.f32 %v3958_v5, %v3919_v62  ;;  %v4228_v62 = vadd.s32 4294967176, %v5714_v8 }
 0x61d   :  { %v3989_v14 = vadd.f32 %v3988_v51, %v3959_v37 }
 0x61e   :  { %v3993_v19 = vpop.f32.mrf.mxu0 }
 0x61f   :  { %v4019_v25 = vadd.f32 %v4018_v56, %v3989_v14  ;;  %v4131_v58 = vpop.xlane.xlu1 %4130 }
 0x620   :  { %v4201_v18 = vperm.slane %v4131_v58, %v4200_v52 }
 0x622   :  { %v3927_v42 = vpop.f32.mrf.mxu2  ;;  %v4078_v41 = vpop.f32.mrf.mxu3 }
 0x623   :  { %v3963_v1 = vadd.f32 %v3962_v32, %v3927_v42 }
 0x625   :  { %v3994_v50 = vadd.f32 %v3993_v19, %v3963_v1 }
 0x627   :  { %v4025_v7 = vadd.f32 %v4024_v36, %v3994_v50  ;;  %v4134_v4 = vpop.xlane.xlu1 %4133 }
 0x628   :  { %v4205_v10 = vperm.slane %v4134_v4, %v4204_v54 }
 0x62a   :  { %v4051_v24 = vpop.f32.mrf.mxu2  ;;  %v4082_v48 = vpop.f32.mrf.mxu3 }
 0x62b   :  { %v4052_v12 = vadd.f32 %v4051_v24, %v4019_v25 }
 0x62d   :  { %v4079_v35 = vadd.f32 %v4078_v41, %v4052_v12 }
 0x62f   :  { %v4103_v33 = vmul.f32 %v5674_v53, %v4079_v35 }
 0x631   :  { %v4147_v11 = vsel %vm1123_vm0, %v4103_v33, 0.0 }
 0x632   :  { %v4055_v23 = vpop.f32.mrf.mxu2  ;;  %4148 = vadd.xlane.f32.xlu1 %v4147_v11 }
 0x633   :  { %v4056_v38 = vadd.f32 %v4055_v23, %v4025_v7 }
 0x635   :  { %v4083_v3 = vadd.f32 %v4082_v48, %v4056_v38 }
 0x637   :  { %v4104_v30 = vmul.f32 %v5674_v53, %v4083_v3 }
 0x639   :  { %v4150_v20 = vsel %vm1123_vm0, %v4104_v30, 0.0  ;;  %vm4186_vm0 = vcmask 326912  }
 0x63a   :  { %4151 = vadd.xlane.f32.xlu2 %v4150_v20  ;;  %v4187_v27 = vsel %vm4186_vm0, %v4185_v16, %v5720_v60 }
 0x63b   :  { %v4137_v57 = vpop.xlane.xlu1 %4136  ;;  %v4191_v49 = vsel %vm4190_vm12, %v4189_v15, %v4187_v27 }
 0x63c   :  { %v4195_v22 = vsel %vm4194_vm13, %v4193_v17, %v4191_v49  ;;  %v4209_v63 = vperm.slane %v4137_v57, %v4208_v55 }
 0x63d   :  { %v4199_v61 = vsel %vm4198_vm14, %v4197_v0, %v4195_v22 }
 0x63e   :  { %v4203_v60 = vsel %vm4202_vm15, %v4201_v18, %v4199_v61 }
 0x63f   :  { %v4207_v5 = vsel %vm4206_vm1, %v4205_v10, %v4203_v60 }
 0x640   :  { %v4211_v32 = vsel %vm4210_vm2, %v4209_v63, %v4207_v5 }
 0x643   :  { %v4140_v9 = vpop.xlane.xlu1 %4139 }
 0x644   :  { %v4213_v39 = vperm.slane %v4140_v9, %v4212_v6 }
 0x646   :  { %v4215_v51 = vsel %vm4214_vm3, %v4213_v39, %v4211_v32 }
 0x681   :  { %v4143_v53 = vpop.xlane.xlu1 %4142 }
 0x682   :  { %v4217_v43 = vperm.slane %v4143_v53, %v4216_v34 }
 0x684   :  { %v4219_v42 = vsel %vm4218_vm4, %v4217_v43, %v4215_v51 }
 0x689   :  { %v4146_v26 = vpop.xlane.xlu2 %4145 }
 0x68a   :  { %v4221_v47 = vperm.slane %v4146_v26, %v4220_v2 }
 0x68c   :  { %v4223_v56 = vsel %vm4222_vm6, %v4221_v47, %v4219_v42 }
 0x6a5   :  { %v4149_v28 = vpop.xlane.xlu1 %4148 }
 0x6a6   :  { %v4225_v37 = vperm.slane %v4149_v28, %v4224_v40 }
 0x6a8   :  { %v4227_v25 = vsel %vm4226_vm7, %v4225_v37, %v4223_v56 }
 0x6ad   :  { %v4152_v14 = vpop.xlane.xlu2 %4151 }
 0x6ae   :  { %v4229_v1 = vperm.slane %v4152_v14, %v4228_v62 }
 0x6b0   :  { %v4231_v8 = vsel %vm4230_vm8, %v4229_v1, %v4227_v25 }
 0x6b1   :  { %4233 = vst [vmem:[#allocation5] sm:$0x1] %v4231_v8 }
 0x6b2   :  { %4244 = dma.vmem_to_hbm [thread:$0]  %s4240_s26, 16, %s4242_s29, [#allocation4]  }
 0x6b3   :  { %4391 = dma.done.wait [#allocation4], 16  }
 0x6b4   :  { %4392 = vsyncadd [#allocation4], 4294967280 }
 0x6b5   :  { %4249 = vsyncpa [#allocation3], 1 }
 0x6b6   :  { %4250 = vsyncpa [#allocation4], 1 }

</bundles_post_ra>
